<compile_context>
chip_gen: v6e
topology: v6e:2x2x1
jax: 0.10.0
libtpu: 0.0.40
codegen_flags: <defaults>
</compile_context>

<pallas_src>
import functools

import numpy as np
import jax
import jax.numpy as jnp
from jax.experimental import pallas as pl
from jax.experimental.pallas import tpu as pltpu


# --------------------------------------------------------------------------
# Fused kernel: up (ConvT) -> up_conv x3 -> down (Conv) residual -> down_conv x3
# One grid step = one block of `nb` images folded along the row dimension.
# --------------------------------------------------------------------------
def _brm_kernel(x_ref, u_ref, d_ref, bup_ref, bdn_ref,
                b_up_ref, b_dn_ref, b_upc_ref, b_dnc_ref, alpha_ref,
                up_out_ref, out_ref, up_pad, base_pad, *, nb, h, s):
    f32 = jnp.float32
    bf16 = jnp.bfloat16
    WC = x_ref.shape[1]               # W * C   (base row width, lane-dense)
    RW = bup_ref.shape[-1]            # Ws * C  (upsampled row width)
    hs = h * s                        # upsampled rows per image
    # Padded buffers: [halo0 | img0 rows | sep | img1 rows | sep | ...]
    # M for the dense tap matmuls = all padded rows except first and last.
    m_up = nb * (hs + 1) - 1
    m_dn = nb * (h + 1) - 1

    def prelu(v, a):
        return jnp.where(v >= 0, v, a * v)

    x = x_ref[...]                                                   # (nb*h, WC) f32
    xb = x.astype(bf16)

    # ---- up = PReLU(ConvTranspose2d(k=s, stride=s)(x))   [super-row layout] --
    up0 = jnp.dot(xb, u_ref[...], preferred_element_type=f32) + b_up_ref[...]
    up0 = prelu(up0, alpha_ref[0, 0])                                # (nb*h, s*RW)

    # ---- out0 = x - PReLU(Conv2d(k=s, stride=s)(up))  (residual branch) ------
    dn = jnp.dot(up0.astype(bf16), d_ref[...], preferred_element_type=f32)
    out0 = x - prelu(dn + b_dn_ref[...], alpha_ref[0, 1])            # (nb*h, WC)

    # ---- zero only the halo / separator rows (interiors always overwritten) --
    zu = jnp.zeros((1, RW), f32)
    zb = jnp.zeros((1, WC), f32)
    up_pad[0:1, :] = zu
    base_pad[0:1, :] = zb
    for i in range(nb):
        up_pad[(i + 1) * (hs + 1):(i + 1) * (hs + 1) + 1, :] = zu
        base_pad[(i + 1) * (h + 1):(i + 1) * (h + 1) + 1, :] = zb

    # ---- scatter up0 (super-row) into the flat padded buffer -----------------
    # flat[r*s + j, :] = up0[r, j*RW:(j+1)*RW] realized as s tiny 0/1 perm dots.
    t_ids = jax.lax.broadcasted_iota(jnp.int32, (hs, h), 0)
    r_ids = jax.lax.broadcasted_iota(jnp.int32, (hs, h), 1)
    perm = [jnp.where(t_ids == r_ids * s + j,
                      jnp.float32(1), jnp.float32(0)).astype(bf16)
            for j in range(s)]

    for i in range(nb):
        yi = up0[i * h:(i + 1) * h, :].astype(bf16)                  # (h, s*RW)
        flat = jnp.dot(perm[0], yi[:, 0:RW], preferred_element_type=f32)
        for j in range(1, s):
            flat = flat + jnp.dot(perm[j], yi[:, j * RW:(j + 1) * RW],
                                  preferred_element_type=f32)
        up_pad[1 + i * (hs + 1):1 + i * (hs + 1) + hs, :] = flat
        base_pad[1 + i * (h + 1):1 + i * (h + 1) + h, :] = out0[i * h:(i + 1) * h, :]

    # ---- up_conv: 3 x (3x3 conv pad=1 + PReLU) in flat sub-row layout --------
    for layer in range(3):
        acc = jnp.dot(up_pad[0:m_up, :].astype(bf16), bup_ref[layer, 0],
                      preferred_element_type=f32) + b_upc_ref[layer:layer + 1, :]
        for kh in range(1, 3):
            acc = acc + jnp.dot(up_pad[kh:kh + m_up, :].astype(bf16),
                                bup_ref[layer, kh], preferred_element_type=f32)
        acc = prelu(acc, alpha_ref[0, 2 + layer])
        for i in range(nb):
            src = acc[i * (hs + 1):i * (hs + 1) + hs, :]
            if layer < 2:
                up_pad[1 + i * (hs + 1):1 + i * (hs + 1) + hs, :] = src
            else:
                up_out_ref[i * hs:(i + 1) * hs, :] = src.astype(up_out_ref.dtype)

    # ---- down_conv: 3 x (3x3 conv pad=1 + PReLU), then out = out0 + down -----
    for layer in range(3):
        acc = jnp.dot(base_pad[0:m_dn, :].astype(bf16), bdn_ref[layer, 0],
                      preferred_element_type=f32) + b_dnc_ref[layer:layer + 1, :]
        for kh in range(1, 3):
            acc = acc + jnp.dot(base_pad[kh:kh + m_dn, :].astype(bf16),
                                bdn_ref[layer, kh], preferred_element_type=f32)
        acc = prelu(acc, alpha_ref[0, 5 + layer])
        for i in range(nb):
            src = acc[i * (h + 1):i * (h + 1) + h, :]
            if layer < 2:
                base_pad[1 + i * (h + 1):1 + i * (h + 1) + h, :] = src
            else:
                out_ref[i * h:(i + 1) * h, :] = \
                    (out0[i * h:(i + 1) * h, :] + src).astype(out_ref.dtype)


# --------------------------------------------------------------------------
# Grid selection: split across the 2 TensorCores only on a 2-TC chip (v7x);
# on single-TC chips fold the whole batch into M so weights are pushed once.
# --------------------------------------------------------------------------
def _default_grid_blocks(n):
    kind = ""
    try:
        kind = jax.devices()[0].device_kind.lower().replace(" ", "")
    except Exception:
        pass
    g = 2 if ("v7" in kind or "tpu7" in kind) else 1
    return g if (g > 0 and n % g == 0) else 1


# --------------------------------------------------------------------------
# brm forward: NCHW in/out (PyTorch convention); one pallas_call inside.
# --------------------------------------------------------------------------
def brm_forward(x_nchw, prep, *, feat, scale, grid_blocks=None):
    N, C, H, W = x_nchw.shape
    s = scale
    Hs, Ws = H * s, W * s
    WC = W * C
    RW = Ws * C

    G = grid_blocks if grid_blocks is not None else _default_grid_blocks(N)
    if N % G:
        G = 1
    NB = N // G                       # images folded into each grid block

    # NCHW -> row layout (N*H, W*C); channels lane-minor.
    x_rows = jnp.transpose(x_nchw, (0, 2, 3, 1)).reshape(N * H, WC)

    kernel = functools.partial(_brm_kernel, nb=NB, h=H, s=s)
    call = pl.pallas_call(
        kernel,
        grid=(G,),
        out_shape=(jax.ShapeDtypeStruct((N * Hs, RW), jnp.float32),
                   jax.ShapeDtypeStruct((N * H, WC), jnp.float32)),
        in_specs=[
            pl.BlockSpec((NB * H, WC), lambda g: (g, 0)),            # x rows
            pl.BlockSpec((WC, s * RW), lambda g: (0, 0)),            # U (bf16)
            pl.BlockSpec((s * RW, WC), lambda g: (0, 0)),            # D (bf16)
            pl.BlockSpec((3, 3, RW, RW), lambda g: (0, 0, 0, 0)),    # up_conv taps
            pl.BlockSpec((3, 3, WC, WC), lambda g: (0, 0, 0, 0)),    # down_conv taps
            pl.BlockSpec((1, s * RW), lambda g: (0, 0)),             # up bias row
            pl.BlockSpec((1, WC), lambda g: (0, 0)),                 # down bias row
            pl.BlockSpec((3, RW), lambda g: (0, 0)),                 # up_conv biases
            pl.BlockSpec((3, WC), lambda g: (0, 0)),                 # down_conv biases
            pl.BlockSpec((1, 8), lambda g: (0, 0),
                         memory_space=pltpu.MemorySpace.SMEM),       # PReLU alphas
        ],
        out_specs=(pl.BlockSpec((NB * Hs, RW), lambda g: (g, 0)),
                   pl.BlockSpec((NB * H, WC), lambda g: (g, 0))),
        scratch_shapes=[pltpu.VMEM((NB * (Hs + 1) + 1, RW), jnp.float32),  # up buf
                        pltpu.VMEM((NB * (H + 1) + 1, WC), jnp.float32)],  # base buf
        compiler_params=pltpu.CompilerParams(
            dimension_semantics=("parallel",)),                      # v7x megacore
    )
    up_flat, out_rows = call(x_rows, prep["U"], prep["D"], prep["Bup"], prep["Bdn"],
                             prep["b_up"], prep["b_dn"], prep["b_upc"],
                             prep["b_dnc"], prep["alphas"])

    # row layout -> NCHW (boundary glue only; cheap at these sizes)
    up = up_flat.reshape(N, Hs, Ws, C).transpose(0, 3, 1, 2)
    out = out_rows.reshape(N, H, W, C).transpose(0, 3, 1, 2)
    return up, out


# --------------------------------------------------------------------------
# One-time weight preprocessing (hoisted out of the hot path).
# Builds the dense row-matrices that realize each conv exactly; bf16 for MXU.
# --------------------------------------------------------------------------
def prepare_params(p, feat, scale, H, W):
    C, s = feat, scale
    Ws = W * s
    WC = W * C
    RW = Ws * C

    # up: ConvTranspose2d(C, C, s, stride=s)  ->  (WC, s*RW)
    Wt = np.asarray(p["up_w"], np.float32)            # (Cin, Cout, kh, kw)
    U = np.zeros((WC, s * RW), np.float32)
    for w in range(W):
        for ih in range(s):
            for iw in range(s):
                col = ih * RW + (w * s + iw) * C
                U[w * C:(w + 1) * C, col:col + C] = Wt[:, :, ih, iw]        # (ci,co)

    # down: Conv2d(C, C, s, stride=s)  ->  (s*RW, WC)
    Wd = np.asarray(p["down_w"], np.float32)          # (Cout, Cin, kh, kw)
    D = np.zeros((s * RW, WC), np.float32)
    for wo in range(W):
        for ih in range(s):
            for iw in range(s):
                row = ih * RW + (wo * s + iw) * C
                D[row:row + C, wo * C:(wo + 1) * C] = Wd[:, :, ih, iw].T    # (ci,co)

    # 3x3 conv (pad=1) -> 3 banded tap matrices, one per kh
    def band(w_oihw, width):
        wgt = np.asarray(w_oihw, np.float32)          # (Cout, Cin, 3, 3)
        B = np.zeros((3, width * C, width * C), np.float32)
        for kh in range(3):
            for kw in range(3):
                blk = wgt[:, :, kh, kw].T             # (ci, co)
                for wo in range(width):
                    wi = wo + kw - 1
                    if 0 <= wi < width:
                        B[kh, wi * C:(wi + 1) * C, wo * C:(wo + 1) * C] = blk
        return B

    Bup = np.stack([band(p["up_conv_w"][i], Ws) for i in range(3)])   # (3,3,RW,RW)
    Bdn = np.stack([band(p["down_conv_w"][i], W) for i in range(3)])  # (3,3,WC,WC)

    b_up = np.tile(np.asarray(p["up_b"], np.float32), s * Ws)[None, :]   # (1, s*RW)
    b_dn = np.tile(np.asarray(p["down_b"], np.float32), W)[None, :]      # (1, WC)
    b_upc = np.stack([np.tile(np.asarray(p["up_conv_b"][i], np.float32), Ws)
                      for i in range(3)])                                 # (3, RW)
    b_dnc = np.stack([np.tile(np.asarray(p["down_conv_b"][i], np.float32), W)
                      for i in range(3)])                                 # (3, WC)

    alphas = np.array([float(p["up_a"]), float(p["down_a"])]
                      + [float(p["up_conv_a"][i]) for i in range(3)]
                      + [float(p["down_conv_a"][i]) for i in range(3)],
                      np.float32)[None, :]                                # (1, 8)

    return {
        "U": jnp.asarray(U, jnp.bfloat16),    # MXU operands in bf16
        "D": jnp.asarray(D, jnp.bfloat16),
        "Bup": jnp.asarray(Bup, jnp.bfloat16),
        "Bdn": jnp.asarray(Bdn, jnp.bfloat16),
        "b_up": jnp.asarray(b_up),            # biases / alphas stay f32
        "b_dn": jnp.asarray(b_dn),
        "b_upc": jnp.asarray(b_upc),
        "b_dnc": jnp.asarray(b_dnc),
        "alphas": jnp.asarray(alphas),
    }


# --------------------------------------------------------------------------
# Deterministic parameter init (shapes follow the PyTorch module __init__)
# --------------------------------------------------------------------------
def init_params(key, feat, scale):
    ks = jax.random.split(key, 16)
    w = lambda k, shape: (0.05 * jax.random.normal(k, shape)).astype(jnp.float32)
    p = {
        "up_w": w(ks[0], (feat, feat, scale, scale)),   # ConvTranspose2d (in,out,kh,kw)
        "up_b": w(ks[1], (feat,)),
        "up_a": jnp.float32(0.25),                      # PReLU default init
        "down_w": w(ks[2], (feat, feat, scale, scale)), # Conv2d (out,in,kh,kw)
        "down_b": w(ks[3], (feat,)),
        "down_a": jnp.float32(0.25),
        "up_conv_w": [w(ks[4 + i], (feat, feat, 3, 3)) for i in range(3)],
        "up_conv_b": [w(ks[7 + i], (feat,)) for i in range(3)],
        "up_conv_a": [jnp.float32(0.25)] * 3,
        "down_conv_w": [w(ks[10 + i], (feat, feat, 3, 3)) for i in range(3)],
        "down_conv_b": [w(ks[13 + i], (feat,)) for i in range(3)],
        "down_conv_a": [jnp.float32(0.25)] * 3,
    }
    return p


# --------------------------------------------------------------------------
# Pure-JAX reference (XLA convs) — used only for the correctness assert.
# --------------------------------------------------------------------------
def brm_reference(x, p, feat, scale):
    s = scale
    N, C, H, W = x.shape
    hp = jax.lax.Precision.HIGHEST
    act = lambda v, a: jnp.where(v >= 0, v, a * v)

    up_out = jnp.einsum("nchw,cdij->ndhiwj", x, p["up_w"], precision=hp)
    up_out = up_out.reshape(N, C, H * s, W * s) + p["up_b"][None, :, None, None]
    up_out = act(up_out, p["up_a"])

    def conv3(v, wgt, b, a):
        y = jax.lax.conv_general_dilated(
            v, wgt, (1, 1), ((1, 1), (1, 1)),
            dimension_numbers=("NCHW", "OIHW", "NCHW"), precision=hp)
        return act(y + b[None, :, None, None], a)

    up = up_out
    for i in range(3):
        up = conv3(up, p["up_conv_w"][i], p["up_conv_b"][i], p["up_conv_a"][i])

    ur = up_out.reshape(N, C, H, s, W, s)
    dn = jnp.einsum("nchiwj,dcij->ndhw", ur, p["down_w"], precision=hp)
    out = x - act(dn + p["down_b"][None, :, None, None], p["down_a"])

    down = out
    for i in range(3):
        down = conv3(down, p["down_conv_w"][i], p["down_conv_b"][i],
                     p["down_conv_a"][i])
    return up, out + down


if __name__ == "__main__":
    FEAT, SCALE = 8, 2
    N, H, W = 2, 16, 16

    key = jax.random.PRNGKey(0)
    kx, kp = jax.random.split(key)
    x = jax.random.normal(kx, (N, FEAT, H, W), dtype=jnp.float32)   # NCHW like PyTorch
    params = init_params(kp, FEAT, SCALE)
    prep = prepare_params(params, FEAT, SCALE, H, W)   # one-time, outside hot path

    fwd = jax.jit(functools.partial(brm_forward, feat=FEAT, scale=SCALE))
    up, out = fwd(x, prep)
    jax.block_until_ready((up, out))

    assert up.shape == (N, FEAT, H * SCALE, W * SCALE)
    assert out.shape == (N, FEAT, H, W)
    assert up.dtype == jnp.float32 and out.dtype == jnp.float32

    ref_up, ref_out = brm_reference(x, params, FEAT, SCALE)
    assert jnp.allclose(up, ref_up, atol=2e-2, rtol=2e-2), \
        float(jnp.max(jnp.abs(up - ref_up)))
    assert jnp.allclose(out, ref_out, atol=2e-2, rtol=2e-2), \
        float(jnp.max(jnp.abs(out - ref_out)))
    print("KERNEL_OK")
</pallas_src>

<mosaic_0001>
module attributes {stable_mosaic.version = 11 : i64} {
  func.func @_brm_kernel(%arg0: i32, %arg1: memref<32x128xf32, #tpu.memory_space<vmem>>, %arg2: memref<128x512xbf16, #tpu.memory_space<vmem>>, %arg3: memref<512x128xbf16, #tpu.memory_space<vmem>>, %arg4: memref<3x3x256x256xbf16, #tpu.memory_space<vmem>>, %arg5: memref<3x3x128x128xbf16, #tpu.memory_space<vmem>>, %arg6: memref<1x512xf32, #tpu.memory_space<vmem>>, %arg7: memref<1x128xf32, #tpu.memory_space<vmem>>, %arg8: memref<3x256xf32, #tpu.memory_space<vmem>>, %arg9: memref<3x128xf32, #tpu.memory_space<vmem>>, %arg10: memref<1x8xf32, #tpu.memory_space<smem>>, %arg11: memref<64x256xf32, #tpu.memory_space<vmem>>, %arg12: memref<32x128xf32, #tpu.memory_space<vmem>>, %arg13: memref<67x256xf32, #tpu.memory_space<vmem>>, %arg14: memref<35x128xf32, #tpu.memory_space<vmem>>) attributes {dimension_semantics = [#tpu.dimension_semantics<parallel>], iteration_bounds = array<i64: 1>, scalar_prefetch = 0 : i64, scratch_operands = 2 : i64, tpu.core_type = #tpu.core_type<tc>, window_params = [{transform_indices = @transform_0, window_bounds = array<i64: 32, 128>}, {pipeline_mode = #tpu.pipeline_mode<synchronous>, transform_indices = @transform_1, window_bounds = array<i64: 128, 512>}, {pipeline_mode = #tpu.pipeline_mode<synchronous>, transform_indices = @transform_2, window_bounds = array<i64: 512, 128>}, {pipeline_mode = #tpu.pipeline_mode<synchronous>, transform_indices = @transform_3, window_bounds = array<i64: 3, 3, 256, 256>}, {pipeline_mode = #tpu.pipeline_mode<synchronous>, transform_indices = @transform_4, window_bounds = array<i64: 3, 3, 128, 128>}, {pipeline_mode = #tpu.pipeline_mode<synchronous>, transform_indices = @transform_5, window_bounds = array<i64: 1, 512>}, {pipeline_mode = #tpu.pipeline_mode<synchronous>, transform_indices = @transform_6, window_bounds = array<i64: 1, 128>}, {pipeline_mode = #tpu.pipeline_mode<synchronous>, transform_indices = @transform_7, window_bounds = array<i64: 3, 256>}, {pipeline_mode = #tpu.pipeline_mode<synchronous>, transform_indices = @transform_8, window_bounds = array<i64: 3, 128>}, {transform_indices = @transform_9, window_bounds = array<i64: 1, 8>}, {transform_indices = @transform_10, window_bounds = array<i64: 64, 256>}, {transform_indices = @transform_11, window_bounds = array<i64: 32, 128>}]} {
    %c0 = arith.constant 0 : index
    %c0_0 = arith.constant 0 : index
    %0 = vector.load %arg1[%c0, %c0_0] : memref<32x128xf32, #tpu.memory_space<vmem>>, vector<32x128xf32>
    %1 = arith.truncf %0 : vector<32x128xf32> to vector<32x128xbf16>
    %c0_1 = arith.constant 0 : index
    %c0_2 = arith.constant 0 : index
    %2 = vector.load %arg2[%c0_1, %c0_2] : memref<128x512xbf16, #tpu.memory_space<vmem>>, vector<128x512xbf16>
    %cst = arith.constant dense<0.000000e+00> : vector<32x512xf32>
    %3 = tpu.matmul %1, %2, %cst {dimension_numbers = #tpu.dot_dimension_numbers<[1], [0], [0], [1], [0, 0, 1, 1], [], []>} : vector<32x128xbf16>, vector<128x512xbf16>, vector<32x512xf32> -> vector<32x512xf32>
    %c0_3 = arith.constant 0 : index
    %c0_4 = arith.constant 0 : index
    %4 = vector.load %arg6[%c0_3, %c0_4] : memref<1x512xf32, #tpu.memory_space<vmem>>, vector<1x512xf32>
    %5 = vector.broadcast %4 : vector<1x512xf32> to vector<32x512xf32>
    %6 = arith.addf %3, %5 : vector<32x512xf32>
    %c0_5 = arith.constant 0 : index
    %c0_6 = arith.constant 0 : index
    %7 = memref.load %arg10[%c0_5, %c0_6] : memref<1x8xf32, #tpu.memory_space<smem>>
    %cst_7 = arith.constant 0.000000e+00 : f32
    %8 = vector.broadcast %cst_7 : f32 to vector<32x512xf32>
    %9 = arith.cmpf oge, %6, %8 : vector<32x512xf32>
    %10 = vector.broadcast %7 : f32 to vector<32x512xf32>
    %11 = arith.mulf %10, %6 : vector<32x512xf32>
    %12 = arith.select %9, %6, %11 : vector<32x512xi1>, vector<32x512xf32>
    %13 = arith.truncf %12 : vector<32x512xf32> to vector<32x512xbf16>
    %c0_8 = arith.constant 0 : index
    %c0_9 = arith.constant 0 : index
    %14 = vector.load %arg3[%c0_8, %c0_9] : memref<512x128xbf16, #tpu.memory_space<vmem>>, vector<512x128xbf16>
    %cst_10 = arith.constant dense<0.000000e+00> : vector<32x128xf32>
    %15 = tpu.matmul %13, %14, %cst_10 {dimension_numbers = #tpu.dot_dimension_numbers<[1], [0], [0], [1], [0, 0, 1, 1], [], []>} : vector<32x512xbf16>, vector<512x128xbf16>, vector<32x128xf32> -> vector<32x128xf32>
    %c0_11 = arith.constant 0 : index
    %c0_12 = arith.constant 0 : index
    %16 = vector.load %arg7[%c0_11, %c0_12] : memref<1x128xf32, #tpu.memory_space<vmem>>, vector<1x128xf32>
    %17 = vector.broadcast %16 : vector<1x128xf32> to vector<32x128xf32>
    %18 = arith.addf %15, %17 : vector<32x128xf32>
    %c0_13 = arith.constant 0 : index
    %c1 = arith.constant 1 : index
    %19 = memref.load %arg10[%c0_13, %c1] : memref<1x8xf32, #tpu.memory_space<smem>>
    %cst_14 = arith.constant 0.000000e+00 : f32
    %20 = vector.broadcast %cst_14 : f32 to vector<32x128xf32>
    %21 = arith.cmpf oge, %18, %20 : vector<32x128xf32>
    %22 = vector.broadcast %19 : f32 to vector<32x128xf32>
    %23 = arith.mulf %22, %18 : vector<32x128xf32>
    %24 = arith.select %21, %18, %23 : vector<32x128xi1>, vector<32x128xf32>
    %25 = arith.subf %0, %24 : vector<32x128xf32>
    %cst_15 = arith.constant 0.000000e+00 : f32
    %26 = vector.broadcast %cst_15 : f32 to vector<1x256xf32>
    %cst_16 = arith.constant 0.000000e+00 : f32
    %27 = vector.broadcast %cst_16 : f32 to vector<1x128xf32>
    %c0_17 = arith.constant 0 : index
    %c0_18 = arith.constant 0 : index
    %28 = vector.load %arg13[%c0_17, %c0_18] : memref<67x256xf32, #tpu.memory_space<vmem>>, vector<1x256xf32>
    tpu.vector_store %arg13[%c0_17, %c0_18], %26 {strides = array<i32>} : memref<67x256xf32, #tpu.memory_space<vmem>>, vector<1x256xf32>,
    %c0_19 = arith.constant 0 : index
    %c0_20 = arith.constant 0 : index
    %29 = vector.load %arg14[%c0_19, %c0_20] : memref<35x128xf32, #tpu.memory_space<vmem>>, vector<1x128xf32>
    tpu.vector_store %arg14[%c0_19, %c0_20], %27 {strides = array<i32>} : memref<35x128xf32, #tpu.memory_space<vmem>>, vector<1x128xf32>,
    %c33 = arith.constant 33 : index
    %c0_21 = arith.constant 0 : index
    %30 = vector.load %arg13[%c33, %c0_21] : memref<67x256xf32, #tpu.memory_space<vmem>>, vector<1x256xf32>
    tpu.vector_store %arg13[%c33, %c0_21], %26 {strides = array<i32>} : memref<67x256xf32, #tpu.memory_space<vmem>>, vector<1x256xf32>,
    %c17 = arith.constant 17 : index
    %c0_22 = arith.constant 0 : index
    %31 = vector.load %arg14[%c17, %c0_22] : memref<35x128xf32, #tpu.memory_space<vmem>>, vector<1x128xf32>
    tpu.vector_store %arg14[%c17, %c0_22], %27 {strides = array<i32>} : memref<35x128xf32, #tpu.memory_space<vmem>>, vector<1x128xf32>,
    %c66 = arith.constant 66 : index
    %c0_23 = arith.constant 0 : index
    %32 = vector.load %arg13[%c66, %c0_23] : memref<67x256xf32, #tpu.memory_space<vmem>>, vector<1x256xf32>
    tpu.vector_store %arg13[%c66, %c0_23], %26 {strides = array<i32>} : memref<67x256xf32, #tpu.memory_space<vmem>>, vector<1x256xf32>,
    %c34 = arith.constant 34 : index
    %c0_24 = arith.constant 0 : index
    %33 = vector.load %arg14[%c34, %c0_24] : memref<35x128xf32, #tpu.memory_space<vmem>>, vector<1x128xf32>
    tpu.vector_store %arg14[%c34, %c0_24], %27 {strides = array<i32>} : memref<35x128xf32, #tpu.memory_space<vmem>>, vector<1x128xf32>,
    %34 = tpu.iota {dimensions = array<i32: 0>} : vector<32x16xi32>
    %35 = tpu.iota {dimensions = array<i32: 1>} : vector<32x16xi32>
    %c2_i32 = arith.constant 2 : i32
    %36 = vector.broadcast %c2_i32 : i32 to vector<32x16xi32>
    %37 = arith.muli %35, %36 : vector<32x16xi32>
    %c0_i32 = arith.constant 0 : i32
    %38 = vector.broadcast %c0_i32 : i32 to vector<32x16xi32>
    %39 = arith.addi %37, %38 : vector<32x16xi32>
    %40 = arith.cmpi eq, %34, %39 : vector<32x16xi32>
    %cst_25 = arith.constant 1.000000e+00 : f32
    %cst_26 = arith.constant 0.000000e+00 : f32
    %41 = vector.broadcast %cst_25 : f32 to vector<32x16xf32>
    %42 = vector.broadcast %cst_26 : f32 to vector<32x16xf32>
    %43 = arith.select %40, %41, %42 : vector<32x16xi1>, vector<32x16xf32>
    %44 = arith.truncf %43 : vector<32x16xf32> to vector<32x16xbf16>
    %c2_i32_27 = arith.constant 2 : i32
    %45 = vector.broadcast %c2_i32_27 : i32 to vector<32x16xi32>
    %46 = arith.muli %35, %45 : vector<32x16xi32>
    %c1_i32 = arith.constant 1 : i32
    %47 = vector.broadcast %c1_i32 : i32 to vector<32x16xi32>
    %48 = arith.addi %46, %47 : vector<32x16xi32>
    %49 = arith.cmpi eq, %34, %48 : vector<32x16xi32>
    %cst_28 = arith.constant 1.000000e+00 : f32
    %cst_29 = arith.constant 0.000000e+00 : f32
    %50 = vector.broadcast %cst_28 : f32 to vector<32x16xf32>
    %51 = vector.broadcast %cst_29 : f32 to vector<32x16xf32>
    %52 = arith.select %49, %50, %51 : vector<32x16xi1>, vector<32x16xf32>
    %53 = arith.truncf %52 : vector<32x16xf32> to vector<32x16xbf16>
    %54 = vector.extract_strided_slice %12 {offsets = [0, 0], sizes = [16, 512], strides = [1, 1]} : vector<32x512xf32> to vector<16x512xf32>
    %55 = arith.truncf %54 : vector<16x512xf32> to vector<16x512xbf16>
    %56 = vector.extract_strided_slice %55 {offsets = [0, 0], sizes = [16, 256], strides = [1, 1]} : vector<16x512xbf16> to vector<16x256xbf16>
    %cst_30 = arith.constant dense<0.000000e+00> : vector<32x256xf32>
    %57 = tpu.matmul %44, %56, %cst_30 {dimension_numbers = #tpu.dot_dimension_numbers<[1], [0], [0], [1], [0, 0, 1, 1], [], []>} : vector<32x16xbf16>, vector<16x256xbf16>, vector<32x256xf32> -> vector<32x256xf32>
    %58 = vector.extract_strided_slice %55 {offsets = [0, 256], sizes = [16, 256], strides = [1, 1]} : vector<16x512xbf16> to vector<16x256xbf16>
    %cst_31 = arith.constant dense<0.000000e+00> : vector<32x256xf32>
    %59 = tpu.matmul %53, %58, %cst_31 {dimension_numbers = #tpu.dot_dimension_numbers<[1], [0], [0], [1], [0, 0, 1, 1], [], []>} : vector<32x16xbf16>, vector<16x256xbf16>, vector<32x256xf32> -> vector<32x256xf32>
    %60 = arith.addf %57, %59 : vector<32x256xf32>
    %c1_32 = arith.constant 1 : index
    %c0_33 = arith.constant 0 : index
    %61 = vector.load %arg13[%c1_32, %c0_33] : memref<67x256xf32, #tpu.memory_space<vmem>>, vector<32x256xf32>
    tpu.vector_store %arg13[%c1_32, %c0_33], %60 {strides = array<i32>} : memref<67x256xf32, #tpu.memory_space<vmem>>, vector<32x256xf32>,
    %62 = vector.extract_strided_slice %25 {offsets = [0, 0], sizes = [16, 128], strides = [1, 1]} : vector<32x128xf32> to vector<16x128xf32>
    %c1_34 = arith.constant 1 : index
    %c0_35 = arith.constant 0 : index
    %63 = vector.load %arg14[%c1_34, %c0_35] : memref<35x128xf32, #tpu.memory_space<vmem>>, vector<16x128xf32>
    tpu.vector_store %arg14[%c1_34, %c0_35], %62 {strides = array<i32>} : memref<35x128xf32, #tpu.memory_space<vmem>>, vector<16x128xf32>,
    %64 = vector.extract_strided_slice %12 {offsets = [16, 0], sizes = [16, 512], strides = [1, 1]} : vector<32x512xf32> to vector<16x512xf32>
    %65 = arith.truncf %64 : vector<16x512xf32> to vector<16x512xbf16>
    %66 = vector.extract_strided_slice %65 {offsets = [0, 0], sizes = [16, 256], strides = [1, 1]} : vector<16x512xbf16> to vector<16x256xbf16>
    %cst_36 = arith.constant dense<0.000000e+00> : vector<32x256xf32>
    %67 = tpu.matmul %44, %66, %cst_36 {dimension_numbers = #tpu.dot_dimension_numbers<[1], [0], [0], [1], [0, 0, 1, 1], [], []>} : vector<32x16xbf16>, vector<16x256xbf16>, vector<32x256xf32> -> vector<32x256xf32>
    %68 = vector.extract_strided_slice %65 {offsets = [0, 256], sizes = [16, 256], strides = [1, 1]} : vector<16x512xbf16> to vector<16x256xbf16>
    %cst_37 = arith.constant dense<0.000000e+00> : vector<32x256xf32>
    %69 = tpu.matmul %53, %68, %cst_37 {dimension_numbers = #tpu.dot_dimension_numbers<[1], [0], [0], [1], [0, 0, 1, 1], [], []>} : vector<32x16xbf16>, vector<16x256xbf16>, vector<32x256xf32> -> vector<32x256xf32>
    %70 = arith.addf %67, %69 : vector<32x256xf32>
    %c34_38 = arith.constant 34 : index
    %c0_39 = arith.constant 0 : index
    %71 = vector.load %arg13[%c34_38, %c0_39] : memref<67x256xf32, #tpu.memory_space<vmem>>, vector<32x256xf32>
    tpu.vector_store %arg13[%c34_38, %c0_39], %70 {strides = array<i32>} : memref<67x256xf32, #tpu.memory_space<vmem>>, vector<32x256xf32>,
    %72 = vector.extract_strided_slice %25 {offsets = [16, 0], sizes = [16, 128], strides = [1, 1]} : vector<32x128xf32> to vector<16x128xf32>
    %c18 = arith.constant 18 : index
    %c0_40 = arith.constant 0 : index
    %73 = vector.load %arg14[%c18, %c0_40] : memref<35x128xf32, #tpu.memory_space<vmem>>, vector<16x128xf32>
    tpu.vector_store %arg14[%c18, %c0_40], %72 {strides = array<i32>} : memref<35x128xf32, #tpu.memory_space<vmem>>, vector<16x128xf32>,
    %c0_41 = arith.constant 0 : index
    %c0_42 = arith.constant 0 : index
    %74 = vector.load %arg13[%c0_41, %c0_42] : memref<67x256xf32, #tpu.memory_space<vmem>>, vector<65x256xf32>
    %75 = arith.truncf %74 : vector<65x256xf32> to vector<65x256xbf16>
    %c0_43 = arith.constant 0 : index
    %c0_44 = arith.constant 0 : index
    %c0_45 = arith.constant 0 : index
    %c0_46 = arith.constant 0 : index
    %76 = vector.load %arg4[%c0_43, %c0_44, %c0_45, %c0_46] : memref<3x3x256x256xbf16, #tpu.memory_space<vmem>>, vector<1x1x256x256xbf16>
    %77 = vector.shape_cast %76 : vector<1x1x256x256xbf16> to vector<256x256xbf16>
    %cst_47 = arith.constant dense<0.000000e+00> : vector<65x256xf32>
    %78 = tpu.matmul %75, %77, %cst_47 {dimension_numbers = #tpu.dot_dimension_numbers<[1], [0], [0], [1], [0, 0, 1, 1], [], []>} : vector<65x256xbf16>, vector<256x256xbf16>, vector<65x256xf32> -> vector<65x256xf32>
    %c0_48 = arith.constant 0 : index
    %c0_49 = arith.constant 0 : index
    %79 = vector.load %arg8[%c0_48, %c0_49] : memref<3x256xf32, #tpu.memory_space<vmem>>, vector<1x256xf32>
    %80 = vector.broadcast %79 : vector<1x256xf32> to vector<65x256xf32>
    %81 = arith.addf %78, %80 : vector<65x256xf32>
    %c1_50 = arith.constant 1 : index
    %c0_51 = arith.constant 0 : index
    %82 = vector.load %arg13[%c1_50, %c0_51] : memref<67x256xf32, #tpu.memory_space<vmem>>, vector<65x256xf32>
    %83 = arith.truncf %82 : vector<65x256xf32> to vector<65x256xbf16>
    %c0_52 = arith.constant 0 : index
    %c1_53 = arith.constant 1 : index
    %c0_54 = arith.constant 0 : index
    %c0_55 = arith.constant 0 : index
    %84 = vector.load %arg4[%c0_52, %c1_53, %c0_54, %c0_55] : memref<3x3x256x256xbf16, #tpu.memory_space<vmem>>, vector<1x1x256x256xbf16>
    %85 = vector.shape_cast %84 : vector<1x1x256x256xbf16> to vector<256x256xbf16>
    %cst_56 = arith.constant dense<0.000000e+00> : vector<65x256xf32>
    %86 = tpu.matmul %83, %85, %cst_56 {dimension_numbers = #tpu.dot_dimension_numbers<[1], [0], [0], [1], [0, 0, 1, 1], [], []>} : vector<65x256xbf16>, vector<256x256xbf16>, vector<65x256xf32> -> vector<65x256xf32>
    %87 = arith.addf %81, %86 : vector<65x256xf32>
    %c2 = arith.constant 2 : index
    %c0_57 = arith.constant 0 : index
    %88 = vector.load %arg13[%c2, %c0_57] : memref<67x256xf32, #tpu.memory_space<vmem>>, vector<65x256xf32>
    %89 = arith.truncf %88 : vector<65x256xf32> to vector<65x256xbf16>
    %c0_58 = arith.constant 0 : index
    %c2_59 = arith.constant 2 : index
    %c0_60 = arith.constant 0 : index
    %c0_61 = arith.constant 0 : index
    %90 = vector.load %arg4[%c0_58, %c2_59, %c0_60, %c0_61] : memref<3x3x256x256xbf16, #tpu.memory_space<vmem>>, vector<1x1x256x256xbf16>
    %91 = vector.shape_cast %90 : vector<1x1x256x256xbf16> to vector<256x256xbf16>
    %cst_62 = arith.constant dense<0.000000e+00> : vector<65x256xf32>
    %92 = tpu.matmul %89, %91, %cst_62 {dimension_numbers = #tpu.dot_dimension_numbers<[1], [0], [0], [1], [0, 0, 1, 1], [], []>} : vector<65x256xbf16>, vector<256x256xbf16>, vector<65x256xf32> -> vector<65x256xf32>
    %93 = arith.addf %87, %92 : vector<65x256xf32>
    %c0_63 = arith.constant 0 : index
    %c2_64 = arith.constant 2 : index
    %94 = memref.load %arg10[%c0_63, %c2_64] : memref<1x8xf32, #tpu.memory_space<smem>>
    %cst_65 = arith.constant 0.000000e+00 : f32
    %95 = vector.broadcast %cst_65 : f32 to vector<65x256xf32>
    %96 = arith.cmpf oge, %93, %95 : vector<65x256xf32>
    %97 = vector.broadcast %94 : f32 to vector<65x256xf32>
    %98 = arith.mulf %97, %93 : vector<65x256xf32>
    %99 = arith.select %96, %93, %98 : vector<65x256xi1>, vector<65x256xf32>
    %100 = vector.extract_strided_slice %99 {offsets = [0, 0], sizes = [32, 256], strides = [1, 1]} : vector<65x256xf32> to vector<32x256xf32>
    %c1_66 = arith.constant 1 : index
    %c0_67 = arith.constant 0 : index
    %101 = vector.load %arg13[%c1_66, %c0_67] : memref<67x256xf32, #tpu.memory_space<vmem>>, vector<32x256xf32>
    tpu.vector_store %arg13[%c1_66, %c0_67], %100 {strides = array<i32>} : memref<67x256xf32, #tpu.memory_space<vmem>>, vector<32x256xf32>,
    %102 = vector.extract_strided_slice %99 {offsets = [33, 0], sizes = [32, 256], strides = [1, 1]} : vector<65x256xf32> to vector<32x256xf32>
    %c34_68 = arith.constant 34 : index
    %c0_69 = arith.constant 0 : index
    %103 = vector.load %arg13[%c34_68, %c0_69] : memref<67x256xf32, #tpu.memory_space<vmem>>, vector<32x256xf32>
    tpu.vector_store %arg13[%c34_68, %c0_69], %102 {strides = array<i32>} : memref<67x256xf32, #tpu.memory_space<vmem>>, vector<32x256xf32>,
    %c0_70 = arith.constant 0 : index
    %c0_71 = arith.constant 0 : index
    %104 = vector.load %arg13[%c0_70, %c0_71] : memref<67x256xf32, #tpu.memory_space<vmem>>, vector<65x256xf32>
    %105 = arith.truncf %104 : vector<65x256xf32> to vector<65x256xbf16>
    %c1_72 = arith.constant 1 : index
    %c0_73 = arith.constant 0 : index
    %c0_74 = arith.constant 0 : index
    %c0_75 = arith.constant 0 : index
    %106 = vector.load %arg4[%c1_72, %c0_73, %c0_74, %c0_75] : memref<3x3x256x256xbf16, #tpu.memory_space<vmem>>, vector<1x1x256x256xbf16>
    %107 = vector.shape_cast %106 : vector<1x1x256x256xbf16> to vector<256x256xbf16>
    %cst_76 = arith.constant dense<0.000000e+00> : vector<65x256xf32>
    %108 = tpu.matmul %105, %107, %cst_76 {dimension_numbers = #tpu.dot_dimension_numbers<[1], [0], [0], [1], [0, 0, 1, 1], [], []>} : vector<65x256xbf16>, vector<256x256xbf16>, vector<65x256xf32> -> vector<65x256xf32>
    %c1_77 = arith.constant 1 : index
    %c0_78 = arith.constant 0 : index
    %109 = vector.load %arg8[%c1_77, %c0_78] : memref<3x256xf32, #tpu.memory_space<vmem>>, vector<1x256xf32>
    %110 = vector.broadcast %109 : vector<1x256xf32> to vector<65x256xf32>
    %111 = arith.addf %108, %110 : vector<65x256xf32>
    %c1_79 = arith.constant 1 : index
    %c0_80 = arith.constant 0 : index
    %112 = vector.load %arg13[%c1_79, %c0_80] : memref<67x256xf32, #tpu.memory_space<vmem>>, vector<65x256xf32>
    %113 = arith.truncf %112 : vector<65x256xf32> to vector<65x256xbf16>
    %c1_81 = arith.constant 1 : index
    %c1_82 = arith.constant 1 : index
    %c0_83 = arith.constant 0 : index
    %c0_84 = arith.constant 0 : index
    %114 = vector.load %arg4[%c1_81, %c1_82, %c0_83, %c0_84] : memref<3x3x256x256xbf16, #tpu.memory_space<vmem>>, vector<1x1x256x256xbf16>
    %115 = vector.shape_cast %114 : vector<1x1x256x256xbf16> to vector<256x256xbf16>
    %cst_85 = arith.constant dense<0.000000e+00> : vector<65x256xf32>
    %116 = tpu.matmul %113, %115, %cst_85 {dimension_numbers = #tpu.dot_dimension_numbers<[1], [0], [0], [1], [0, 0, 1, 1], [], []>} : vector<65x256xbf16>, vector<256x256xbf16>, vector<65x256xf32> -> vector<65x256xf32>
    %117 = arith.addf %111, %116 : vector<65x256xf32>
    %c2_86 = arith.constant 2 : index
    %c0_87 = arith.constant 0 : index
    %118 = vector.load %arg13[%c2_86, %c0_87] : memref<67x256xf32, #tpu.memory_space<vmem>>, vector<65x256xf32>
    %119 = arith.truncf %118 : vector<65x256xf32> to vector<65x256xbf16>
    %c1_88 = arith.constant 1 : index
    %c2_89 = arith.constant 2 : index
    %c0_90 = arith.constant 0 : index
    %c0_91 = arith.constant 0 : index
    %120 = vector.load %arg4[%c1_88, %c2_89, %c0_90, %c0_91] : memref<3x3x256x256xbf16, #tpu.memory_space<vmem>>, vector<1x1x256x256xbf16>
    %121 = vector.shape_cast %120 : vector<1x1x256x256xbf16> to vector<256x256xbf16>
    %cst_92 = arith.constant dense<0.000000e+00> : vector<65x256xf32>
    %122 = tpu.matmul %119, %121, %cst_92 {dimension_numbers = #tpu.dot_dimension_numbers<[1], [0], [0], [1], [0, 0, 1, 1], [], []>} : vector<65x256xbf16>, vector<256x256xbf16>, vector<65x256xf32> -> vector<65x256xf32>
    %123 = arith.addf %117, %122 : vector<65x256xf32>
    %c0_93 = arith.constant 0 : index
    %c3 = arith.constant 3 : index
    %124 = memref.load %arg10[%c0_93, %c3] : memref<1x8xf32, #tpu.memory_space<smem>>
    %cst_94 = arith.constant 0.000000e+00 : f32
    %125 = vector.broadcast %cst_94 : f32 to vector<65x256xf32>
    %126 = arith.cmpf oge, %123, %125 : vector<65x256xf32>
    %127 = vector.broadcast %124 : f32 to vector<65x256xf32>
    %128 = arith.mulf %127, %123 : vector<65x256xf32>
    %129 = arith.select %126, %123, %128 : vector<65x256xi1>, vector<65x256xf32>
    %130 = vector.extract_strided_slice %129 {offsets = [0, 0], sizes = [32, 256], strides = [1, 1]} : vector<65x256xf32> to vector<32x256xf32>
    %c1_95 = arith.constant 1 : index
    %c0_96 = arith.constant 0 : index
    %131 = vector.load %arg13[%c1_95, %c0_96] : memref<67x256xf32, #tpu.memory_space<vmem>>, vector<32x256xf32>
    tpu.vector_store %arg13[%c1_95, %c0_96], %130 {strides = array<i32>} : memref<67x256xf32, #tpu.memory_space<vmem>>, vector<32x256xf32>,
    %132 = vector.extract_strided_slice %129 {offsets = [33, 0], sizes = [32, 256], strides = [1, 1]} : vector<65x256xf32> to vector<32x256xf32>
    %c34_97 = arith.constant 34 : index
    %c0_98 = arith.constant 0 : index
    %133 = vector.load %arg13[%c34_97, %c0_98] : memref<67x256xf32, #tpu.memory_space<vmem>>, vector<32x256xf32>
    tpu.vector_store %arg13[%c34_97, %c0_98], %132 {strides = array<i32>} : memref<67x256xf32, #tpu.memory_space<vmem>>, vector<32x256xf32>,
    %c0_99 = arith.constant 0 : index
    %c0_100 = arith.constant 0 : index
    %134 = vector.load %arg13[%c0_99, %c0_100] : memref<67x256xf32, #tpu.memory_space<vmem>>, vector<65x256xf32>
    %135 = arith.truncf %134 : vector<65x256xf32> to vector<65x256xbf16>
    %c2_101 = arith.constant 2 : index
    %c0_102 = arith.constant 0 : index
    %c0_103 = arith.constant 0 : index
    %c0_104 = arith.constant 0 : index
    %136 = vector.load %arg4[%c2_101, %c0_102, %c0_103, %c0_104] : memref<3x3x256x256xbf16, #tpu.memory_space<vmem>>, vector<1x1x256x256xbf16>
    %137 = vector.shape_cast %136 : vector<1x1x256x256xbf16> to vector<256x256xbf16>
    %cst_105 = arith.constant dense<0.000000e+00> : vector<65x256xf32>
    %138 = tpu.matmul %135, %137, %cst_105 {dimension_numbers = #tpu.dot_dimension_numbers<[1], [0], [0], [1], [0, 0, 1, 1], [], []>} : vector<65x256xbf16>, vector<256x256xbf16>, vector<65x256xf32> -> vector<65x256xf32>
    %c2_106 = arith.constant 2 : index
    %c0_107 = arith.constant 0 : index
    %139 = vector.load %arg8[%c2_106, %c0_107] : memref<3x256xf32, #tpu.memory_space<vmem>>, vector<1x256xf32>
    %140 = vector.broadcast %139 : vector<1x256xf32> to vector<65x256xf32>
    %141 = arith.addf %138, %140 : vector<65x256xf32>
    %c1_108 = arith.constant 1 : index
    %c0_109 = arith.constant 0 : index
    %142 = vector.load %arg13[%c1_108, %c0_109] : memref<67x256xf32, #tpu.memory_space<vmem>>, vector<65x256xf32>
    %143 = arith.truncf %142 : vector<65x256xf32> to vector<65x256xbf16>
    %c2_110 = arith.constant 2 : index
    %c1_111 = arith.constant 1 : index
    %c0_112 = arith.constant 0 : index
    %c0_113 = arith.constant 0 : index
    %144 = vector.load %arg4[%c2_110, %c1_111, %c0_112, %c0_113] : memref<3x3x256x256xbf16, #tpu.memory_space<vmem>>, vector<1x1x256x256xbf16>
    %145 = vector.shape_cast %144 : vector<1x1x256x256xbf16> to vector<256x256xbf16>
    %cst_114 = arith.constant dense<0.000000e+00> : vector<65x256xf32>
    %146 = tpu.matmul %143, %145, %cst_114 {dimension_numbers = #tpu.dot_dimension_numbers<[1], [0], [0], [1], [0, 0, 1, 1], [], []>} : vector<65x256xbf16>, vector<256x256xbf16>, vector<65x256xf32> -> vector<65x256xf32>
    %147 = arith.addf %141, %146 : vector<65x256xf32>
    %c2_115 = arith.constant 2 : index
    %c0_116 = arith.constant 0 : index
    %148 = vector.load %arg13[%c2_115, %c0_116] : memref<67x256xf32, #tpu.memory_space<vmem>>, vector<65x256xf32>
    %149 = arith.truncf %148 : vector<65x256xf32> to vector<65x256xbf16>
    %c2_117 = arith.constant 2 : index
    %c2_118 = arith.constant 2 : index
    %c0_119 = arith.constant 0 : index
    %c0_120 = arith.constant 0 : index
    %150 = vector.load %arg4[%c2_117, %c2_118, %c0_119, %c0_120] : memref<3x3x256x256xbf16, #tpu.memory_space<vmem>>, vector<1x1x256x256xbf16>
    %151 = vector.shape_cast %150 : vector<1x1x256x256xbf16> to vector<256x256xbf16>
    %cst_121 = arith.constant dense<0.000000e+00> : vector<65x256xf32>
    %152 = tpu.matmul %149, %151, %cst_121 {dimension_numbers = #tpu.dot_dimension_numbers<[1], [0], [0], [1], [0, 0, 1, 1], [], []>} : vector<65x256xbf16>, vector<256x256xbf16>, vector<65x256xf32> -> vector<65x256xf32>
    %153 = arith.addf %147, %152 : vector<65x256xf32>
    %c0_122 = arith.constant 0 : index
    %c4 = arith.constant 4 : index
    %154 = memref.load %arg10[%c0_122, %c4] : memref<1x8xf32, #tpu.memory_space<smem>>
    %cst_123 = arith.constant 0.000000e+00 : f32
    %155 = vector.broadcast %cst_123 : f32 to vector<65x256xf32>
    %156 = arith.cmpf oge, %153, %155 : vector<65x256xf32>
    %157 = vector.broadcast %154 : f32 to vector<65x256xf32>
    %158 = arith.mulf %157, %153 : vector<65x256xf32>
    %159 = arith.select %156, %153, %158 : vector<65x256xi1>, vector<65x256xf32>
    %160 = vector.extract_strided_slice %159 {offsets = [0, 0], sizes = [32, 256], strides = [1, 1]} : vector<65x256xf32> to vector<32x256xf32>
    %c0_124 = arith.constant 0 : index
    %c0_125 = arith.constant 0 : index
    %161 = vector.load %arg11[%c0_124, %c0_125] : memref<64x256xf32, #tpu.memory_space<vmem>>, vector<32x256xf32>
    tpu.vector_store %arg11[%c0_124, %c0_125], %160 {strides = array<i32>} : memref<64x256xf32, #tpu.memory_space<vmem>>, vector<32x256xf32>,
    %162 = vector.extract_strided_slice %159 {offsets = [33, 0], sizes = [32, 256], strides = [1, 1]} : vector<65x256xf32> to vector<32x256xf32>
    %c32 = arith.constant 32 : index
    %c0_126 = arith.constant 0 : index
    %163 = vector.load %arg11[%c32, %c0_126] : memref<64x256xf32, #tpu.memory_space<vmem>>, vector<32x256xf32>
    tpu.vector_store %arg11[%c32, %c0_126], %162 {strides = array<i32>} : memref<64x256xf32, #tpu.memory_space<vmem>>, vector<32x256xf32>,
    %c0_127 = arith.constant 0 : index
    %c0_128 = arith.constant 0 : index
    %164 = vector.load %arg14[%c0_127, %c0_128] : memref<35x128xf32, #tpu.memory_space<vmem>>, vector<33x128xf32>
    %165 = arith.truncf %164 : vector<33x128xf32> to vector<33x128xbf16>
    %c0_129 = arith.constant 0 : index
    %c0_130 = arith.constant 0 : index
    %c0_131 = arith.constant 0 : index
    %c0_132 = arith.constant 0 : index
    %166 = vector.load %arg5[%c0_129, %c0_130, %c0_131, %c0_132] : memref<3x3x128x128xbf16, #tpu.memory_space<vmem>>, vector<1x1x128x128xbf16>
    %167 = vector.shape_cast %166 : vector<1x1x128x128xbf16> to vector<128x128xbf16>
    %cst_133 = arith.constant dense<0.000000e+00> : vector<33x128xf32>
    %168 = tpu.matmul %165, %167, %cst_133 {dimension_numbers = #tpu.dot_dimension_numbers<[1], [0], [0], [1], [0, 0, 1, 1], [], []>} : vector<33x128xbf16>, vector<128x128xbf16>, vector<33x128xf32> -> vector<33x128xf32>
    %c0_134 = arith.constant 0 : index
    %c0_135 = arith.constant 0 : index
    %169 = vector.load %arg9[%c0_134, %c0_135] : memref<3x128xf32, #tpu.memory_space<vmem>>, vector<1x128xf32>
    %170 = vector.broadcast %169 : vector<1x128xf32> to vector<33x128xf32>
    %171 = arith.addf %168, %170 : vector<33x128xf32>
    %c1_136 = arith.constant 1 : index
    %c0_137 = arith.constant 0 : index
    %172 = vector.load %arg14[%c1_136, %c0_137] : memref<35x128xf32, #tpu.memory_space<vmem>>, vector<33x128xf32>
    %173 = arith.truncf %172 : vector<33x128xf32> to vector<33x128xbf16>
    %c0_138 = arith.constant 0 : index
    %c1_139 = arith.constant 1 : index
    %c0_140 = arith.constant 0 : index
    %c0_141 = arith.constant 0 : index
    %174 = vector.load %arg5[%c0_138, %c1_139, %c0_140, %c0_141] : memref<3x3x128x128xbf16, #tpu.memory_space<vmem>>, vector<1x1x128x128xbf16>
    %175 = vector.shape_cast %174 : vector<1x1x128x128xbf16> to vector<128x128xbf16>
    %cst_142 = arith.constant dense<0.000000e+00> : vector<33x128xf32>
    %176 = tpu.matmul %173, %175, %cst_142 {dimension_numbers = #tpu.dot_dimension_numbers<[1], [0], [0], [1], [0, 0, 1, 1], [], []>} : vector<33x128xbf16>, vector<128x128xbf16>, vector<33x128xf32> -> vector<33x128xf32>
    %177 = arith.addf %171, %176 : vector<33x128xf32>
    %c2_143 = arith.constant 2 : index
    %c0_144 = arith.constant 0 : index
    %178 = vector.load %arg14[%c2_143, %c0_144] : memref<35x128xf32, #tpu.memory_space<vmem>>, vector<33x128xf32>
    %179 = arith.truncf %178 : vector<33x128xf32> to vector<33x128xbf16>
    %c0_145 = arith.constant 0 : index
    %c2_146 = arith.constant 2 : index
    %c0_147 = arith.constant 0 : index
    %c0_148 = arith.constant 0 : index
    %180 = vector.load %arg5[%c0_145, %c2_146, %c0_147, %c0_148] : memref<3x3x128x128xbf16, #tpu.memory_space<vmem>>, vector<1x1x128x128xbf16>
    %181 = vector.shape_cast %180 : vector<1x1x128x128xbf16> to vector<128x128xbf16>
    %cst_149 = arith.constant dense<0.000000e+00> : vector<33x128xf32>
    %182 = tpu.matmul %179, %181, %cst_149 {dimension_numbers = #tpu.dot_dimension_numbers<[1], [0], [0], [1], [0, 0, 1, 1], [], []>} : vector<33x128xbf16>, vector<128x128xbf16>, vector<33x128xf32> -> vector<33x128xf32>
    %183 = arith.addf %177, %182 : vector<33x128xf32>
    %c0_150 = arith.constant 0 : index
    %c5 = arith.constant 5 : index
    %184 = memref.load %arg10[%c0_150, %c5] : memref<1x8xf32, #tpu.memory_space<smem>>
    %cst_151 = arith.constant 0.000000e+00 : f32
    %185 = vector.broadcast %cst_151 : f32 to vector<33x128xf32>
    %186 = arith.cmpf oge, %183, %185 : vector<33x128xf32>
    %187 = vector.broadcast %184 : f32 to vector<33x128xf32>
    %188 = arith.mulf %187, %183 : vector<33x128xf32>
    %189 = arith.select %186, %183, %188 : vector<33x128xi1>, vector<33x128xf32>
    %190 = vector.extract_strided_slice %189 {offsets = [0, 0], sizes = [16, 128], strides = [1, 1]} : vector<33x128xf32> to vector<16x128xf32>
    %c1_152 = arith.constant 1 : index
    %c0_153 = arith.constant 0 : index
    %191 = vector.load %arg14[%c1_152, %c0_153] : memref<35x128xf32, #tpu.memory_space<vmem>>, vector<16x128xf32>
    tpu.vector_store %arg14[%c1_152, %c0_153], %190 {strides = array<i32>} : memref<35x128xf32, #tpu.memory_space<vmem>>, vector<16x128xf32>,
    %192 = vector.extract_strided_slice %189 {offsets = [17, 0], sizes = [16, 128], strides = [1, 1]} : vector<33x128xf32> to vector<16x128xf32>
    %c18_154 = arith.constant 18 : index
    %c0_155 = arith.constant 0 : index
    %193 = vector.load %arg14[%c18_154, %c0_155] : memref<35x128xf32, #tpu.memory_space<vmem>>, vector<16x128xf32>
    tpu.vector_store %arg14[%c18_154, %c0_155], %192 {strides = array<i32>} : memref<35x128xf32, #tpu.memory_space<vmem>>, vector<16x128xf32>,
    %c0_156 = arith.constant 0 : index
    %c0_157 = arith.constant 0 : index
    %194 = vector.load %arg14[%c0_156, %c0_157] : memref<35x128xf32, #tpu.memory_space<vmem>>, vector<33x128xf32>
    %195 = arith.truncf %194 : vector<33x128xf32> to vector<33x128xbf16>
    %c1_158 = arith.constant 1 : index
    %c0_159 = arith.constant 0 : index
    %c0_160 = arith.constant 0 : index
    %c0_161 = arith.constant 0 : index
    %196 = vector.load %arg5[%c1_158, %c0_159, %c0_160, %c0_161] : memref<3x3x128x128xbf16, #tpu.memory_space<vmem>>, vector<1x1x128x128xbf16>
    %197 = vector.shape_cast %196 : vector<1x1x128x128xbf16> to vector<128x128xbf16>
    %cst_162 = arith.constant dense<0.000000e+00> : vector<33x128xf32>
    %198 = tpu.matmul %195, %197, %cst_162 {dimension_numbers = #tpu.dot_dimension_numbers<[1], [0], [0], [1], [0, 0, 1, 1], [], []>} : vector<33x128xbf16>, vector<128x128xbf16>, vector<33x128xf32> -> vector<33x128xf32>
    %c1_163 = arith.constant 1 : index
    %c0_164 = arith.constant 0 : index
    %199 = vector.load %arg9[%c1_163, %c0_164] : memref<3x128xf32, #tpu.memory_space<vmem>>, vector<1x128xf32>
    %200 = vector.broadcast %199 : vector<1x128xf32> to vector<33x128xf32>
    %201 = arith.addf %198, %200 : vector<33x128xf32>
    %c1_165 = arith.constant 1 : index
    %c0_166 = arith.constant 0 : index
    %202 = vector.load %arg14[%c1_165, %c0_166] : memref<35x128xf32, #tpu.memory_space<vmem>>, vector<33x128xf32>
    %203 = arith.truncf %202 : vector<33x128xf32> to vector<33x128xbf16>
    %c1_167 = arith.constant 1 : index
    %c1_168 = arith.constant 1 : index
    %c0_169 = arith.constant 0 : index
    %c0_170 = arith.constant 0 : index
    %204 = vector.load %arg5[%c1_167, %c1_168, %c0_169, %c0_170] : memref<3x3x128x128xbf16, #tpu.memory_space<vmem>>, vector<1x1x128x128xbf16>
    %205 = vector.shape_cast %204 : vector<1x1x128x128xbf16> to vector<128x128xbf16>
    %cst_171 = arith.constant dense<0.000000e+00> : vector<33x128xf32>
    %206 = tpu.matmul %203, %205, %cst_171 {dimension_numbers = #tpu.dot_dimension_numbers<[1], [0], [0], [1], [0, 0, 1, 1], [], []>} : vector<33x128xbf16>, vector<128x128xbf16>, vector<33x128xf32> -> vector<33x128xf32>
    %207 = arith.addf %201, %206 : vector<33x128xf32>
    %c2_172 = arith.constant 2 : index
    %c0_173 = arith.constant 0 : index
    %208 = vector.load %arg14[%c2_172, %c0_173] : memref<35x128xf32, #tpu.memory_space<vmem>>, vector<33x128xf32>
    %209 = arith.truncf %208 : vector<33x128xf32> to vector<33x128xbf16>
    %c1_174 = arith.constant 1 : index
    %c2_175 = arith.constant 2 : index
    %c0_176 = arith.constant 0 : index
    %c0_177 = arith.constant 0 : index
    %210 = vector.load %arg5[%c1_174, %c2_175, %c0_176, %c0_177] : memref<3x3x128x128xbf16, #tpu.memory_space<vmem>>, vector<1x1x128x128xbf16>
    %211 = vector.shape_cast %210 : vector<1x1x128x128xbf16> to vector<128x128xbf16>
    %cst_178 = arith.constant dense<0.000000e+00> : vector<33x128xf32>
    %212 = tpu.matmul %209, %211, %cst_178 {dimension_numbers = #tpu.dot_dimension_numbers<[1], [0], [0], [1], [0, 0, 1, 1], [], []>} : vector<33x128xbf16>, vector<128x128xbf16>, vector<33x128xf32> -> vector<33x128xf32>
    %213 = arith.addf %207, %212 : vector<33x128xf32>
    %c0_179 = arith.constant 0 : index
    %c6 = arith.constant 6 : index
    %214 = memref.load %arg10[%c0_179, %c6] : memref<1x8xf32, #tpu.memory_space<smem>>
    %cst_180 = arith.constant 0.000000e+00 : f32
    %215 = vector.broadcast %cst_180 : f32 to vector<33x128xf32>
    %216 = arith.cmpf oge, %213, %215 : vector<33x128xf32>
    %217 = vector.broadcast %214 : f32 to vector<33x128xf32>
    %218 = arith.mulf %217, %213 : vector<33x128xf32>
    %219 = arith.select %216, %213, %218 : vector<33x128xi1>, vector<33x128xf32>
    %220 = vector.extract_strided_slice %219 {offsets = [0, 0], sizes = [16, 128], strides = [1, 1]} : vector<33x128xf32> to vector<16x128xf32>
    %c1_181 = arith.constant 1 : index
    %c0_182 = arith.constant 0 : index
    %221 = vector.load %arg14[%c1_181, %c0_182] : memref<35x128xf32, #tpu.memory_space<vmem>>, vector<16x128xf32>
    tpu.vector_store %arg14[%c1_181, %c0_182], %220 {strides = array<i32>} : memref<35x128xf32, #tpu.memory_space<vmem>>, vector<16x128xf32>,
    %222 = vector.extract_strided_slice %219 {offsets = [17, 0], sizes = [16, 128], strides = [1, 1]} : vector<33x128xf32> to vector<16x128xf32>
    %c18_183 = arith.constant 18 : index
    %c0_184 = arith.constant 0 : index
    %223 = vector.load %arg14[%c18_183, %c0_184] : memref<35x128xf32, #tpu.memory_space<vmem>>, vector<16x128xf32>
    tpu.vector_store %arg14[%c18_183, %c0_184], %222 {strides = array<i32>} : memref<35x128xf32, #tpu.memory_space<vmem>>, vector<16x128xf32>,
    %c0_185 = arith.constant 0 : index
    %c0_186 = arith.constant 0 : index
    %224 = vector.load %arg14[%c0_185, %c0_186] : memref<35x128xf32, #tpu.memory_space<vmem>>, vector<33x128xf32>
    %225 = arith.truncf %224 : vector<33x128xf32> to vector<33x128xbf16>
    %c2_187 = arith.constant 2 : index
    %c0_188 = arith.constant 0 : index
    %c0_189 = arith.constant 0 : index
    %c0_190 = arith.constant 0 : index
    %226 = vector.load %arg5[%c2_187, %c0_188, %c0_189, %c0_190] : memref<3x3x128x128xbf16, #tpu.memory_space<vmem>>, vector<1x1x128x128xbf16>
    %227 = vector.shape_cast %226 : vector<1x1x128x128xbf16> to vector<128x128xbf16>
    %cst_191 = arith.constant dense<0.000000e+00> : vector<33x128xf32>
    %228 = tpu.matmul %225, %227, %cst_191 {dimension_numbers = #tpu.dot_dimension_numbers<[1], [0], [0], [1], [0, 0, 1, 1], [], []>} : vector<33x128xbf16>, vector<128x128xbf16>, vector<33x128xf32> -> vector<33x128xf32>
    %c2_192 = arith.constant 2 : index
    %c0_193 = arith.constant 0 : index
    %229 = vector.load %arg9[%c2_192, %c0_193] : memref<3x128xf32, #tpu.memory_space<vmem>>, vector<1x128xf32>
    %230 = vector.broadcast %229 : vector<1x128xf32> to vector<33x128xf32>
    %231 = arith.addf %228, %230 : vector<33x128xf32>
    %c1_194 = arith.constant 1 : index
    %c0_195 = arith.constant 0 : index
    %232 = vector.load %arg14[%c1_194, %c0_195] : memref<35x128xf32, #tpu.memory_space<vmem>>, vector<33x128xf32>
    %233 = arith.truncf %232 : vector<33x128xf32> to vector<33x128xbf16>
    %c2_196 = arith.constant 2 : index
    %c1_197 = arith.constant 1 : index
    %c0_198 = arith.constant 0 : index
    %c0_199 = arith.constant 0 : index
    %234 = vector.load %arg5[%c2_196, %c1_197, %c0_198, %c0_199] : memref<3x3x128x128xbf16, #tpu.memory_space<vmem>>, vector<1x1x128x128xbf16>
    %235 = vector.shape_cast %234 : vector<1x1x128x128xbf16> to vector<128x128xbf16>
    %cst_200 = arith.constant dense<0.000000e+00> : vector<33x128xf32>
    %236 = tpu.matmul %233, %235, %cst_200 {dimension_numbers = #tpu.dot_dimension_numbers<[1], [0], [0], [1], [0, 0, 1, 1], [], []>} : vector<33x128xbf16>, vector<128x128xbf16>, vector<33x128xf32> -> vector<33x128xf32>
    %237 = arith.addf %231, %236 : vector<33x128xf32>
    %c2_201 = arith.constant 2 : index
    %c0_202 = arith.constant 0 : index
    %238 = vector.load %arg14[%c2_201, %c0_202] : memref<35x128xf32, #tpu.memory_space<vmem>>, vector<33x128xf32>
    %239 = arith.truncf %238 : vector<33x128xf32> to vector<33x128xbf16>
    %c2_203 = arith.constant 2 : index
    %c2_204 = arith.constant 2 : index
    %c0_205 = arith.constant 0 : index
    %c0_206 = arith.constant 0 : index
    %240 = vector.load %arg5[%c2_203, %c2_204, %c0_205, %c0_206] : memref<3x3x128x128xbf16, #tpu.memory_space<vmem>>, vector<1x1x128x128xbf16>
    %241 = vector.shape_cast %240 : vector<1x1x128x128xbf16> to vector<128x128xbf16>
    %cst_207 = arith.constant dense<0.000000e+00> : vector<33x128xf32>
    %242 = tpu.matmul %239, %241, %cst_207 {dimension_numbers = #tpu.dot_dimension_numbers<[1], [0], [0], [1], [0, 0, 1, 1], [], []>} : vector<33x128xbf16>, vector<128x128xbf16>, vector<33x128xf32> -> vector<33x128xf32>
    %243 = arith.addf %237, %242 : vector<33x128xf32>
    %c0_208 = arith.constant 0 : index
    %c7 = arith.constant 7 : index
    %244 = memref.load %arg10[%c0_208, %c7] : memref<1x8xf32, #tpu.memory_space<smem>>
    %cst_209 = arith.constant 0.000000e+00 : f32
    %245 = vector.broadcast %cst_209 : f32 to vector<33x128xf32>
    %246 = arith.cmpf oge, %243, %245 : vector<33x128xf32>
    %247 = vector.broadcast %244 : f32 to vector<33x128xf32>
    %248 = arith.mulf %247, %243 : vector<33x128xf32>
    %249 = arith.select %246, %243, %248 : vector<33x128xi1>, vector<33x128xf32>
    %250 = vector.extract_strided_slice %249 {offsets = [0, 0], sizes = [16, 128], strides = [1, 1]} : vector<33x128xf32> to vector<16x128xf32>
    %251 = vector.extract_strided_slice %25 {offsets = [0, 0], sizes = [16, 128], strides = [1, 1]} : vector<32x128xf32> to vector<16x128xf32>
    %252 = arith.addf %251, %250 : vector<16x128xf32>
    %c0_210 = arith.constant 0 : index
    %c0_211 = arith.constant 0 : index
    %253 = vector.load %arg12[%c0_210, %c0_211] : memref<32x128xf32, #tpu.memory_space<vmem>>, vector<16x128xf32>
    tpu.vector_store %arg12[%c0_210, %c0_211], %252 {strides = array<i32>} : memref<32x128xf32, #tpu.memory_space<vmem>>, vector<16x128xf32>,
    %254 = vector.extract_strided_slice %249 {offsets = [17, 0], sizes = [16, 128], strides = [1, 1]} : vector<33x128xf32> to vector<16x128xf32>
    %255 = vector.extract_strided_slice %25 {offsets = [16, 0], sizes = [16, 128], strides = [1, 1]} : vector<32x128xf32> to vector<16x128xf32>
    %256 = arith.addf %255, %254 : vector<16x128xf32>
    %c16 = arith.constant 16 : index
    %c0_212 = arith.constant 0 : index
    %257 = vector.load %arg12[%c16, %c0_212] : memref<32x128xf32, #tpu.memory_space<vmem>>, vector<16x128xf32>
    tpu.vector_store %arg12[%c16, %c0_212], %256 {strides = array<i32>} : memref<32x128xf32, #tpu.memory_space<vmem>>, vector<16x128xf32>,
    return
  }
  func.func @transform_0(%arg0: i32) -> (i32, i32) {
    %c0_i32 = arith.constant 0 : i32
    %c0_i32_0 = arith.constant 0 : i32
    return %arg0, %c0_i32 : i32, i32
  }
  func.func @transform_1(%arg0: i32) -> (i32, i32) {
    %c0_i32 = arith.constant 0 : i32
    %c0_i32_0 = arith.constant 0 : i32
    %c0_i32_1 = arith.constant 0 : i32
    return %c0_i32, %c0_i32_0 : i32, i32
  }
  func.func @transform_2(%arg0: i32) -> (i32, i32) {
    %c0_i32 = arith.constant 0 : i32
    %c0_i32_0 = arith.constant 0 : i32
    %c0_i32_1 = arith.constant 0 : i32
    return %c0_i32, %c0_i32_0 : i32, i32
  }
  func.func @transform_3(%arg0: i32) -> (i32, i32, i32, i32) {
    %c0_i32 = arith.constant 0 : i32
    %c0_i32_0 = arith.constant 0 : i32
    %c0_i32_1 = arith.constant 0 : i32
    %c0_i32_2 = arith.constant 0 : i32
    %c0_i32_3 = arith.constant 0 : i32
    return %c0_i32, %c0_i32_0, %c0_i32_1, %c0_i32_2 : i32, i32, i32, i32
  }
  func.func @transform_4(%arg0: i32) -> (i32, i32, i32, i32) {
    %c0_i32 = arith.constant 0 : i32
    %c0_i32_0 = arith.constant 0 : i32
    %c0_i32_1 = arith.constant 0 : i32
    %c0_i32_2 = arith.constant 0 : i32
    %c0_i32_3 = arith.constant 0 : i32
    return %c0_i32, %c0_i32_0, %c0_i32_1, %c0_i32_2 : i32, i32, i32, i32
  }
  func.func @transform_5(%arg0: i32) -> (i32, i32) {
    %c0_i32 = arith.constant 0 : i32
    %c0_i32_0 = arith.constant 0 : i32
    %c0_i32_1 = arith.constant 0 : i32
    return %c0_i32, %c0_i32_0 : i32, i32
  }
  func.func @transform_6(%arg0: i32) -> (i32, i32) {
    %c0_i32 = arith.constant 0 : i32
    %c0_i32_0 = arith.constant 0 : i32
    %c0_i32_1 = arith.constant 0 : i32
    return %c0_i32, %c0_i32_0 : i32, i32
  }
  func.func @transform_7(%arg0: i32) -> (i32, i32) {
    %c0_i32 = arith.constant 0 : i32
    %c0_i32_0 = arith.constant 0 : i32
    %c0_i32_1 = arith.constant 0 : i32
    return %c0_i32, %c0_i32_0 : i32, i32
  }
  func.func @transform_8(%arg0: i32) -> (i32, i32) {
    %c0_i32 = arith.constant 0 : i32
    %c0_i32_0 = arith.constant 0 : i32
    %c0_i32_1 = arith.constant 0 : i32
    return %c0_i32, %c0_i32_0 : i32, i32
  }
  func.func @transform_9(%arg0: i32) -> (i32, i32) {
    %c0_i32 = arith.constant 0 : i32
    %c0_i32_0 = arith.constant 0 : i32
    %c0_i32_1 = arith.constant 0 : i32
    return %c0_i32, %c0_i32_0 : i32, i32
  }
  func.func @transform_10(%arg0: i32) -> (i32, i32) {
    %c0_i32 = arith.constant 0 : i32
    %c0_i32_0 = arith.constant 0 : i32
    return %arg0, %c0_i32 : i32, i32
  }
  func.func @transform_11(%arg0: i32) -> (i32, i32) {
    %c0_i32 = arith.constant 0 : i32
    %c0_i32_0 = arith.constant 0 : i32
    return %arg0, %c0_i32 : i32, i32
  }
}

</mosaic_0001>

<bundles_post_ra>
// kernel: brm_forward.1
= control target key start
LH: loop header
LB: loop body
LE: loop exit
PB: predicated region body
PF: predicated region fallthrough
CT: control target
= control target key end

     0   :  { %17 = vsyncpa [#allocation5], 0  ;;  %s8734_s0 = inlined_call_operand.vmem [shape: f32[32,128], index: 0, kind: input, shape index: {}]   ;;  %s8735_s1 = inlined_call_operand.hbm [shape: bf16[128,512], index: 1, kind: input, shape index: {}]   ;;  %s8736_s2 = inlined_call_operand.hbm [shape: bf16[512,128], index: 2, kind: input, shape index: {}]   ;;  %s8737_s3 = inlined_call_operand.hbm [shape: bf16[3,3,256,256], index: 3, kind: input, shape index: {}]   ;;  %s8738_s4 = inlined_call_operand.hbm [shape: bf16[3,3,128,128], index: 4, kind: input, shape index: {}]   ;;  %s8739_s5 = inlined_call_operand.hbm [shape: f32[1,512], index: 5, kind: input, shape index: {}]   ;;  %s8740_s6 = inlined_call_operand.hbm [shape: f32[1,128], index: 6, kind: input, shape index: {}]   ;;  %s8741_s7 = inlined_call_operand.hbm [shape: f32[3,256], index: 7, kind: input, shape index: {}]   ;;  %s8742_s8 = inlined_call_operand.hbm [shape: f32[3,128], index: 8, kind: input, shape index: {}]   ;;  %s8743_s9 = inlined_call_operand.hbm [shape: f32[1,8], index: 9, kind: input, shape index: {}]   ;;  %s8744_s10 = inlined_call_operand.vmem [shape: f32[64,256], index: 10, kind: output, shape index: {0}]   ;;  %s8745_s11 = inlined_call_operand.vmem [shape: f32[32,128], index: 11, kind: output, shape index: {1}]  }
   0x1   :  { %18 = vsyncpa [#allocation8], 0 }
   0x2   :  { %19 = vsyncpa [#allocation11], 0 }
   0x3   :  { %20 = vsyncpa [#allocation14], 0 }
   0x4   :  { %21 = vsyncpa [#allocation17], 0 }
   0x5   :  { %22 = vsyncpa [#allocation6], 0  ;;  %s7724_s17 = smov [#allocation7]  }
   0x6   :  { %s42_s18 = sshll.u32 %s7724_s17, 4  ;;  %s43_s18 = int_to_ptr.vmem [resolvable:$true] %s42_s18 }
   0x7   :  { %s7552_s19 = scalar_lea.vmem %s43_s18, 4096  ;;  %p7557_p1 = scmp.lt.s32.totalorder %s43_s18, %s43_s18 }
   0x8   :  { %p7553_p0 = scmp.ne.s32.totalorder %s43_s18, %s7552_s19  ;;  %p7558_p2 = scmp.lt.s32.totalorder %s7552_s19, %s7552_s19 }
   0xa   :  { %p7559_p3 = por %p7558_p2, %p7557_p1 }
   0xc   :  { %p7560_p4 = pnand %p7559_p3, %p7553_p0 }
   0xe   :  { %7563 = shalt.err (!%p7560_p4)
}
   0xf   :  { %s7725_s20 = smov 64   ;;  %s7726_s21 = smov 4  }
  0x10   :  { %48 = dma.hbm_to_vmem [thread:$0]  %s8736_s2, 4096, %s43_s18, [#allocation8], %s7725_s20, %s7725_s20, %s7726_s21  }
  0x11   :  { %s7727_s24 = smov [#allocation10]   ;;  %s7728_s26 = smov [#allocation13]  }
  0x12   :  { %s66_s25 = sshll.u32 %s7727_s24, 4  ;;  %s89_s27 = sshll.u32 %s7728_s26, 4  ;;  %s67_s25 = int_to_ptr.vmem [resolvable:$true] %s66_s25  ;;  %s90_s27 = int_to_ptr.vmem [resolvable:$true] %s89_s27 }
  0x13   :  { %s7572_s28 = scalar_lea.vmem %s67_s25, 9216  ;;  %p7577_p6 = scmp.lt.s32.totalorder %s67_s25, %s67_s25 }
  0x14   :  { %p7573_p5 = scmp.ne.s32.totalorder %s67_s25, %s7572_s28  ;;  %p7578_p7 = scmp.lt.s32.totalorder %s7572_s28, %s7572_s28 }
  0x16   :  { %p7579_p8 = por %p7578_p7, %p7577_p6 }
  0x18   :  { %p7580_p9 = pnand %p7579_p8, %p7573_p5 }
  0x1a   :  { %7583 = shalt.err (!%p7580_p9)
}
  0x1b   :  { %72 = dma.hbm_to_vmem [thread:$0]  %s8738_s4, 9216, %s67_s25, [#allocation11], %s7725_s20, %s7725_s20, %s7726_s21  }
  0x1c   :  { %s7592_s12 = scalar_lea.vmem %s90_s27, 16  ;;  %s7596_s2 = scalar_lea.vmem %s90_s27, 32 }
  0x1d   :  { %p7593_p10 = scmp.ne.s32.totalorder %s90_s27, %s7592_s12  ;;  %p7597_p11 = scmp.lt.s32.totalorder %s90_s27, %s90_s27 }
  0x1e   :  { %p7598_p12 = scmp.lt.s32.totalorder %s7596_s2, %s7592_s12 }
  0x20   :  { %p7599_p13 = por %p7598_p12, %p7597_p11 }
  0x22   :  { %p7600_p0 = pnand %p7599_p13, %p7593_p10 }
  0x24   :  { %7603 = shalt.err (!%p7600_p0)
}
  0x25   :  { %92 = dma.hbm_to_vmem [thread:$0]  %s8740_s6, 16, %s90_s27, [#allocation14]  }
  0x26   :  { %s7729_s15 = smov [#allocation4]  }
  0x27   :  { %s30_s16 = sshll.u32 %s7729_s15, 4  ;;  %s31_s16 = int_to_ptr.vmem [resolvable:$true] %s30_s16 }
  0x28   :  { %s7612_s17 = scalar_lea.vmem %s31_s16, 4096  ;;  %p7617_p2 = scmp.lt.s32.totalorder %s31_s16, %s31_s16 }
  0x29   :  { %p7613_p1 = scmp.ne.s32.totalorder %s31_s16, %s7612_s17  ;;  %p7618_p3 = scmp.lt.s32.totalorder %s7612_s17, %s7612_s17 }
  0x2b   :  { %p7619_p4 = por %p7618_p3, %p7617_p2 }
  0x2d   :  { %p7620_p5 = pnand %p7619_p4, %p7613_p1 }
  0x2f   :  { %7623 = shalt.err (!%p7620_p5)
}
  0x30   :  { %s7730_s4 = smov 256   ;;  %s7731_s18 = smov 16  }
  0x31   :  { %36 = dma.hbm_to_vmem [thread:$0]  %s8735_s1, 4096, %s31_s16, [#allocation5], %s7730_s4, %s7730_s4, %s7731_s18  }
  0x32   :  { %s7732_s21 = smov [#allocation9]  }
  0x33   :  { %s54_s22 = sshll.u32 %s7732_s21, 4  ;;  %s55_s22 = int_to_ptr.vmem [resolvable:$true] %s54_s22 }
  0x34   :  { %s7632_s6 = scalar_lea.vmem %s55_s22, 36864  ;;  %p7637_p7 = scmp.lt.s32.totalorder %s55_s22, %s55_s22 }
  0x35   :  { %p7633_p6 = scmp.ne.s32.totalorder %s55_s22, %s7632_s6  ;;  %p7638_p8 = scmp.lt.s32.totalorder %s7632_s6, %s7632_s6 }
  0x37   :  { %p7639_p9 = por %p7638_p8, %p7637_p7 }
  0x39   :  { %p7640_p10 = pnand %p7639_p9, %p7633_p6 }
  0x3b   :  { %7643 = shalt.err (!%p7640_p10)
}
  0x3c   :  { %s7733_s23 = smov 128   ;;  %s7734_s24 = smov 8  }
  0x3d   :  { %60 = dma.hbm_to_vmem [thread:$0]  %s8737_s3, 36864, %s55_s22, [#allocation8], %s7733_s23, %s7733_s23, %s7734_s24  }
  0x3e   :  { %s7735_s27 = smov [#allocation12]   ;;  %s7736_s1 = smov [#allocation15]  }
  0x3f   :  { %s79_s28 = sshll.u32 %s7735_s27, 4  ;;  %s99_s29 = sshll.u32 %s7736_s1, 4  ;;  %s80_s28 = int_to_ptr.vmem [resolvable:$true] %s79_s28  ;;  %s100_s29 = int_to_ptr.vmem [resolvable:$true] %s99_s29 }
  0x40   :  { %s7652_s30 = scalar_lea.vmem %s80_s28, 64  ;;  %p7657_p12 = scmp.lt.s32.totalorder %s80_s28, %s80_s28 }
  0x41   :  { %p7653_p11 = scmp.ne.s32.totalorder %s80_s28, %s7652_s30  ;;  %p7658_p13 = scmp.lt.s32.totalorder %s7652_s30, %s7652_s30 }
  0x43   :  { %p7659_p0 = por %p7658_p13, %p7657_p12 }
  0x45   :  { %p7660_p1 = pnand %p7659_p0, %p7653_p11 }
  0x47   :  { %7663 = shalt.err (!%p7660_p1)
}
  0x48   :  { %82 = dma.hbm_to_vmem [thread:$0]  %s8739_s5, 64, %s80_s28, [#allocation11]  }
  0x49   :  { %s7672_s13 = scalar_lea.vmem %s100_s29, 128  ;;  %p7677_p3 = scmp.lt.s32.totalorder %s100_s29, %s100_s29 }
  0x4a   :  { %p7673_p2 = scmp.ne.s32.totalorder %s100_s29, %s7672_s13  ;;  %p7678_p4 = scmp.lt.s32.totalorder %s7672_s13, %s7672_s13 }
  0x4c   :  { %p7679_p5 = por %p7678_p4, %p7677_p3 }
  0x4e   :  { %p7680_p6 = pnand %p7679_p5, %p7673_p2 }
  0x50   :  { %7683 = shalt.err (!%p7680_p6)
}
  0x51   :  { %102 = dma.hbm_to_vmem [thread:$0]  %s8741_s7, 128, %s100_s29, [#allocation14]  }
  0x52   :  { %s7737_s15 = smov [#allocation16]  }
  0x53   :  { %s109_s16 = sshll.u32 %s7737_s15, 4  ;;  %s110_s16 = int_to_ptr.vmem [resolvable:$true] %s109_s16 }
  0x54   :  { %s7692_s17 = scalar_lea.vmem %s110_s16, 64  ;;  %p7697_p8 = scmp.lt.s32.totalorder %s110_s16, %s110_s16 }
  0x55   :  { %p7693_p7 = scmp.ne.s32.totalorder %s110_s16, %s7692_s17  ;;  %p7698_p9 = scmp.lt.s32.totalorder %s7692_s17, %s7692_s17 }
  0x57   :  { %p7699_p10 = por %p7698_p9, %p7697_p8 }
  0x59   :  { %p7700_p11 = pnand %p7699_p10, %p7693_p7 }
  0x5b   :  { %7703 = shalt.err (!%p7700_p11)
}
  0x5c   :  { %112 = dma.hbm_to_vmem [thread:$0]  %s8742_s8, 64, %s110_s16, [#allocation17]  }
  0x5d   :  { %s7738_s18 = smov [#allocation18]  }
  0x5e   :  { %120 = dma.hbm_to_smem %s8743_s9, 16, %s7738_s18, [#allocation6]  }
  0x5f   :  { %7712 = dma.done.wait [#allocation5], 4096  }
  0x60   :  { %7713 = vsyncadd [#allocation5], 4294963200 }
  0x61   :  { %7714 = dma.done.wait [#allocation8], 40960  }
  0x62   :  { %7715 = vsyncadd [#allocation8], 4294926336 }
  0x63   :  { %7716 = dma.done.wait [#allocation11], 9280  }
  0x64   :  { %7717 = vsyncadd [#allocation11], 4294958016 }
  0x65   :  { %7718 = dma.done.wait [#allocation14], 144  }
  0x66   :  { %7719 = vsyncadd [#allocation14], 4294967152 }
  0x67   :  { %7720 = dma.done.wait [#allocation17], 64  }
  0x68   :  { %7721 = vsyncadd [#allocation17], 4294967232 }
  0x69   :  { %7722 = dma.done.wait [#allocation6], 16  }
  0x6a   :  { %7723 = vsyncadd [#allocation6], 4294967280 }
  0x6b   :  { %148 = sfence }
  0x6c   :  { %v6956_v0 = vld [vmem:[#allocation4 + $0xe4] ss:$16 sps:$4 sm:$0xff]   ;;  %v6958_v1 = vld [vmem:[#allocation4 + $0xec] ss:$16 sps:$4 sm:$0xff]   ;;  %v7739_v2 = vmov 0   ;;  %s476_s25 = sld [smem:[#allocation18]] }
  0x6d   :  { %402 = vmatprep.mubr.bf16.mxu0 %v7739_v2  ;;  %455 = vmatprep.mubr.bf16.mxu1 %v7739_v2  ;;  %v6960_v3 = vld [vmem:[#allocation4 + $0xe0] ss:$16 sps:$4 sm:$0xff]   ;;  %v6961_v4 = vld [vmem:[#allocation4 + $0xe8] ss:$16 sps:$4 sm:$0xff]   ;;  %v6962_v5 = vld [vmem:[#allocation4 + $0xc4] ss:$16 sps:$4 sm:$0xff]  }
  0x6e   :  { %370 = vmatprep.subr.bf16.mxu0 %v6956_v0  ;;  %423 = vmatprep.subr.bf16.mxu1 %v6958_v1  ;;  %v6964_v6 = vld [vmem:[#allocation4 + $0xcc] ss:$16 sps:$4 sm:$0xff]   ;;  %v6966_v7 = vld [vmem:[#allocation4 + $0xc0] ss:$16 sps:$4 sm:$0xff]   ;;  %v6967_v8 = vld [vmem:[#allocation4 + $0xc8] ss:$16 sps:$4 sm:$0xff]  }
  0x6f   :  { %371 = vmatpush1.bf16.msra.mxu0 %v6960_v3  ;;  %424 = vmatpush1.bf16.msra.mxu1 %v6961_v4  ;;  %v6968_v9 = vld [vmem:[#allocation4 + $0xa4] ss:$16 sps:$4 sm:$0xff]   ;;  %v6970_v10 = vld [vmem:[#allocation4 + $0xac] ss:$16 sps:$4 sm:$0xff]   ;;  %v6972_v11 = vld [vmem:[#allocation4 + $0xa0] ss:$16 sps:$4 sm:$0xff]  }
  0x70   :  { %372 = vmatprep.subr.bf16.mxu0 %v6962_v5  ;;  %425 = vmatprep.subr.bf16.mxu1 %v6964_v6  ;;  %v6973_v12 = vld [vmem:[#allocation4 + $0xa8] ss:$16 sps:$4 sm:$0xff]   ;;  %v6974_v13 = vld [vmem:[#allocation4 + $0x84] ss:$16 sps:$4 sm:$0xff]   ;;  %v6976_v14 = vld [vmem:[#allocation4 + $0x8c] ss:$16 sps:$4 sm:$0xff]  }
  0x71   :  { %v6978_v15 = vld [vmem:[#allocation4 + $0x80] ss:$16 sps:$4 sm:$0xff]   ;;  %v6979_v16 = vld [vmem:[#allocation4 + $0x88] ss:$16 sps:$4 sm:$0xff]   ;;  %v6980_v17 = vld [vmem:[#allocation4 + $0x64] ss:$16 sps:$4 sm:$0xff]  }
  0x72   :  { %v6982_v18 = vld [vmem:[#allocation4 + $0x6c] ss:$16 sps:$4 sm:$0xff]   ;;  %v6984_v19 = vld [vmem:[#allocation4 + $0x60] ss:$16 sps:$4 sm:$0xff]   ;;  %v6985_v20 = vld [vmem:[#allocation4 + $0x68] ss:$16 sps:$4 sm:$0xff]  }
  0x73   :  { %373 = vmatpush1.bf16.msra.mxu0 %v6966_v7  ;;  %426 = vmatpush1.bf16.msra.mxu1 %v6967_v8  ;;  %v6986_v21 = vld [vmem:[#allocation4 + $0x44] ss:$16 sps:$4 sm:$0xff]   ;;  %v6988_v22 = vld [vmem:[#allocation4 + $0x4c] ss:$16 sps:$4 sm:$0xff]   ;;  %v6990_v23 = vld [vmem:[#allocation4 + $0x40] ss:$16 sps:$4 sm:$0xff]  }
  0x74   :  { %374 = vmatprep.subr.bf16.mxu0 %v6968_v9  ;;  %427 = vmatprep.subr.bf16.mxu1 %v6970_v10  ;;  %v6991_v24 = vld [vmem:[#allocation4 + $0x48] ss:$16 sps:$4 sm:$0xff]   ;;  %v6992_v25 = vld [vmem:[#allocation4 + $0x24] ss:$16 sps:$4 sm:$0xff]   ;;  %v6994_v26 = vld [vmem:[#allocation4 + $0x2c] ss:$16 sps:$4 sm:$0xff]   ;;  %v190_v9 = vlaneseq }
  0x75   :  { %v6996_v27 = vld [vmem:[#allocation4 + $0x20] ss:$16 sps:$4 sm:$0xff]   ;;  %v6997_v28 = vld [vmem:[#allocation4 + $0x28] ss:$16 sps:$4 sm:$0xff]   ;;  %v6998_v29 = vld [vmem:[#allocation4 + $0x4] ss:$16 sps:$4 sm:$0xff]  }
  0x76   :  { %v7000_v30 = vld [vmem:[#allocation4 + $0xc] ss:$16 sps:$4 sm:$0xff]   ;;  %v7002_v31 = vld [vmem:[#allocation4] ss:$16 sps:$4 sm:$0xff]   ;;  %v7003_v32 = vld [vmem:[#allocation4 + $0x8] ss:$16 sps:$4 sm:$0xff]  }
  0x77   :  { %375 = vmatpush1.bf16.msra.mxu0 %v6972_v11  ;;  %428 = vmatpush1.bf16.msra.mxu1 %v6973_v12  ;;  %v150_v33 = vld [vmem:[%s8734_s0] sm:$0xff]  ;;  %v151_v34 = vld [vmem:[%s8734_s0 + $0x8] sm:$0xff]  ;;  %v7004_v35 = vld [vmem:[#allocation7 + $0xf8] sm:$0xff]   ;;  %v8746_v8 = vmov 0.0   ;;  %v7849_v10 = vshrl.u32 %v190_v9, 7  ;;  %s6153_s26 = sld [smem:[#allocation18 + $0x1]] }
  0x78   :  { %376 = vmatprep.subr.bf16.mxu0 %v6974_v13  ;;  %429 = vmatprep.subr.bf16.mxu1 %v6976_v14  ;;  %v7005_v36 = vld [vmem:[#allocation7 + $0x78] sm:$0xff]   ;;  %v154_v37 = vpack.c.bf16 %v151_v34, %v150_v33  ;;  %v7008_v40 = vld [vmem:[#allocation7 + $0xf0] sm:$0xff]   ;;  %v153_v42 = vld [vmem:[%s8734_s0 + $0x18] sm:$0xff]  ;;  %919 = vst [vmem:[#allocation3] sm:$0x1] %v8746_v8  ;;  %s6355_s3 = sld [smem:[#allocation18 + $0x3]] }
  0x79   :  { %v7006_v38 = vld [vmem:[#allocation7 + $0xb8] sm:$0xff]   ;;  %v7009_v43 = vld [vmem:[#allocation7 + $0x70] sm:$0xff]   ;;  %v7012_v46 = vld [vmem:[#allocation7 + $0xe8] sm:$0xff]   ;;  %923 = vst [vmem:[#allocation3 + $0x11] sm:$0x1] %v8746_v8  ;;  %v7852_v11 = vsub.s32 0, %v7849_v10 }
  0x7a   :  { %v7007_v39 = vld [vmem:[#allocation7 + $0x38] sm:$0xff]   ;;  %v7010_v44 = vld [vmem:[#allocation7 + $0xb0] sm:$0xff]   ;;  %v7013_v47 = vld [vmem:[#allocation7 + $0x68] sm:$0xff]   ;;  %927 = vst [vmem:[#allocation3 + $0x22] sm:$0x1] %v8746_v8  ;;  %v200_v12 = vsub.s32 2, %v7849_v10 }
  0x7b   :  { %377 = vmatpush1.bf16.msra.mxu0 %v6978_v15  ;;  %430 = vmatpush1.bf16.msra.mxu1 %v6979_v16  ;;  %v152_v41 = vld [vmem:[%s8734_s0 + $0x10] sm:$0xff]  ;;  %v7011_v45 = vld [vmem:[#allocation7 + $0x30] sm:$0xff]   ;;  %v7014_v49 = vld [vmem:[#allocation7 + $0xa8] sm:$0xff]   ;;  %v7856_v14 = vsub.s32 1, %v7849_v10  ;;  %v204_v15 = vsub.s32 3, %v7849_v10  ;;  %s6452_s14 = sld [smem:[#allocation18 + $0x4]] }
  0x7c   :  { %378 = vmatprep.subr.bf16.mxu0 %v6980_v17  ;;  %431 = vmatprep.subr.bf16.mxu1 %v6982_v18  ;;  %v155_v48 = vpack.c.bf16 %v153_v42, %v152_v41  ;;  %v7015_v50 = vld [vmem:[#allocation7 + $0x28] sm:$0xff]   ;;  %v7016_v51 = vld [vmem:[#allocation7 + $0xe0] sm:$0xff]   ;;  %v7020_v55 = vld [vmem:[#allocation7 + $0xd8] sm:$0xff]   ;;  %s8609_s1 = sld [smem:[#allocation18 + $0x5]] }
  0x7d   :  { %v7017_v52 = vld [vmem:[#allocation7 + $0x60] sm:$0xff]   ;;  %v7021_v56 = vld [vmem:[#allocation7 + $0x58] sm:$0xff]   ;;  %v7024_v59 = vld [vmem:[#allocation7 + $0xd0] sm:$0xff]   ;;  %s6530_s4 = sld [smem:[#allocation18 + $0x7]] }
  0x7e   :  { %v7018_v53 = vld [vmem:[#allocation7 + $0xa0] sm:$0xff]   ;;  %v7022_v57 = vld [vmem:[#allocation7 + $0x98] sm:$0xff]   ;;  %v7025_v60 = vld [vmem:[#allocation7 + $0x50] sm:$0xff]  }
  0x7f   :  { %379 = vmatpush1.bf16.msra.mxu0 %v6984_v19  ;;  %432 = vmatpush1.bf16.msra.mxu1 %v6985_v20  ;;  %v7019_v54 = vld [vmem:[#allocation7 + $0x20] sm:$0xff]   ;;  %v7023_v58 = vld [vmem:[#allocation7 + $0x18] sm:$0xff]   ;;  %v7026_v61 = vld [vmem:[#allocation7 + $0x90] sm:$0xff]  }
  0x80   :  { %380 = vmatprep.subr.bf16.mxu0 %v6986_v21  ;;  %433 = vmatprep.subr.bf16.mxu1 %v6988_v22  ;;  %v7027_v62 = vld [vmem:[#allocation7 + $0x10] sm:$0xff]   ;;  %v7028_v63 = vld [vmem:[#allocation7 + $0xc8] sm:$0xff]   ;;  %v7032_v4 = vld [vmem:[#allocation7 + $0xc0] sm:$0xff]  }
  0x81   :  { %v7029_v0 = vld [vmem:[#allocation7 + $0x48] sm:$0xff]   ;;  %v7033_v5 = vld [vmem:[#allocation7 + $0x40] sm:$0xff]  }
  0x82   :  { %v7030_v1 = vld [vmem:[#allocation7 + $0x88] sm:$0xff]   ;;  %v7034_v6 = vld [vmem:[#allocation7 + $0x80] sm:$0xff]  }
  0x83   :  { %381 = vmatpush1.bf16.msra.mxu0 %v6990_v23  ;;  %434 = vmatpush1.bf16.msra.mxu1 %v6991_v24  ;;  %v7031_v3 = vld [vmem:[#allocation7 + $0x8] sm:$0xff]   ;;  %v7035_v7 = vld [vmem:[#allocation7] sm:$0xff]   ;;  %v7865_v24 = vstv %s476_s25 }
  0x84   :  { %382 = vmatprep.subr.bf16.mxu0 %v6992_v25  ;;  %435 = vmatprep.subr.bf16.mxu1 %v6994_v26  ;;  %v188_v13 = vld [vmem:[#allocation12] sm:$0xf] }
  0x85   :  { %v193_v16 = vrot.slane %v188_v13, %v7852_v11  ;;  %v201_v17 = vrot.slane %v188_v13, %v200_v12  ;;  %v7861_v20 = vrot.slane %v188_v13, %v7856_v14  ;;  %v7863_v21 = vrot.slane %v188_v13, %v204_v15 }
  0x87   :  { %383 = vmatpush1.bf16.msra.mxu0 %v6996_v27  ;;  %436 = vmatpush1.bf16.msra.mxu1 %v6997_v28 }
  0x88   :  { %384 = vmatprep.subr.bf16.mxu0 %v6998_v29  ;;  %437 = vmatprep.subr.bf16.mxu1 %v7000_v30 }
  0x8b   :  { %385 = vmatpush1.bf16.msra.mxu0 %v7002_v31  ;;  %438 = vmatpush1.bf16.msra.mxu1 %v7003_v32  ;;  %v934_v31 = vand.u32 127, %v190_v9 }
  0x8c   :  { %6559 = vmatprep.subr.bf16.mxu1 %v7004_v35  ;;  %6531 = vmatprep.subr.bf16.mxu0 %v7005_v36 }
  0x8e   :  { %403 = vmatmul.mubr.bf16.vlgmr.msra.gmra.mxu0 %v154_v37  ;;  %456 = vmatmul.mubr.bf16.vlgmr.msra.gmra.mxu1 %v154_v37 }
  0x8f   :  { %412 = vmatprep.mubr.bf16.mxu0 %v7739_v2  ;;  %465 = vmatprep.mubr.bf16.mxu1 %v7739_v2 }
  0x90   :  { %6560 = vmatpush3.bf16.msra.mxu1 %v7006_v38  ;;  %6532 = vmatpush3.bf16.msra.mxu0 %v7007_v39 }
  0x91   :  { %6561 = vmatprep.subr.bf16.mxu1 %v7008_v40  ;;  %6533 = vmatprep.subr.bf16.mxu0 %v7009_v43 }
  0x94   :  { %6562 = vmatpush3.bf16.msra.mxu1 %v7010_v44  ;;  %6534 = vmatpush3.bf16.msra.mxu0 %v7011_v45 }
  0x95   :  { %6563 = vmatprep.subr.bf16.mxu1 %v7012_v46  ;;  %6535 = vmatprep.subr.bf16.mxu0 %v7013_v47  ;;  %v7878_v46 = vmul.u32 2, %v934_v31 }
  0x96   :  { %413 = vmatmul.mubr.bf16.gmra.mxu0 %v155_v48  ;;  %466 = vmatmul.mubr.bf16.gmra.mxu1 %v155_v48 }
  0x98   :  { %6564 = vmatpush3.bf16.msra.mxu1 %v7014_v49  ;;  %6536 = vmatpush3.bf16.msra.mxu0 %v7015_v50 }
  0x99   :  { %6565 = vmatprep.subr.bf16.mxu1 %v7016_v51  ;;  %6537 = vmatprep.subr.bf16.mxu0 %v7017_v52 }
  0x9c   :  { %6566 = vmatpush3.bf16.msra.mxu1 %v7018_v53  ;;  %6538 = vmatpush3.bf16.msra.mxu0 %v7019_v54 }
  0x9d   :  { %6567 = vmatprep.subr.bf16.mxu1 %v7020_v55  ;;  %6539 = vmatprep.subr.bf16.mxu0 %v7021_v56 }
  0xa0   :  { %6568 = vmatpush3.bf16.msra.mxu1 %v7022_v57  ;;  %6540 = vmatpush3.bf16.msra.mxu0 %v7023_v58 }
  0xa1   :  { %6569 = vmatprep.subr.bf16.mxu1 %v7024_v59  ;;  %6541 = vmatprep.subr.bf16.mxu0 %v7025_v60 }
  0xa4   :  { %6570 = vmatpush3.bf16.msra.mxu1 %v7026_v61  ;;  %6542 = vmatpush3.bf16.msra.mxu0 %v7027_v62 }
  0xa5   :  { %6571 = vmatprep.subr.bf16.mxu1 %v7028_v63  ;;  %6543 = vmatprep.subr.bf16.mxu0 %v7029_v0 }
  0xa8   :  { %6572 = vmatpush3.bf16.msra.mxu1 %v7030_v1  ;;  %6544 = vmatpush3.bf16.msra.mxu0 %v7031_v3 }
  0xa9   :  { %6573 = vmatprep.subr.bf16.mxu1 %v7032_v4  ;;  %6545 = vmatprep.subr.bf16.mxu0 %v7033_v5 }
  0xac   :  { %6574 = vmatpush3.bf16.msra.mxu1 %v7034_v6  ;;  %6546 = vmatpush3.bf16.msra.mxu0 %v7035_v7 }
 0x14e   :  { %v404_v18 = vpop.f32.mrf.mxu0  ;;  %v457_v19 = vpop.f32.mrf.mxu1 }
 0x14f   :  { %v405_v22 = vadd.f32 %v404_v18, %v193_v16  ;;  %v458_v23 = vadd.f32 %v457_v19, %v201_v17 }
 0x150   :  { %v406_v25 = vpop.f32.mrf.mxu0  ;;  %v459_v26 = vpop.f32.mrf.mxu1 }
 0x151   :  { %vm477_vm0 = vcmp.ge.f32.partialorder %v405_v22, 0.0  ;;  %v407_v27 = vadd.f32 %v406_v25, %v7861_v20  ;;  %v460_v28 = vadd.f32 %v459_v26, %v7863_v21  ;;  %v494_v32 = vmul.f32 %v7865_v24, %v405_v22 }
 0x152   :  { %v408_v29 = vpop.f32.mrf.mxu0  ;;  %v461_v30 = vpop.f32.mrf.mxu1  ;;  %v496_v33 = vmul.f32 %v7865_v24, %v458_v23  ;;  %vm479_vm1 = vcmp.ge.f32.partialorder %v458_v23, 0.0 }
 0x153   :  { %v409_v34 = vadd.f32 %v408_v29, %v193_v16  ;;  %v462_v35 = vadd.f32 %v461_v30, %v201_v17  ;;  %vm478_vm2 = vcmp.ge.f32.partialorder %v407_v27, 0.0  ;;  %v495_v36 = vmul.f32 %v7865_v24, %v407_v27 }
 0x154   :  { %v497_v37 = vmul.f32 %v7865_v24, %v460_v28  ;;  %v410_v38 = vpop.f32.mrf.mxu0  ;;  %v463_v39 = vpop.f32.mrf.mxu1  ;;  %vm480_vm5 = vcmp.ge.f32.partialorder %v460_v28, 0.0  ;;  %v510_v47 = vsel %vm477_vm0, %v405_v22, %v494_v32  ;;  %v512_v48 = vsel %vm479_vm1, %v458_v23, %v496_v33 }
 0x155   :  { %vm481_vm3 = vcmp.ge.f32.partialorder %v409_v34, 0.0  ;;  %v498_v40 = vmul.f32 %v7865_v24, %v409_v34  ;;  %vm483_vm4 = vcmp.ge.f32.partialorder %v462_v35, 0.0  ;;  %v500_v41 = vmul.f32 %v7865_v24, %v462_v35 }
 0x156   :  { %v411_v42 = vadd.f32 %v410_v38, %v7861_v20  ;;  %v464_v43 = vadd.f32 %v463_v39, %v7863_v21  ;;  %v414_v44 = vpop.f32.mrf.mxu0  ;;  %v467_v45 = vpop.f32.mrf.mxu1  ;;  %v511_v55 = vsel %vm478_vm2, %v407_v27, %v495_v36  ;;  %v513_v58 = vsel %vm480_vm5, %v460_v28, %v497_v37  ;;  %v7038_v37 = vld [vmem:[#allocation9 + $0x74] ss:$8 sps:$4 sm:$0xff]  }
 0x157   :  { %v514_v49 = vsel %vm481_vm3, %v409_v34, %v498_v40  ;;  %v516_v50 = vsel %vm483_vm4, %v462_v35, %v500_v41  ;;  %v415_v52 = vadd.f32 %v414_v44, %v193_v16  ;;  %v468_v57 = vadd.f32 %v467_v45, %v201_v17  ;;  %v7036_v45 = vld [vmem:[#allocation9 + $0x70] ss:$8 sps:$4 sm:$0xff]  }
 0x158   :  { %vm482_vm6 = vcmp.ge.f32.partialorder %v411_v42, 0.0  ;;  %v499_v51 = vmul.f32 %v7865_v24, %v411_v42  ;;  %v416_v53 = vpop.f32.mrf.mxu0  ;;  %v469_v54 = vpop.f32.mrf.mxu1  ;;  %vm484_vm7 = vcmp.ge.f32.partialorder %v464_v43, 0.0  ;;  %v501_v56 = vmul.f32 %v7865_v24, %v464_v43 }
 0x159   :  { %v7886_v59 = vpack.c.bf16 %v514_v49, %v510_v47  ;;  %v528_v60 = vpack.c.bf16 %v516_v50, %v512_v48  ;;  %v417_v61 = vadd.f32 %v416_v53, %v7861_v20  ;;  %v470_v62 = vadd.f32 %v469_v54, %v7863_v21  ;;  %v7041_v47 = vld [vmem:[#allocation9 + $0x64] ss:$8 sps:$4 sm:$0xff]   ;;  %v7039_v50 = vld [vmem:[#allocation9 + $0x60] ss:$8 sps:$4 sm:$0xff]   ;;  %v7042_v53 = vld [vmem:[#allocation9 + $0x50] ss:$8 sps:$4 sm:$0xff]  }
 0x15a   :  { %v418_v63 = vpop.f32.mrf.mxu0  ;;  %v471_v0 = vpop.f32.mrf.mxu1  ;;  %v515_v4 = vsel %vm482_vm6, %v411_v42, %v499_v51  ;;  %v517_v5 = vsel %vm484_vm7, %v464_v43, %v501_v56  ;;  %vm485_vm8 = vcmp.ge.f32.partialorder %v415_v52, 0.0  ;;  %v502_v6 = vmul.f32 %v7865_v24, %v415_v52  ;;  %v7044_v51 = vld [vmem:[#allocation9 + $0x54] ss:$8 sps:$4 sm:$0xff]  }
 0x15b   :  { %v419_v1 = vadd.f32 %v418_v63, %v193_v16  ;;  %v472_v3 = vadd.f32 %v471_v0, %v201_v17  ;;  %vm486_vm9 = vcmp.ge.f32.partialorder %v417_v61, 0.0  ;;  %v503_v7 = vmul.f32 %v7865_v24, %v417_v61  ;;  %v7053_v63 = vld [vmem:[#allocation9 + $0x34] ss:$8 sps:$4 sm:$0xff]   ;;  %v7054_v0 = vld [vmem:[#allocation9 + $0x160] ss:$8 sps:$4 sm:$0xff]  }
 0x15c   :  { %v420_v12 = vpop.f32.mrf.mxu0  ;;  %v473_v13 = vpop.f32.mrf.mxu1  ;;  %vm488_vm10 = vcmp.ge.f32.partialorder %v470_v62, 0.0  ;;  %v505_v15 = vmul.f32 %v7865_v24, %v470_v62  ;;  %v527_v22 = vpack.c.bf16 %v515_v4, %v511_v55  ;;  %v529_v23 = vpack.c.bf16 %v517_v5, %v513_v58  ;;  %v7060_v4 = vld [vmem:[#allocation9 + $0x150] ss:$8 sps:$4 sm:$0xff]   ;;  %v7057_v5 = vld [vmem:[#allocation9 + $0x20] ss:$8 sps:$4 sm:$0xff]  }
 0x15d   :  { %v506_v18 = vmul.f32 %v7865_v24, %v419_v1  ;;  %v508_v19 = vmul.f32 %v7865_v24, %v472_v3  ;;  %v421_v16 = vadd.f32 %v420_v12, %v7861_v20  ;;  %v474_v17 = vadd.f32 %v473_v13, %v7863_v21  ;;  %v7066_v12 = vld [vmem:[#allocation9 + $0x140] ss:$8 sps:$4 sm:$0xff]   ;;  %v7063_v13 = vld [vmem:[#allocation9 + $0x10] ss:$8 sps:$4 sm:$0xff]  }
 0x15e   :  { %v504_v25 = vmul.f32 %v7865_v24, %v468_v57  ;;  %vm489_vm11 = vcmp.ge.f32.partialorder %v419_v1, 0.0  ;;  %vm491_vm12 = vcmp.ge.f32.partialorder %v472_v3, 0.0  ;;  %v519_v26 = vsel %vm486_vm9, %v417_v61, %v503_v7  ;;  %829 = vmatprep.mubr.bf16.mxu0 %v527_v22  ;;  %878 = vmatprep.mubr.bf16.mxu1 %v529_v23  ;;  %v7045_v61 = vld [vmem:[#allocation9 + $0x40] ss:$8 sps:$4 sm:$0xff]   ;;  %v7065_v7 = vld [vmem:[#allocation9 + $0x14] ss:$8 sps:$4 sm:$0xff]  }
 0x15f   :  { %vm490_vm13 = vcmp.ge.f32.partialorder %v421_v16, 0.0  ;;  %v507_v27 = vmul.f32 %v7865_v24, %v421_v16  ;;  %vm492_vm14 = vcmp.ge.f32.partialorder %v474_v17, 0.0  ;;  %v509_v28 = vmul.f32 %v7865_v24, %v474_v17  ;;  %978 = vmatprep.subr.bf16.mxu1 %v529_v23  ;;  %830 = vmatmul.mubr.bf16.vlgmr.msra.gmra.mxu0 %v7886_v59  ;;  %v7078_v23 = vld [vmem:[#allocation9 + $0x120] ss:$8 sps:$4 sm:$0xff]  }
 0x160   :  { %vm487_vm15 = vcmp.ge.f32.partialorder %v468_v57, 0.0  ;;  %v521_v20 = vsel %vm488_vm10, %v470_v62, %v505_v15  ;;  %v518_v21 = vsel %vm485_vm8, %v415_v52, %v502_v6  ;;  %879 = vmatmul.mubr.bf16.vlgmr.msra.gmra.mxu1 %v528_v60  ;;  %v522_v31 = vsel %vm489_vm11, %v419_v1, %v506_v18  ;;  %v7056_v62 = vld [vmem:[#allocation9 + $0x164] ss:$8 sps:$4 sm:$0xff]   ;;  %v7051_v1 = vld [vmem:[#allocation9 + $0x30] ss:$8 sps:$4 sm:$0xff]  }
 0x161   :  { %v523_v29 = vsel %vm490_vm13, %v421_v16, %v507_v27  ;;  %v525_v30 = vsel %vm492_vm14, %v474_v17, %v509_v28  ;;  %v524_v32 = vsel %vm491_vm12, %v472_v3, %v508_v19  ;;  %979 = vmatpush1.bf16.msra.mxu1 %v528_v60  ;;  %v520_v34 = vsel %vm487_vm15, %v468_v57, %v504_v25  ;;  %v7048_v60 = vld [vmem:[#allocation9 + $0x170] ss:$8 sps:$4 sm:$0xff]   ;;  %v7062_v3 = vld [vmem:[#allocation9 + $0x154] ss:$8 sps:$4 sm:$0xff]   ;;  %v7068_v6 = vld [vmem:[#allocation9 + $0x144] ss:$8 sps:$4 sm:$0xff]  }
 0x162   :  { %v531_v33 = vpack.c.bf16 %v523_v29, %v519_v26  ;;  %v533_v24 = vpack.c.bf16 %v525_v30, %v521_v20  ;;  %1037 = vmatprep.subr.bf16.mxu1 %v527_v22  ;;  %v930_v35 = vadd.s32 8, %v7849_v10  ;;  %v946_v36 = vadd.s32 1, %v7878_v46  ;;  %v7074_v15 = vld [vmem:[#allocation9 + $0x134] ss:$8 sps:$4 sm:$0xff]   ;;  %v7071_v18 = vld [vmem:[#allocation9 + $0x4] ss:$8 sps:$4 sm:$0xff]  }
 0x163   :  { %v530_v38 = vpack.c.bf16 %v522_v31, %v518_v21  ;;  %v532_v39 = vpack.c.bf16 %v524_v32, %v520_v34  ;;  %v931_v42 = vadd.s32 16, %v7849_v10  ;;  %v932_v43 = vadd.s32 24, %v7849_v10  ;;  %v7072_v19 = vld [vmem:[#allocation9 + $0x130] ss:$8 sps:$4 sm:$0xff]   ;;  %v7069_v16 = vld [vmem:[#allocation9] ss:$8 sps:$4 sm:$0xff]  }
 0x164   :  { %837 = vmatprep.mubr.bf16.mxu0 %v531_v33  ;;  %886 = vmatprep.mubr.bf16.mxu1 %v533_v24  ;;  %vm947_vm0 = vcmp.eq.s32.totalorder %v7849_v10, %v946_v36  ;;  %vm948_vm1 = vcmp.eq.s32.totalorder %v930_v35, %v946_v36  ;;  %vm957_vm2 = vcmask 130048   ;;  %vm936_vm5 = vcmp.eq.s32.totalorder %v7849_v10, %v7878_v46  ;;  %v7080_v17 = vld [vmem:[#allocation9 + $0x124] ss:$8 sps:$4 sm:$0xff]   ;;  %v7077_v22 = vld [vmem:[#allocation9 + $0xf4] ss:$8 sps:$4 sm:$0xff]  }
 0x165   :  { %1135 = vmatprep.subr.bf16.mxu0 %v533_v24  ;;  %v951_v40 = vsel %vm947_vm0, 1.0, %v8746_v8  ;;  %v952_v41 = vsel %vm948_vm1, 1.0, %v8746_v8  ;;  %vm949_vm3 = vcmp.eq.s32.totalorder %v931_v42, %v946_v36  ;;  %vm950_vm4 = vcmp.eq.s32.totalorder %v932_v43, %v946_v36  ;;  %v7075_v25 = vld [vmem:[#allocation9 + $0xf0] ss:$8 sps:$4 sm:$0xff]   ;;  %v7086_v26 = vld [vmem:[#allocation9 + $0x114] ss:$8 sps:$4 sm:$0xff]  }
 0x166   :  { %1136 = vmatpush1.bf16.msra.mxu0 %v532_v39  ;;  %v955_v44 = vpack.c.bf16 %v952_v41, %v951_v40  ;;  %v953_v48 = vsel %vm949_vm3, 1.0, %v8746_v8  ;;  %v954_v49 = vsel %vm950_vm4, 1.0, %v8746_v8  ;;  %vm937_vm6 = vcmp.eq.s32.totalorder %v930_v35, %v7878_v46  ;;  %v7083_v27 = vld [vmem:[#allocation9 + $0xe4] ss:$8 sps:$4 sm:$0xff]   ;;  %v7084_v28 = vld [vmem:[#allocation9 + $0x110] ss:$8 sps:$4 sm:$0xff]  }
 0x167   :  { %1504 = vmatprep.subr.bf16.mxu0 %v7038_v37  ;;  %838 = vmatmul.mubr.bf16.gmra.mxu0 %v530_v38  ;;  %v956_v52 = vpack.c.bf16 %v954_v49, %v953_v48  ;;  %v940_v54 = vsel %vm936_vm5, 1.0, %v8746_v8  ;;  %v941_v55 = vsel %vm937_vm6, 1.0, %v8746_v8  ;;  %vm938_vm7 = vcmp.eq.s32.totalorder %v931_v42, %v7878_v46  ;;  %v7081_v20 = vld [vmem:[#allocation9 + $0xe0] ss:$8 sps:$4 sm:$0xff]   ;;  %v7092_v21 = vld [vmem:[#allocation9 + $0x104] ss:$8 sps:$4 sm:$0xff]  }
 0x168   :  { %887 = vmatmul.mubr.bf16.gmra.mxu1 %v532_v39  ;;  %1153 = vmatprep.mubr.bf16.mxu0 %v7739_v2  ;;  %v944_v56 = vpack.c.bf16 %v941_v55, %v940_v54  ;;  %vm939_vm8 = vcmp.eq.s32.totalorder %v932_v43, %v7878_v46  ;;  %v942_v10 = vsel %vm938_vm7, 1.0, %v8746_v8  ;;  %v7050_v46 = vld [vmem:[#allocation9 + $0x174] ss:$8 sps:$4 sm:$0xff]   ;;  %v7090_v30 = vld [vmem:[#allocation9 + $0x100] ss:$8 sps:$4 sm:$0xff]   ;;  %vm915_vm9 = vcmp.lt.s32.totalorder %v190_v9, 256 }
 0x169   :  { %996 = vmatprep.mubr.bf16.mxu1 %v7739_v2  ;;  %v943_v57 = vsel %vm939_vm8, 1.0, %v8746_v8  ;;  %v7089_v29 = vld [vmem:[#allocation9 + $0xd4] ss:$8 sps:$4 sm:$0xff]   ;;  %v7087_v31 = vld [vmem:[#allocation9 + $0xd0] ss:$8 sps:$4 sm:$0xff]   ;;  %vm1084_vm14 = vcmask 1040384  }
 0x16a   :  { %v945_v58 = vpack.c.bf16 %v943_v57, %v942_v10  ;;  %v7098_v32 = vld [vmem:[#allocation9 + $0x1f4] ss:$8 sps:$4 sm:$0xff]   ;;  %v7096_v24 = vld [vmem:[#allocation9 + $0x1f0] ss:$8 sps:$4 sm:$0xff]   ;;  %v7093_v34 = vld [vmem:[#allocation9 + $0xc0] ss:$8 sps:$4 sm:$0xff]  }
 0x16b   :  { %v7104_v35 = vld [vmem:[#allocation9 + $0x1e4] ss:$8 sps:$4 sm:$0xff]   ;;  %v7101_v36 = vld [vmem:[#allocation9 + $0xb4] ss:$8 sps:$4 sm:$0xff]   ;;  %v7102_v37 = vld [vmem:[#allocation9 + $0x1e0] ss:$8 sps:$4 sm:$0xff]  }
 0x16c   :  { %v7110_v39 = vld [vmem:[#allocation9 + $0x1d4] ss:$8 sps:$4 sm:$0xff]   ;;  %v7107_v40 = vld [vmem:[#allocation9 + $0xa4] ss:$8 sps:$4 sm:$0xff]   ;;  %v7108_v41 = vld [vmem:[#allocation9 + $0x1d0] ss:$8 sps:$4 sm:$0xff]  }
 0x16d   :  { %v7105_v42 = vld [vmem:[#allocation9 + $0xa0] ss:$8 sps:$4 sm:$0xff]   ;;  %917 = vst.msk [vmem:[#allocation2] ss:$8 sm:$0x3] %vm915_vm9, %v8746_v8  ;;  %vm1235_vm15 = vcmask 1041408  }
 0x16e   :  { %921 = vst.msk [vmem:[#allocation2 + $0x41] ss:$8 sm:$0x3] %vm915_vm9, %v8746_v8  ;;  %925 = vst.msk [vmem:[#allocation2 + $0x82] ss:$8 sm:$0x3] %vm915_vm9, %v8746_v8 }
 0x16f   :  { %6158 = vmatmul.mubr.msk.bf16.vlgmr.msra.gmra.mxu0 %vm957_vm2, %v955_v44  ;;  %v7116_v43 = vld [vmem:[#allocation9 + $0x1c4] ss:$8 sps:$4 sm:$0xff]   ;;  %v7122_v48 = vld [vmem:[#allocation9 + $0x1b4] ss:$8 sps:$4 sm:$0xff]   ;;  %v7120_v9 = vld [vmem:[#allocation9 + $0x1b0] ss:$8 sps:$4 sm:$0xff]  }
 0x170   :  { %6154 = vmatmul.mubr.msk.bf16.vlgmr.msra.gmra.mxu1 %vm957_vm2, %v955_v44  ;;  %1163 = vmatprep.mubr.bf16.mxu0 %v7739_v2  ;;  %v7113_v44 = vld [vmem:[#allocation9 + $0x94] ss:$8 sps:$4 sm:$0xff]   ;;  %v7119_v49 = vld [vmem:[#allocation9 + $0x84] ss:$8 sps:$4 sm:$0xff]   ;;  %v7132_v55 = vld [vmem:[#allocation9 + $0x190] ss:$8 sps:$4 sm:$0xff]  }
 0x171   :  { %1038 = vmatpush1.bf16.msra.mxu1 %v7886_v59  ;;  %1006 = vmatprep.mubr.bf16.mxu1 %v7739_v2  ;;  %v7047_v59 = vld [vmem:[#allocation9 + $0x44] ss:$8 sps:$4 sm:$0xff]   ;;  %v7134_v54 = vld [vmem:[#allocation9 + $0x194] ss:$8 sps:$4 sm:$0xff]   ;;  %v7138_v10 = vld [vmem:[#allocation9 + $0x180] ss:$8 sps:$4 sm:$0xff]  }
 0x172   :  { %1188 = vmatprep.subr.bf16.mxu1 %v531_v33  ;;  %1505 = vmatpush1.bf16.msra.mxu0 %v7036_v45  ;;  %v7095_v33 = vld [vmem:[#allocation9 + $0xc4] ss:$8 sps:$4 sm:$0xff]   ;;  %v7114_v45 = vld [vmem:[#allocation9 + $0x1c0] ss:$8 sps:$4 sm:$0xff]   ;;  %vm1626_vm0 = vsmask.f32 7424 }
 0x173   :  { %1506 = vmatprep.subr.bf16.mxu0 %v7041_v47  ;;  %v7111_v47 = vld [vmem:[#allocation9 + $0x90] ss:$8 sps:$4 sm:$0xff]   ;;  %vm2023_vm1 = vcmask 1046528  }
 0x176   :  { %1507 = vmatpush1.bf16.msra.mxu0 %v7039_v50  ;;  %v7117_v50 = vld [vmem:[#allocation9 + $0x80] ss:$8 sps:$4 sm:$0xff]  }
 0x177   :  { %6159 = vmatmul.mubr.msk.bf16.gmra.mxu0 %vm957_vm2, %v956_v52  ;;  %1508 = vmatprep.subr.bf16.mxu0 %v7044_v51  ;;  %v7128_v51 = vld [vmem:[#allocation9 + $0x1a4] ss:$8 sps:$4 sm:$0xff]  }
 0x178   :  { %6155 = vmatmul.mubr.msk.bf16.gmra.mxu1 %vm957_vm2, %v956_v52  ;;  %v7125_v52 = vld [vmem:[#allocation9 + $0x274] ss:$8 sps:$4 sm:$0xff]  }
 0x179   :  { %1055 = vmatprep.mubr.bf16.mxu1 %v7739_v2 }
 0x17a   :  { %1509 = vmatpush1.bf16.msra.mxu0 %v7042_v53  ;;  %v7126_v53 = vld [vmem:[#allocation9 + $0x1a0] ss:$8 sps:$4 sm:$0xff]  }
 0x17b   :  { %1510 = vmatprep.subr.bf16.mxu0 %v7047_v59 }
 0x17e   :  { %1511 = vmatpush1.bf16.msra.mxu0 %v7045_v61 }
 0x17f   :  { %1512 = vmatprep.subr.bf16.mxu0 %v7053_v63 }
 0x180   :  { %6156 = vmatmul.mubr.msk.bf16.vlgmr.msra.gmra.mxu1 %vm957_vm2, %v944_v56 }
 0x181   :  { %1065 = vmatprep.mubr.bf16.mxu1 %v7739_v2  ;;  %1189 = vmatpush1.bf16.msra.mxu1 %v530_v38  ;;  %v7099_v38 = vld [vmem:[#allocation9 + $0xb0] ss:$8 sps:$4 sm:$0xff]  }
 0x182   :  { %1873 = vmatprep.subr.bf16.mxu1 %v7050_v46  ;;  %1513 = vmatpush1.bf16.msra.mxu0 %v7051_v1  ;;  %v6120_v46 = vld [vmem:[#allocation13] ss:$0 sm:$0xff] }
 0x188   :  { %6157 = vmatmul.mubr.msk.bf16.gmra.mxu1 %vm957_vm2, %v945_v58 }
 0x189   :  { %1206 = vmatprep.mubr.bf16.mxu1 %v7739_v2 }
 0x190   :  { %6160 = vmatmul.mubr.msk.bf16.vlgmr.msra.gmra.mxu1 %vm957_vm2, %v944_v56  ;;  %v7140_v56 = vld [vmem:[#allocation9 + $0x184] ss:$8 sps:$4 sm:$0xff]  }
 0x191   :  { %1216 = vmatprep.mubr.bf16.mxu1 %v7739_v2  ;;  %1874 = vmatpush1.bf16.msra.mxu1 %v7048_v60  ;;  %v7059_v2 = vld [vmem:[#allocation9 + $0x24] ss:$8 sps:$4 sm:$0xff]  }
 0x192   :  { %1875 = vmatprep.subr.bf16.mxu1 %v7056_v62  ;;  %1514 = vmatprep.subr.bf16.mxu0 %v7059_v2 }
 0x193   :  { %1515 = vmatpush1.bf16.msra.mxu0 %v7057_v5 }
 0x194   :  { %1516 = vmatprep.subr.bf16.mxu0 %v7065_v7 }
 0x195   :  { %1876 = vmatpush1.bf16.msra.mxu1 %v7054_v0 }
 0x196   :  { %1877 = vmatprep.subr.bf16.mxu1 %v7062_v3  ;;  %v900_v3 = vstv %s6153_s26 }
 0x197   :  { %1517 = vmatpush1.bf16.msra.mxu0 %v7063_v13 }
 0x198   :  { %6161 = vmatmul.mubr.msk.bf16.gmra.mxu1 %vm957_vm2, %v945_v58  ;;  %1518 = vmatprep.subr.bf16.mxu0 %v7071_v18 }
 0x199   :  { %1878 = vmatpush1.bf16.msra.mxu1 %v7060_v4 }
 0x19a   :  { %1879 = vmatprep.subr.bf16.mxu1 %v7068_v6 }
 0x19b   :  { %1519 = vmatpush1.bf16.msra.mxu0 %v7069_v16 }
 0x19c   :  { %1520 = vmatprep.subr.bf16.mxu0 %v7077_v22 }
 0x19d   :  { %1880 = vmatpush1.bf16.msra.mxu1 %v7066_v12 }
 0x19e   :  { %1881 = vmatprep.subr.bf16.mxu1 %v7074_v15 }
 0x19f   :  { %1521 = vmatpush2.bf16.msra.mxu0 %v7075_v25  ;;  %v7540_v25 = vld [vmem:[%s8734_s0] sm:$0xff] }
 0x1a0   :  { %1522 = vmatprep.subr.bf16.mxu0 %v7083_v27 }
 0x1a1   :  { %1882 = vmatpush1.bf16.msra.mxu1 %v7072_v19 }
 0x1a2   :  { %1883 = vmatprep.subr.bf16.mxu1 %v7080_v17 }
 0x1a3   :  { %1523 = vmatpush2.bf16.msra.mxu0 %v7081_v20 }
 0x1a4   :  { %1524 = vmatprep.subr.bf16.mxu0 %v7089_v29 }
 0x1a5   :  { %1884 = vmatpush1.bf16.msra.mxu1 %v7078_v23 }
 0x1a6   :  { %1885 = vmatprep.subr.bf16.mxu1 %v7086_v26 }
 0x1a7   :  { %1525 = vmatpush2.bf16.msra.mxu0 %v7087_v31 }
 0x1a8   :  { %1526 = vmatprep.subr.bf16.mxu0 %v7095_v33 }
 0x1a9   :  { %1886 = vmatpush1.bf16.msra.mxu1 %v7084_v28 }
 0x1aa   :  { %1887 = vmatprep.subr.bf16.mxu1 %v7092_v21 }
 0x1ab   :  { %1527 = vmatpush2.bf16.msra.mxu0 %v7093_v34  ;;  %v7541_v34 = vld [vmem:[%s8734_s0 + $0x8] sm:$0xff] }
 0x1ac   :  { %1528 = vmatprep.subr.bf16.mxu0 %v7101_v36 }
 0x1ad   :  { %1888 = vmatpush1.bf16.msra.mxu1 %v7090_v30 }
 0x1ae   :  { %1889 = vmatprep.subr.bf16.mxu1 %v7098_v32 }
 0x1af   :  { %1529 = vmatpush2.bf16.msra.mxu0 %v7099_v38 }
 0x1b0   :  { %1530 = vmatprep.subr.bf16.mxu0 %v7107_v40 }
 0x1b1   :  { %1890 = vmatpush2.bf16.msra.mxu1 %v7096_v24 }
 0x1b2   :  { %1891 = vmatprep.subr.bf16.mxu1 %v7104_v35 }
 0x1b3   :  { %1531 = vmatpush2.bf16.msra.mxu0 %v7105_v42 }
 0x1b4   :  { %1532 = vmatprep.subr.bf16.mxu0 %v7113_v44 }
 0x1b5   :  { %1892 = vmatpush2.bf16.msra.mxu1 %v7102_v37 }
 0x1b6   :  { %1893 = vmatprep.subr.bf16.mxu1 %v7110_v39 }
 0x1b7   :  { %1533 = vmatpush2.bf16.msra.mxu0 %v7111_v47 }
 0x1b8   :  { %1534 = vmatprep.subr.bf16.mxu0 %v7119_v49 }
 0x1b9   :  { %1894 = vmatpush2.bf16.msra.mxu1 %v7108_v41 }
 0x1ba   :  { %1895 = vmatprep.subr.bf16.mxu1 %v7116_v43  ;;  %v7542_v43 = vld [vmem:[%s8734_s0 + $0x10] sm:$0xff] }
 0x1bb   :  { %1535 = vmatpush2.bf16.msra.mxu0 %v7117_v50 }
 0x1bc   :  { %2212 = vmatprep.subr.bf16.mxu0 %v7125_v52 }
 0x1bd   :  { %1896 = vmatpush2.bf16.msra.mxu1 %v7114_v45 }
 0x1be   :  { %1897 = vmatprep.subr.bf16.mxu1 %v7122_v48 }
 0x1c1   :  { %1898 = vmatpush2.bf16.msra.mxu1 %v7120_v9  ;;  %v7543_v9 = vld [vmem:[%s8734_s0 + $0x18] sm:$0xff]  ;;  %s6258_s0 = sld [smem:[#allocation18 + $0x2]] }
 0x1c2   :  { %1899 = vmatprep.subr.bf16.mxu1 %v7128_v51 }
 0x1c5   :  { %1900 = vmatpush2.bf16.msra.mxu1 %v7126_v53 }
 0x1c6   :  { %1901 = vmatprep.subr.bf16.mxu1 %v7134_v54 }
 0x1c9   :  { %1902 = vmatpush2.bf16.msra.mxu1 %v7132_v55 }
 0x1ca   :  { %1903 = vmatprep.subr.bf16.mxu1 %v7140_v56 }
 0x1cd   :  { %1904 = vmatpush2.bf16.msra.mxu1 %v7138_v10 }
 0x21f   :  { %v6547_v57 = vpop.f32.mrf.mxu0 }
 0x220   :  { %v6575_v58 = vpop.f32.mrf.mxu1 }
 0x221   :  { %v6548_v59 = vpop.f32.mrf.mxu0 }
 0x222   :  { %v6549_v60 = vadd.f32 %v6548_v59, %v6547_v57  ;;  %v6576_v61 = vpop.f32.mrf.mxu1 }
 0x223   :  { %v6550_v62 = vpop.f32.mrf.mxu0  ;;  %v6577_v0 = vadd.f32 %v6576_v61, %v6575_v58 }
 0x224   :  { %v832_v63 = vadd.f32 %v6549_v60, %v6120_v46  ;;  %v6578_v1 = vpop.f32.mrf.mxu1 }
 0x225   :  { %v6551_v2 = vpop.f32.mrf.mxu0 }
 0x226   :  { %v881_v4 = vadd.f32 %v6577_v0, %v832_v63  ;;  %v6552_v5 = vadd.f32 %v6551_v2, %v6550_v62  ;;  %v6579_v6 = vpop.f32.mrf.mxu1 }
 0x227   :  { %v6553_v7 = vpop.f32.mrf.mxu0  ;;  %v6580_v15 = vadd.f32 %v6579_v6, %v6578_v1 }
 0x228   :  { %vm896_vm10 = vcmp.ge.f32.partialorder %v881_v4, 0.0  ;;  %v901_v12 = vmul.f32 %v900_v3, %v881_v4  ;;  %v835_v13 = vadd.f32 %v6552_v5, %v6120_v46  ;;  %v6581_v18 = vpop.f32.mrf.mxu1 }
 0x229   :  { %v6554_v19 = vpop.f32.mrf.mxu0 }
 0x22a   :  { %v905_v16 = vsel %vm896_vm10, %v881_v4, %v901_v12  ;;  %v884_v17 = vadd.f32 %v6580_v15, %v835_v13  ;;  %v6555_v22 = vadd.f32 %v6554_v19, %v6553_v7  ;;  %v6582_v23 = vpop.f32.mrf.mxu1 }
 0x22b   :  { %v7948_v26 = vsub.f32 %v7540_v25, %v905_v16  ;;  %v6556_v27 = vpop.f32.mrf.mxu0  ;;  %v6583_v21 = vadd.f32 %v6582_v23, %v6581_v18 }
 0x22c   :  { %vm897_vm11 = vcmp.ge.f32.partialorder %v884_v17, 0.0  ;;  %v902_v28 = vmul.f32 %v900_v3, %v884_v17  ;;  %v840_v20 = vadd.f32 %v6555_v22, %v6120_v46  ;;  %v6584_v29 = vpop.f32.mrf.mxu1 }
 0x22d   :  { %1119 = vst [vmem:[#allocation3 + $0x1] sm:$0xff] %v7948_v26  ;;  %v6557_v30 = vpop.f32.mrf.mxu0 }
 0x22e   :  { %v906_v31 = vsel %vm897_vm11, %v884_v17, %v902_v28  ;;  %v889_v32 = vadd.f32 %v6583_v21, %v840_v20  ;;  %v6558_v33 = vadd.f32 %v6557_v30, %v6556_v27  ;;  %v6585_v24 = vpop.f32.mrf.mxu1 }
 0x22f   :  { %v7954_v35 = vsub.f32 %v7541_v34, %v906_v31  ;;  %v6586_v38 = vadd.f32 %v6585_v24, %v6584_v29  ;;  %v1155_v56 = vpop.f32.mrf.mxu0  ;;  %v7123_v31 = vld [vmem:[#allocation9 + $0x270] ss:$8 sps:$4 sm:$0xff]  }
 0x230   :  { %vm898_vm12 = vcmp.ge.f32.partialorder %v889_v32, 0.0  ;;  %v903_v36 = vmul.f32 %v900_v3, %v889_v32  ;;  %v843_v37 = vadd.f32 %v6558_v33, %v6120_v46  ;;  %v998_v39 = vpop.f32.mrf.mxu1 }
 0x231   :  { %1120 = vst [vmem:[#allocation3 + $0x9] sm:$0xff] %v7954_v35  ;;  %v1157_v60 = vpop.f32.mrf.mxu0 }
 0x232   :  { %v907_v40 = vsel %vm898_vm12, %v889_v32, %v903_v36  ;;  %v892_v41 = vadd.f32 %v6586_v38, %v843_v37  ;;  %v1000_v42 = vpop.f32.mrf.mxu1  ;;  %v7131_v36 = vld [vmem:[#allocation9 + $0x264] ss:$8 sps:$4 sm:$0xff]  }
 0x233   :  { %v7960_v44 = vsub.f32 %v7542_v43, %v907_v40 }
 0x234   :  { %vm899_vm13 = vcmp.ge.f32.partialorder %v892_v41, 0.0  ;;  %v904_v45 = vmul.f32 %v900_v3, %v892_v41  ;;  %v1002_v47 = vpop.f32.mrf.mxu1  ;;  %v1159_v3 = vpop.f32.mrf.mxu0 }
 0x235   :  { %1270 = vst [vmem:[#allocation3 + $0x12] sm:$0xff] %v7960_v44 }
 0x236   :  { %v908_v48 = vsel %vm899_vm13, %v892_v41, %v904_v45  ;;  %v1004_v49 = vpop.f32.mrf.mxu1  ;;  %v1161_v15 = vpop.f32.mrf.mxu0 }
 0x237   :  { %v7966_v50 = vsub.f32 %v7543_v9, %v908_v48 }
 0x238   :  { %v1008_v51 = vpop.f32.mrf.mxu1  ;;  %v1165_v34 = vpop.f32.mrf.mxu0 }
 0x239   :  { %8749 = vst [vmem:[#allocation25_spill] sm:$0xff] %v7966_v50  ;;  %1271 = vst [vmem:[#allocation3 + $0x1a] sm:$0xff] %v7966_v50 }
 0x23a   :  { %v1010_v52 = vpop.f32.mrf.mxu1 }
 0x23c   :  { %v1012_v53 = vpop.f32.mrf.mxu1 }
 0x23e   :  { %v1014_v54 = vpop.f32.mrf.mxu1 }
 0x240   :  { %v1057_v55 = vpop.f32.mrf.mxu1 }
 0x241   :  { %v1058_v10 = vadd.f32 %v1057_v55, %v998_v39  ;;  %v7137_v55 = vld [vmem:[#allocation9 + $0x254] ss:$8 sps:$4 sm:$0xff]  }
 0x242   :  { %v1059_v57 = vpop.f32.mrf.mxu1 }
 0x243   :  { %v1085_v58 = vrot.slane %v1058_v10, 7  ;;  %v1060_v46 = vadd.f32 %v1059_v57, %v1000_v42 }
 0x244   :  { %v1061_v59 = vpop.f32.mrf.mxu1 }
 0x245   :  { %1109 = vst [vmem:[#allocation2] sm:$0xfe] %v1085_v58  ;;  %v1086_v61 = vrot.slane %v1060_v46, 7  ;;  %v1062_v62 = vadd.f32 %v1061_v59, %v1002_v47 }
 0x246   :  { %v1063_v63 = vpop.f32.mrf.mxu1 }
 0x247   :  { %1110 = vst [vmem:[#allocation2 + $0x8] sm:$0xfe] %v1086_v61  ;;  %v1064_v0 = vadd.f32 %v1063_v63, %v1004_v49  ;;  %v1087_v2 = vrot.slane %v1062_v62, 7 }
 0x248   :  { %v1067_v1 = vpop.f32.mrf.mxu1 }
 0x249   :  { %v1068_v4 = vadd.f32 %v1067_v1, %v1008_v51  ;;  %v1089_v5 = vrot.slane %v1064_v0, 7  ;;  %v7970_v19 = vsel %vm1084_vm14, %v1085_v58, %v1087_v2  ;;  %v7129_v51 = vld [vmem:[#allocation9 + $0x260] ss:$8 sps:$4 sm:$0xff]   ;;  %v7135_v0 = vld [vmem:[#allocation9 + $0x250] ss:$8 sps:$4 sm:$0xff]  }
 0x24a   :  { %v1069_v6 = vpop.f32.mrf.mxu1 }
 0x24b   :  { %v1070_v7 = vadd.f32 %v1069_v6, %v1010_v52  ;;  %v1091_v12 = vrot.slane %v1068_v4, 7  ;;  %v7973_v22 = vsel %vm1084_vm14, %v1086_v61, %v1089_v5  ;;  %v7143_v6 = vld [vmem:[#allocation9 + $0x244] ss:$8 sps:$4 sm:$0xff]  }
 0x24c   :  { %v1071_v13 = vpop.f32.mrf.mxu1  ;;  %v1585_v18 = vld [vmem:[#allocation2] sm:$0xfe] }
 0x24d   :  { %v1072_v16 = vadd.f32 %v1071_v13, %v1012_v53  ;;  %v1272_v17 = vld [vmem:[#allocation2] sm:$0xff]  ;;  %v1589_v28 = vpack.c.bf16 %v7970_v19, %v1585_v18  ;;  %v1093_v20 = vrot.slane %v1070_v7, 7  ;;  %v1092_v32 = vsel %vm1084_vm14, %v1087_v2, %v1091_v12  ;;  %v1167_v53 = vpop.f32.mrf.mxu0 }
 0x24e   :  { %v1073_v23 = vpop.f32.mrf.mxu1  ;;  %v1273_v25 = vld [vmem:[#allocation2 + $0x8] sm:$0xff]  ;;  %v1290_v24 = vpack.c.bf16 %v7970_v19, %v1272_v17 }
 0x24f   :  { %v1586_v27 = vld [vmem:[#allocation2 + $0x8] sm:$0xfe]  ;;  %v1095_v21 = vrot.slane %v1072_v16, 7  ;;  %v1074_v29 = vadd.f32 %v1073_v23, %v1014_v54  ;;  %v1291_v30 = vpack.c.bf16 %v7973_v22, %v1273_v25  ;;  %v1630_v41 = vshll.u32 %v1589_v28, 16 }
 0x250   :  { %v1208_v33 = vpop.f32.mrf.mxu1  ;;  %v1590_v37 = vpack.c.bf16 %v7973_v22, %v1586_v27  ;;  %v1094_v47 = vsel %vm1084_vm14, %v1089_v5, %v1093_v20  ;;  %v1628_v1 = vshrl.u32 %v1589_v28, 16  ;;  %v1169_v5 = vpop.f32.mrf.mxu0  ;;  %v7141_v27 = vld [vmem:[#allocation9 + $0x240] ss:$8 sps:$4 sm:$0xff]  }
 0x251   :  { %v1096_v38 = vsel %vm1084_vm14, %v1091_v12, %v1095_v21  ;;  %1117 = vst [vmem:[#allocation2 + $0x40] sm:$0x1] %v1095_v21  ;;  %v1097_v39 = vrot.slane %v1074_v29, 7  ;;  %v1209_v40 = vadd.f32 %v1208_v33, %v1155_v56  ;;  %1536 = vmatprep.mubr.bf16.mxu0 %v1291_v30  ;;  %v1632_v46 = vrot.slane %v1630_v41, 1  ;;  %v7146_v30 = vld [vmem:[#allocation9 + $0x234] ss:$8 sps:$4 sm:$0xff]  }
 0x252   :  { %v1210_v42 = vpop.f32.mrf.mxu1  ;;  %1537 = vmatmul.mubr.bf16.vlgmr.msra.gmra.mxu0 %v1290_v24  ;;  %v7981_v43 = vpack.c.bf16 %v1096_v38, %v1092_v32  ;;  %v1642_v45 = vshll.u32 %v1590_v37, 16  ;;  %v1171_v29 = vpop.f32.mrf.mxu0  ;;  %v7144_v41 = vld [vmem:[#allocation9 + $0x230] ss:$8 sps:$4 sm:$0xff]  }
 0x253   :  { %v1098_v48 = vsel %vm1084_vm14, %v1093_v20, %v1097_v39  ;;  %1118 = vst [vmem:[#allocation2 + $0x48] sm:$0x1] %v1097_v39  ;;  %v1236_v49 = vrot.slane %v1209_v40, 6  ;;  %v1211_v9 = vadd.f32 %v1210_v42, %v1157_v60  ;;  %2213 = vmatpush1.bf16.msra.mxu0 %v7123_v31  ;;  %v1640_v60 = vshrl.u32 %v1590_v37, 16  ;;  %v7149_v42 = vld [vmem:[#allocation9 + $0x224] ss:$8 sps:$4 sm:$0xff]  }
 0x254   :  { %v1212_v52 = vpop.f32.mrf.mxu1  ;;  %2214 = vmatprep.subr.bf16.mxu0 %v7131_v36  ;;  %v7985_v54 = vpack.c.bf16 %v1098_v48, %v1094_v47  ;;  %v1644_v56 = vrot.slane %v1642_v45, 1  ;;  %v1635_v10 = vshll.u32 %v7981_v43, 16  ;;  %v1633_v18 = vor.u32 %v1632_v46, %v1628_v1 }
 0x255   :  { %1260 = vst [vmem:[#allocation2 + $0x40] sm:$0xfc] %v1236_v49  ;;  %v1237_v57 = vrot.slane %v1211_v9, 6  ;;  %v1213_v58 = vadd.f32 %v1212_v52, %v1159_v3  ;;  %v1651_v52 = vshrl.u32 %v7981_v43, 16 }
 0x256   :  { %v1214_v59 = vpop.f32.mrf.mxu1  ;;  %1546 = vmatprep.mubr.bf16.mxu0 %v7985_v54  ;;  %v1647_v61 = vshll.u32 %v7985_v54, 16  ;;  %v1637_v2 = vrot.slane %v1635_v10, 1  ;;  %v1645_v3 = vor.u32 %v1644_v56, %v1640_v60  ;;  %v1659_v45 = vshrl.u32 %v7985_v54, 16  ;;  %v7147_v10 = vld [vmem:[#allocation9 + $0x220] ss:$8 sps:$4 sm:$0xff]  }
 0x257   :  { %1261 = vst [vmem:[#allocation2 + $0x48] sm:$0xfc] %v1237_v57  ;;  %v1238_v62 = vrot.slane %v1213_v58, 6  ;;  %v1215_v63 = vadd.f32 %v1214_v59, %v1161_v15  ;;  %2215 = vmatpush1.bf16.msra.mxu0 %v7129_v51  ;;  %v7152_v60 = vld [vmem:[#allocation9 + $0x214] ss:$8 sps:$4 sm:$0xff]  }
 0x258   :  { %v1218_v4 = vpop.f32.mrf.mxu1  ;;  %2216 = vmatprep.subr.bf16.mxu0 %v7137_v55  ;;  %v1649_v7 = vrot.slane %v1647_v61, 1  ;;  %v1638_v28 = vsel %vm1626_vm0, %v1633_v18, %v1637_v2  ;;  %v1653_v46 = vor.u32 %v1651_v52, %v1637_v2  ;;  %v7155_v2 = vld [vmem:[#allocation9 + $0x204] ss:$8 sps:$4 sm:$0xff]  }
 0x259   :  { %v1240_v12 = vrot.slane %v1215_v63, 6  ;;  %v1219_v13 = vadd.f32 %v1218_v4, %v1165_v34  ;;  %v1239_v16 = vsel %vm1235_vm15, %v1236_v49, %v1238_v62  ;;  %v7150_v4 = vld [vmem:[#allocation9 + $0x210] ss:$8 sps:$4 sm:$0xff]  }
 0x25a   :  { %v1220_v17 = vpop.f32.mrf.mxu1  ;;  %1547 = vmatmul.mubr.bf16.gmra.mxu0 %v7981_v43  ;;  %v1650_v15 = vsel %vm1626_vm0, %v1645_v3, %v1649_v7 }
 0x25b   :  { %v1242_v23 = vrot.slane %v1219_v13, 6  ;;  %v1221_v25 = vadd.f32 %v1220_v17, %v1167_v53  ;;  %2217 = vmatpush1.bf16.msra.mxu0 %v7135_v0  ;;  %1905 = vmatprep.mubr.bf16.mxu1 %v1650_v15  ;;  %v1241_v20 = vsel %vm1235_vm15, %v1237_v57, %v1240_v12  ;;  %v1661_v57 = vor.u32 %v1659_v45, %v1649_v7  ;;  %v1973_v7 = vld [vmem:[#allocation2 + $0x8] sm:$0xfc]  ;;  %v7161_v45 = vld [vmem:[#allocation9 + $0x2e4] ss:$8 sps:$4 sm:$0xff]  }
 0x25c   :  { %v1222_v21 = vpop.f32.mrf.mxu1  ;;  %2218 = vmatprep.subr.bf16.mxu0 %v7143_v6  ;;  %1906 = vmatmul.mubr.bf16.vlgmr.msra.gmra.mxu1 %v1638_v28  ;;  %v1280_v31 = vld [vmem:[#allocation2 + $0x40] sm:$0xff] }
 0x25d   :  { %v1244_v32 = vrot.slane %v1221_v25, 6  ;;  %v1223_v33 = vadd.f32 %v1222_v21, %v1169_v5  ;;  %v7995_v24 = vpack.c.bf16 %v1239_v16, %v1280_v31  ;;  %v1243_v37 = vsel %vm1235_vm15, %v1238_v62, %v1242_v23  ;;  %v7153_v25 = vld [vmem:[#allocation9 + $0x200] ss:$8 sps:$4 sm:$0xff]  }
 0x25e   :  { %v1224_v34 = vpop.f32.mrf.mxu1  ;;  %v1281_v36 = vld [vmem:[#allocation2 + $0x48] sm:$0xff]  ;;  %v2028_v31 = vrot.slane %v7985_v54, 1 }
 0x25f   :  { %v1246_v38 = vrot.slane %v1223_v33, 6  ;;  %v1225_v39 = vadd.f32 %v1224_v34, %v1171_v29  ;;  %2219 = vmatpush1.bf16.msra.mxu0 %v7141_v27  ;;  %v7998_v40 = vpack.c.bf16 %v1241_v20, %v1281_v36  ;;  %v1655_v47 = vshll.u32 %v7995_v24, 16  ;;  %v7158_v29 = vld [vmem:[#allocation9 + $0x2f4] ss:$8 sps:$4 sm:$0xff]  }
 0x260   :  { %2220 = vmatprep.subr.bf16.mxu0 %v7146_v30  ;;  %v1245_v48 = vsel %vm1235_vm15, %v1240_v12, %v1244_v32  ;;  %v1667_v18 = vshrl.u32 %v7995_v24, 16  ;;  %v1977_v30 = vpack.c.bf16 %v7973_v22, %v1973_v7 }
 0x261   :  { %v1247_v49 = vsel %vm1235_vm15, %v1242_v23, %v1246_v38  ;;  %1268 = vst [vmem:[#allocation2 + $0x80] sm:$0x3] %v1246_v38  ;;  %v1248_v9 = vrot.slane %v1225_v39, 6  ;;  %1556 = vmatprep.mubr.bf16.mxu0 %v7998_v40  ;;  %v1663_v51 = vshll.u32 %v7998_v40, 16  ;;  %v1657_v53 = vrot.slane %v1655_v47, 1 }
 0x262   :  { %1557 = vmatmul.mubr.bf16.gmra.mxu0 %v7995_v24  ;;  %v8008_v55 = vpack.c.bf16 %v1247_v49, %v1243_v37  ;;  %v1675_v63 = vshrl.u32 %v7998_v40, 16  ;;  %v7156_v39 = vld [vmem:[#allocation9 + $0x2f0] ss:$8 sps:$4 sm:$0xff]  }
 0x263   :  { %v1249_v56 = vsel %vm1235_vm15, %v1244_v32, %v1248_v9  ;;  %1269 = vst [vmem:[#allocation2 + $0x88] sm:$0x3] %v1248_v9  ;;  %2221 = vmatpush1.bf16.msra.mxu0 %v7144_v41  ;;  %v1665_v58 = vrot.slane %v1663_v51, 1  ;;  %v1658_v62 = vsel %vm1626_vm0, %v1653_v46, %v1657_v53  ;;  %v1669_v21 = vor.u32 %v1667_v18, %v1657_v53  ;;  %v7159_v9 = vld [vmem:[#allocation9 + $0x2e0] ss:$8 sps:$4 sm:$0xff]  }
 0x264   :  { %2222 = vmatprep.subr.bf16.mxu0 %v7149_v42  ;;  %v8011_v59 = vpack.c.bf16 %v1249_v56, %v1245_v48  ;;  %v1671_v1 = vshll.u32 %v8008_v55, 16  ;;  %v1683_v37 = vshrl.u32 %v8008_v55, 16  ;;  %v2027_v42 = vrot.slane %v1977_v30, 1  ;;  %v7164_v51 = vld [vmem:[#allocation9 + $0x2d4] ss:$8 sps:$4 sm:$0xff]  }
 0x265   :  { %v1666_v61 = vsel %vm1626_vm0, %v1661_v57, %v1665_v58  ;;  %v1677_v5 = vor.u32 %v1675_v63, %v1665_v58  ;;  %v7162_v56 = vld [vmem:[#allocation9 + $0x2d0] ss:$8 sps:$4 sm:$0xff]   ;;  %v7165_v57 = vld [vmem:[#allocation9 + $0x2c0] ss:$8 sps:$4 sm:$0xff]   ;;  %v7170_v46 = vld [vmem:[#allocation9 + $0x2b4] ss:$8 sps:$4 sm:$0xff]  }
 0x266   :  { %1915 = vmatprep.mubr.bf16.mxu1 %v1666_v61  ;;  %1566 = vmatprep.mubr.bf16.mxu0 %v8011_v59  ;;  %v1679_v0 = vshll.u32 %v8011_v59, 16  ;;  %v1691_v12 = vshrl.u32 %v8011_v59, 16  ;;  %v1673_v16 = vrot.slane %v1671_v1, 1  ;;  %v2029_v47 = vsel %vm2023_vm1, %v2027_v42, %v2028_v31  ;;  %v7173_v61 = vld [vmem:[#allocation9 + $0x2a4] ss:$8 sps:$4 sm:$0xff]  }
 0x267   :  { %2223 = vmatpush1.bf16.msra.mxu0 %v7147_v10  ;;  %1916 = vmatmul.mubr.bf16.gmra.mxu1 %v1658_v62  ;;  %v7167_v10 = vld [vmem:[#allocation9 + $0x2c4] ss:$8 sps:$4 sm:$0xff]   ;;  %v7171_v62 = vld [vmem:[#allocation9 + $0x2a0] ss:$8 sps:$4 sm:$0xff]   ;;  %v7176_v63 = vld [vmem:[#allocation9 + $0x294] ss:$8 sps:$4 sm:$0xff]  }
 0x268   :  { %2224 = vmatprep.subr.bf16.mxu0 %v7152_v60  ;;  %v1681_v6 = vrot.slane %v1679_v0, 1  ;;  %v1587_v3 = vld [vmem:[#allocation2 + $0x80] sm:$0x3]  ;;  %v1674_v34 = vsel %vm1626_vm0, %v1669_v21, %v1673_v16  ;;  %v1685_v48 = vor.u32 %v1683_v37, %v1673_v16  ;;  %v7168_v60 = vld [vmem:[#allocation9 + $0x2b0] ss:$8 sps:$4 sm:$0xff]   ;;  %v2030_v18 = vrot.slane %v7995_v24, 1 }
 0x269   :  { %v1591_v23 = vpack.c.bf16 %v1587_v3, %v1587_v3  ;;  %v1288_v28 = vld [vmem:[#allocation2 + $0x80] sm:$0x1]  ;;  %v7174_v0 = vld [vmem:[#allocation9 + $0x290] ss:$8 sps:$4 sm:$0xff]   ;;  %v7179_v1 = vld [vmem:[#allocation9 + $0x284] ss:$8 sps:$4 sm:$0xff]  }
 0x26a   :  { %1567 = vmatmul.mubr.bf16.gmra.mxu0 %v8008_v55  ;;  %v1682_v13 = vsel %vm1626_vm0, %v1677_v5, %v1681_v6  ;;  %v1289_v17 = vld [vmem:[#allocation2 + $0x88] sm:$0x1]  ;;  %v1693_v32 = vor.u32 %v1691_v12, %v1681_v6  ;;  %v1298_v36 = vpack.c.bf16 %v1288_v28, %v1288_v28  ;;  %v2025_v6 = vrot.slane %v7981_v43, 1  ;;  %v7182_v28 = vld [vmem:[#allocation9 + $0x374] ss:$8 sps:$4 sm:$0xff]  }
 0x26b   :  { %v1588_v15 = vld [vmem:[#allocation2 + $0x88] sm:$0x3]  ;;  %2225 = vmatpush1.bf16.msra.mxu0 %v7150_v4  ;;  %1925 = vmatprep.mubr.bf16.mxu1 %v1682_v13  ;;  %v1299_v27 = vpack.c.bf16 %v1289_v17, %v1289_v17  ;;  %v1687_v38 = vshll.u32 %v1591_v23, 16  ;;  %v1699_v58 = vshrl.u32 %v1591_v23, 16  ;;  %v1972_v4 = vld [vmem:[#allocation2] sm:$0xfc] }
 0x26c   :  { %v1592_v20 = vpack.c.bf16 %v1588_v15, %v1588_v15  ;;  %2226 = vmatprep.subr.bf16.mxu0 %v7155_v2  ;;  %v7177_v2 = vld [vmem:[#allocation9 + $0x280] ss:$8 sps:$4 sm:$0xff]   ;;  %v1976_v5 = vpack.c.bf16 %v7970_v19, %v1972_v4  ;;  %v2032_v3 = vrot.slane %v7998_v40, 1  ;;  %v2036_v16 = vrot.slane %v8011_v59, 1  ;;  %v1975_v19 = vld [vmem:[#allocation2 + $0x88] sm:$0x7]  ;;  %2691 = vmatprep.subr.bf16.mxu1 %v7182_v28 }
 0x26d   :  { %1576 = vmatprep.mubr.bf16.mxu0 %v1299_v27  ;;  %v1689_v49 = vrot.slane %v1687_v38, 1  ;;  %v2031_v17 = vsel %vm2023_vm1, %v2025_v6, %v2030_v18  ;;  %v1979_v40 = vpack.c.bf16 %v1975_v19, %v1975_v19  ;;  %v2034_v15 = vrot.slane %v8008_v55, 1  ;;  %v7183_v55 = vld [vmem:[#allocation9 + $0x360] ss:$8 sps:$4 sm:$0xff]   ;;  %v7188_v30 = vld [vmem:[#allocation9 + $0x354] ss:$8 sps:$4 sm:$0xff]  }
 0x26e   :  { %v1695_v33 = vshll.u32 %v1592_v20, 16  ;;  %v1701_v52 = vshrl.u32 %v1592_v20, 16  ;;  %v2024_v7 = vrot.slane %v1976_v5, 1  ;;  %v2033_v13 = vsel %vm2023_vm1, %v2028_v31, %v2032_v3  ;;  %v7180_v20 = vld [vmem:[#allocation9 + $0x370] ss:$8 sps:$4 sm:$0xff]  }
 0x26f   :  { %2227 = vmatpush1.bf16.msra.mxu0 %v7153_v25  ;;  %1926 = vmatmul.mubr.bf16.gmra.mxu1 %v1674_v34  ;;  %v1690_v53 = vsel %vm1626_vm0, %v1685_v48, %v1689_v49  ;;  %v2037_v43 = vsel %vm2023_vm1, %v2032_v3, %v2036_v16  ;;  %v2040_v23 = vrot.slane %v1979_v40, 1  ;;  %v1974_v25 = vld [vmem:[#allocation2 + $0x80] sm:$0x7]  ;;  %v2035_v54 = vsel %vm2023_vm1, %v2030_v18, %v2034_v15  ;;  %v7186_v31 = vld [vmem:[#allocation9 + $0x350] ss:$8 sps:$4 sm:$0xff]  }
 0x270   :  { %v1697_v41 = vrot.slane %v1695_v33, 1  ;;  %2228 = vmatprep.subr.bf16.mxu0 %v7158_v29  ;;  %v2026_v12 = vsel %vm2023_vm1, %v2024_v7, %v2025_v6  ;;  %v1978_v27 = vpack.c.bf16 %v1974_v25, %v1974_v25  ;;  %2692 = vmatpush1.bf16.msra.mxu1 %v7180_v20  ;;  %v7185_v29 = vld [vmem:[#allocation9 + $0x364] ss:$8 sps:$4 sm:$0xff]   ;;  %v7192_v34 = vld [vmem:[#allocation9 + $0x470] ss:$8 sps:$4 sm:$0xff]  }
 0x271   :  { %v2041_v24 = vsel %vm2023_vm1, %v2036_v16, %v2040_v23  ;;  %2693 = vmatprep.subr.bf16.mxu1 %v7185_v29  ;;  %v7191_v33 = vld [vmem:[#allocation9 + $0x344] ss:$8 sps:$4 sm:$0xff]   ;;  %v7197_v38 = vld [vmem:[#allocation9 + $0x334] ss:$8 sps:$4 sm:$0xff]   ;;  %v7231_v5 = vld [vmem:[#allocation9 + $0x3d0] ss:$8 sps:$4 sm:$0xff]  }
 0x272   :  { %v1698_v22 = vsel %vm1626_vm0, %v1693_v32, %v1697_v41  ;;  %1577 = vmatmul.mubr.bf16.gmra.mxu0 %v1298_v36  ;;  %v2038_v59 = vrot.slane %v1978_v27, 1  ;;  %v7194_v32 = vld [vmem:[#allocation9 + $0x474] ss:$8 sps:$4 sm:$0xff]   ;;  %v7189_v36 = vld [vmem:[#allocation9 + $0x340] ss:$8 sps:$4 sm:$0xff]  }
 0x273   :  { %1935 = vmatprep.mubr.bf16.mxu1 %v1698_v22  ;;  %2229 = vmatpush2.bf16.msra.mxu0 %v7156_v39  ;;  %v7200_v37 = vld [vmem:[#allocation9 + $0x464] ss:$8 sps:$4 sm:$0xff]   ;;  %v7198_v39 = vld [vmem:[#allocation9 + $0x460] ss:$8 sps:$4 sm:$0xff]   ;;  %v7195_v41 = vld [vmem:[#allocation9 + $0x330] ss:$8 sps:$4 sm:$0xff]  }
 0x274   :  { %2244 = vmatprep.mubr.bf16.mxu0 %v2029_v47  ;;  %2230 = vmatprep.subr.bf16.mxu0 %v7161_v45  ;;  %v2039_v21 = vsel %vm2023_vm1, %v2034_v15, %v2038_v59  ;;  %v7206_v42 = vld [vmem:[#allocation9 + $0x454] ss:$8 sps:$4 sm:$0xff]   ;;  %v7203_v45 = vld [vmem:[#allocation9 + $0x324] ss:$8 sps:$4 sm:$0xff]   ;;  %v7204_v22 = vld [vmem:[#allocation9 + $0x450] ss:$8 sps:$4 sm:$0xff]  }
 0x275   :  { %2694 = vmatpush1.bf16.msra.mxu1 %v7183_v55  ;;  %v7201_v47 = vld [vmem:[#allocation9 + $0x320] ss:$8 sps:$4 sm:$0xff]   ;;  %v7212_v48 = vld [vmem:[#allocation9 + $0x444] ss:$8 sps:$4 sm:$0xff]   ;;  %v7209_v49 = vld [vmem:[#allocation9 + $0x314] ss:$8 sps:$4 sm:$0xff]  }
 0x276   :  { %2695 = vmatprep.subr.bf16.mxu1 %v7188_v30  ;;  %v7233_v4 = vld [vmem:[#allocation9 + $0x3d4] ss:$8 sps:$4 sm:$0xff]   ;;  %v7239_v3 = vld [vmem:[#allocation9 + $0x3c4] ss:$8 sps:$4 sm:$0xff]   ;;  %v7240_v7 = vld [vmem:[#allocation9 + $0x4f0] ss:$8 sps:$4 sm:$0xff]  }
 0x277   :  { %2231 = vmatpush2.bf16.msra.mxu0 %v7159_v9  ;;  %1936 = vmatmul.mubr.bf16.gmra.mxu1 %v1690_v53  ;;  %v7210_v9 = vld [vmem:[#allocation9 + $0x440] ss:$8 sps:$4 sm:$0xff]   ;;  %v7215_v53 = vld [vmem:[#allocation9 + $0x304] ss:$8 sps:$4 sm:$0xff]   ;;  %v7242_v6 = vld [vmem:[#allocation9 + $0x4f4] ss:$8 sps:$4 sm:$0xff]  }
 0x278   :  { %2232 = vmatprep.subr.bf16.mxu0 %v7164_v51  ;;  %1945 = vmatprep.mubr.bf16.mxu1 %v1701_v52  ;;  %v7207_v51 = vld [vmem:[#allocation9 + $0x310] ss:$8 sps:$4 sm:$0xff]   ;;  %v7218_v52 = vld [vmem:[#allocation9 + $0x434] ss:$8 sps:$4 sm:$0xff]   ;;  %v7246_v16 = vld [vmem:[#allocation9 + $0x4e0] ss:$8 sps:$4 sm:$0xff]  }
 0x279   :  { %2696 = vmatpush1.bf16.msra.mxu1 %v7186_v31  ;;  %v7245_v18 = vld [vmem:[#allocation9 + $0x3b4] ss:$8 sps:$4 sm:$0xff]   ;;  %v7243_v19 = vld [vmem:[#allocation9 + $0x3b0] ss:$8 sps:$4 sm:$0xff]   ;;  %v7249_v15 = vld [vmem:[#allocation9 + $0x3a0] ss:$8 sps:$4 sm:$0xff]  }
 0x27a   :  { %2697 = vmatprep.subr.bf16.mxu1 %v7191_v33  ;;  %v7252_v40 = vld [vmem:[#allocation9 + $0x4d0] ss:$8 sps:$4 sm:$0xff]   ;;  %v7257_v25 = vld [vmem:[#allocation9 + $0x394] ss:$8 sps:$4 sm:$0xff]   ;;  %v7261_v20 = vld [vmem:[#allocation9 + $0x380] ss:$8 sps:$4 sm:$0xff]  }
 0x27b   :  { %2233 = vmatpush2.bf16.msra.mxu0 %v7162_v56  ;;  %v7216_v56 = vld [vmem:[#allocation9 + $0x430] ss:$8 sps:$4 sm:$0xff]   ;;  %v7269_v29 = vld [vmem:[#allocation9 + $0x574] ss:$8 sps:$4 sm:$0xff]   ;;  %v7270_v55 = vld [vmem:[#allocation9 + $0x4a0] ss:$8 sps:$4 sm:$0xff]  }
 0x27c   :  { %2234 = vmatprep.subr.bf16.mxu0 %v7167_v10  ;;  %v7213_v10 = vld [vmem:[#allocation9 + $0x300] ss:$8 sps:$4 sm:$0xff]   ;;  %v7255_v27 = vld [vmem:[#allocation9 + $0x390] ss:$8 sps:$4 sm:$0xff]   ;;  %v7278_v30 = vld [vmem:[#allocation9 + $0x494] ss:$8 sps:$4 sm:$0xff]  }
 0x27d   :  { %2698 = vmatpush1.bf16.msra.mxu1 %v7189_v36  ;;  %v7264_v28 = vld [vmem:[#allocation9 + $0x4b0] ss:$8 sps:$4 sm:$0xff]   ;;  %v7282_v33 = vld [vmem:[#allocation9 + $0x480] ss:$8 sps:$4 sm:$0xff]  }
 0x27e   :  { %2699 = vmatprep.subr.bf16.mxu1 %v7197_v38  ;;  %v7276_v31 = vld [vmem:[#allocation9 + $0x490] ss:$8 sps:$4 sm:$0xff]  }
 0x27f   :  { %2235 = vmatpush2.bf16.msra.mxu0 %v7165_v57  ;;  %1946 = vmatmul.mubr.bf16.gmra.mxu1 %v1699_v58  ;;  %v7219_v57 = vld [vmem:[#allocation9 + $0x3f0] ss:$8 sps:$4 sm:$0xff]   ;;  %v7221_v58 = vld [vmem:[#allocation9 + $0x3f4] ss:$8 sps:$4 sm:$0xff]  }
 0x280   :  { %2236 = vmatprep.subr.bf16.mxu0 %v7170_v46  ;;  %v7222_v46 = vld [vmem:[#allocation9 + $0x420] ss:$8 sps:$4 sm:$0xff]  }
 0x281   :  { %2700 = vmatpush1.bf16.msra.mxu1 %v7195_v41 }
 0x282   :  { %2701 = vmatprep.subr.bf16.mxu1 %v7203_v45 }
 0x283   :  { %2237 = vmatpush2.bf16.msra.mxu0 %v7168_v60  ;;  %v7224_v60 = vld [vmem:[#allocation9 + $0x424] ss:$8 sps:$4 sm:$0xff]  }
 0x284   :  { %2238 = vmatprep.subr.bf16.mxu0 %v7173_v61  ;;  %v7227_v61 = vld [vmem:[#allocation9 + $0x3e4] ss:$8 sps:$4 sm:$0xff]  }
 0x285   :  { %2702 = vmatpush1.bf16.msra.mxu1 %v7201_v47 }
 0x286   :  { %2703 = vmatprep.subr.bf16.mxu1 %v7209_v49 }
 0x287   :  { %2239 = vmatpush2.bf16.msra.mxu0 %v7171_v62  ;;  %v7230_v62 = vld [vmem:[#allocation9 + $0x414] ss:$8 sps:$4 sm:$0xff]  }
 0x288   :  { %2240 = vmatprep.subr.bf16.mxu0 %v7176_v63  ;;  %v7225_v63 = vld [vmem:[#allocation9 + $0x3e0] ss:$8 sps:$4 sm:$0xff]  }
 0x289   :  { %2704 = vmatpush1.bf16.msra.mxu1 %v7207_v51 }
 0x28a   :  { %2705 = vmatprep.subr.bf16.mxu1 %v7215_v53 }
 0x28b   :  { %2241 = vmatpush2.bf16.msra.mxu0 %v7174_v0  ;;  %v7228_v0 = vld [vmem:[#allocation9 + $0x410] ss:$8 sps:$4 sm:$0xff]  }
 0x28c   :  { %2242 = vmatprep.subr.bf16.mxu0 %v7179_v1  ;;  %v7236_v1 = vld [vmem:[#allocation9 + $0x404] ss:$8 sps:$4 sm:$0xff]  }
 0x28d   :  { %2706 = vmatpush1.bf16.msra.mxu1 %v7213_v10 }
 0x28e   :  { %2707 = vmatprep.subr.bf16.mxu1 %v7221_v58 }
 0x28f   :  { %2243 = vmatpush2.bf16.msra.mxu0 %v7177_v2  ;;  %v7234_v2 = vld [vmem:[#allocation9 + $0x400] ss:$8 sps:$4 sm:$0xff]  }
 0x290   :  { %3059 = vmatprep.subr.bf16.mxu0 %v7194_v32  ;;  %v7284_v32 = vld [vmem:[#allocation9 + $0x484] ss:$8 sps:$4 sm:$0xff]  }
 0x291   :  { %2708 = vmatpush2.bf16.msra.mxu1 %v7219_v57 }
 0x292   :  { %2245 = vmatmul.mubr.bf16.vlgmr.msra.gmra.mxu0 %v2026_v12  ;;  %2709 = vmatprep.subr.bf16.mxu1 %v7227_v61  ;;  %v7237_v12 = vld [vmem:[#allocation9 + $0x3c0] ss:$8 sps:$4 sm:$0xff]  }
 0x293   :  { %2254 = vmatprep.mubr.bf16.mxu0 %v2033_v13  ;;  %3060 = vmatpush1.bf16.msra.mxu0 %v7192_v34  ;;  %v7248_v13 = vld [vmem:[#allocation9 + $0x4e4] ss:$8 sps:$4 sm:$0xff]  }
 0x294   :  { %3061 = vmatprep.subr.bf16.mxu0 %v7200_v37 }
 0x295   :  { %2710 = vmatpush2.bf16.msra.mxu1 %v7225_v63 }
 0x296   :  { %2711 = vmatprep.subr.bf16.mxu1 %v7233_v4 }
 0x297   :  { %3062 = vmatpush1.bf16.msra.mxu0 %v7198_v39 }
 0x298   :  { %3063 = vmatprep.subr.bf16.mxu0 %v7206_v42 }
 0x299   :  { %2712 = vmatpush2.bf16.msra.mxu1 %v7231_v5 }
 0x29a   :  { %2255 = vmatmul.mubr.bf16.gmra.mxu0 %v2031_v17  ;;  %2713 = vmatprep.subr.bf16.mxu1 %v7239_v3  ;;  %v7254_v17 = vld [vmem:[#allocation9 + $0x4d4] ss:$8 sps:$4 sm:$0xff]  }
 0x29b   :  { %2264 = vmatprep.mubr.bf16.mxu0 %v2037_v43  ;;  %3064 = vmatpush1.bf16.msra.mxu0 %v7204_v22  ;;  %v7251_v43 = vld [vmem:[#allocation9 + $0x3a4] ss:$8 sps:$4 sm:$0xff]  }
 0x29c   :  { %3065 = vmatprep.subr.bf16.mxu0 %v7212_v48 }
 0x29d   :  { %2714 = vmatpush2.bf16.msra.mxu1 %v7237_v12 }
 0x29e   :  { %2715 = vmatprep.subr.bf16.mxu1 %v7245_v18 }
 0x29f   :  { %3066 = vmatpush1.bf16.msra.mxu0 %v7210_v9 }
 0x2a0   :  { %3067 = vmatprep.subr.bf16.mxu0 %v7218_v52 }
 0x2a1   :  { %2716 = vmatpush2.bf16.msra.mxu1 %v7243_v19 }
 0x2a2   :  { %2265 = vmatmul.mubr.bf16.gmra.mxu0 %v2035_v54  ;;  %2717 = vmatprep.subr.bf16.mxu1 %v7251_v43  ;;  %v7258_v54 = vld [vmem:[#allocation9 + $0x4c0] ss:$8 sps:$4 sm:$0xff]  }
 0x2a3   :  { %2274 = vmatprep.mubr.bf16.mxu0 %v2041_v24  ;;  %3068 = vmatpush1.bf16.msra.mxu0 %v7216_v56  ;;  %v7266_v24 = vld [vmem:[#allocation9 + $0x4b4] ss:$8 sps:$4 sm:$0xff]  }
 0x2a4   :  { %3069 = vmatprep.subr.bf16.mxu0 %v7224_v60 }
 0x2a5   :  { %2718 = vmatpush2.bf16.msra.mxu1 %v7249_v15 }
 0x2a6   :  { %2719 = vmatprep.subr.bf16.mxu1 %v7257_v25 }
 0x2a7   :  { %3070 = vmatpush1.bf16.msra.mxu0 %v7222_v46 }
 0x2a8   :  { %3071 = vmatprep.subr.bf16.mxu0 %v7230_v62 }
 0x2a9   :  { %2720 = vmatpush2.bf16.msra.mxu1 %v7255_v27  ;;  %v8065_v27 = vstv %s6258_s0 }
 0x2aa   :  { %2275 = vmatmul.mubr.bf16.gmra.mxu0 %v2039_v21  ;;  %v7272_v21 = vld [vmem:[#allocation9 + $0x4a4] ss:$8 sps:$4 sm:$0xff]  }
 0x2ab   :  { %2284 = vmatprep.mubr.bf16.mxu0 %v2040_v23  ;;  %3072 = vmatpush1.bf16.msra.mxu0 %v7228_v0  ;;  %v7260_v23 = vld [vmem:[#allocation9 + $0x4c4] ss:$8 sps:$4 sm:$0xff]  }
 0x2ac   :  { %3073 = vmatprep.subr.bf16.mxu0 %v7236_v1 }
 0x2af   :  { %3074 = vmatpush1.bf16.msra.mxu0 %v7234_v2 }
 0x2b0   :  { %3075 = vmatprep.subr.bf16.mxu0 %v7242_v6 }
 0x2b2   :  { %2285 = vmatmul.mubr.bf16.gmra.mxu0 %v2038_v59  ;;  %v7263_v59 = vld [vmem:[#allocation9 + $0x384] ss:$8 sps:$4 sm:$0xff]  }
 0x2b3   :  { %3076 = vmatpush2.bf16.msra.mxu0 %v7240_v7  ;;  %2721 = vmatprep.subr.bf16.mxu1 %v7263_v59 }
 0x2b4   :  { %3077 = vmatprep.subr.bf16.mxu0 %v7248_v13  ;;  %2722 = vmatpush2.bf16.msra.mxu1 %v7261_v20 }
 0x2b5   :  { %3397 = vmatprep.subr.bf16.mxu1 %v7269_v29 }
 0x2b7   :  { %3078 = vmatpush2.bf16.msra.mxu0 %v7246_v16 }
 0x2b8   :  { %3079 = vmatprep.subr.bf16.mxu0 %v7254_v17 }
 0x2bb   :  { %3080 = vmatpush2.bf16.msra.mxu0 %v7252_v40  ;;  %v1332_v40 = vld [vmem:[#allocation15] ss:$4 sm:$0x3] }
 0x2bc   :  { %3081 = vmatprep.subr.bf16.mxu0 %v7260_v23  ;;  %v1337_v15 = vrot.slane %v1332_v40, %v7852_v11  ;;  %v1341_v23 = vrot.slane %v1332_v40, %v7856_v14 }
 0x2bf   :  { %3082 = vmatpush2.bf16.msra.mxu0 %v7258_v54 }
 0x2c0   :  { %3083 = vmatprep.subr.bf16.mxu0 %v7266_v24 }
 0x2c3   :  { %3084 = vmatpush2.bf16.msra.mxu0 %v7264_v28 }
 0x2c4   :  { %3085 = vmatprep.subr.bf16.mxu0 %v7272_v21 }
 0x2c7   :  { %3086 = vmatpush2.bf16.msra.mxu0 %v7270_v55 }
 0x2c8   :  { %3087 = vmatprep.subr.bf16.mxu0 %v7278_v30 }
 0x2cb   :  { %3088 = vmatpush2.bf16.msra.mxu0 %v7276_v31 }
 0x2cc   :  { %3089 = vmatprep.subr.bf16.mxu0 %v7284_v32 }
 0x2cf   :  { %3090 = vmatpush2.bf16.msra.mxu0 %v7282_v33 }
 0x312   :  { %v1538_v34 = vpop.f32.mrf.mxu0 }
 0x313   :  { %v1539_v25 = vadd.f32 %v1538_v34, %v1337_v15 }
 0x314   :  { %v1540_v36 = vpop.f32.mrf.mxu0 }
 0x315   :  { %v1541_v54 = vadd.f32 %v1540_v36, %v1341_v23 }
 0x316   :  { %v1542_v37 = vpop.f32.mrf.mxu0 }
 0x317   :  { %v1543_v24 = vadd.f32 %v1542_v37, %v1337_v15 }
 0x318   :  { %v1544_v38 = vpop.f32.mrf.mxu0 }
 0x319   :  { %v1545_v59 = vadd.f32 %v1544_v38, %v1341_v23 }
 0x31a   :  { %v1548_v39 = vpop.f32.mrf.mxu0 }
 0x31b   :  { %v1549_v28 = vadd.f32 %v1548_v39, %v1337_v15 }
 0x31c   :  { %v1550_v41 = vpop.f32.mrf.mxu0  ;;  %v1907_v42 = vpop.f32.mrf.mxu1 }
 0x31d   :  { %v1954_v20 = vadd.f32 %v1907_v42, %v1539_v25  ;;  %v1551_v21 = vadd.f32 %v1550_v41, %v1341_v23 }
 0x31e   :  { %v1552_v45 = vpop.f32.mrf.mxu0  ;;  %v1909_v22 = vpop.f32.mrf.mxu1 }
 0x31f   :  { %v1553_v29 = vadd.f32 %v1552_v45, %v1337_v15  ;;  %v1955_v30 = vadd.f32 %v1909_v22, %v1541_v54 }
 0x320   :  { %v1554_v47 = vpop.f32.mrf.mxu0  ;;  %v1911_v48 = vpop.f32.mrf.mxu1 }
 0x321   :  { %v1555_v55 = vadd.f32 %v1554_v47, %v1341_v23  ;;  %v1956_v33 = vadd.f32 %v1911_v48, %v1543_v24 }
 0x322   :  { %v1558_v49 = vpop.f32.mrf.mxu0  ;;  %v1913_v51 = vpop.f32.mrf.mxu1 }
 0x323   :  { %v1559_v32 = vadd.f32 %v1558_v49, %v1337_v15 }
 0x324   :  { %v1560_v9 = vpop.f32.mrf.mxu0 }
 0x326   :  { %v1562_v52 = vpop.f32.mrf.mxu0 }
 0x327   :  { %v1917_v53 = vpop.f32.mrf.mxu1 }
 0x328   :  { %v1564_v56 = vpop.f32.mrf.mxu0  ;;  %v1958_v40 = vadd.f32 %v1917_v53, %v1549_v28 }
 0x329   :  { %v1919_v10 = vpop.f32.mrf.mxu1  ;;  %v1565_v34 = vadd.f32 %v1564_v56, %v1341_v23 }
 0x32a   :  { %v1568_v57 = vpop.f32.mrf.mxu0  ;;  %v1959_v8 = vadd.f32 %v1919_v10, %v1551_v21 }
 0x32b   :  { %v1921_v58 = vpop.f32.mrf.mxu1  ;;  %v1569_v39 = vadd.f32 %v1568_v57, %v1337_v15 }
 0x32c   :  { %v1570_v46 = vpop.f32.mrf.mxu0  ;;  %v1960_v41 = vadd.f32 %v1921_v58, %v1553_v29 }
 0x32d   :  { %v1923_v60 = vpop.f32.mrf.mxu1  ;;  %v1571_v42 = vadd.f32 %v1570_v46, %v1341_v23 }
 0x32e   :  { %v1572_v61 = vpop.f32.mrf.mxu0  ;;  %v1961_v45 = vadd.f32 %v1923_v60, %v1555_v55 }
 0x32f   :  { %v1927_v62 = vpop.f32.mrf.mxu1 }
 0x330   :  { %v1574_v63 = vpop.f32.mrf.mxu0 }
 0x331   :  { %v1929_v0 = vpop.f32.mrf.mxu1 }
 0x332   :  { %v1578_v1 = vpop.f32.mrf.mxu0 }
 0x333   :  { %v1931_v4 = vpop.f32.mrf.mxu1  ;;  %v1579_v58 = vadd.f32 %v1578_v1, %v1337_v15 }
 0x334   :  { %v8047_v2 = vpop.f32.mrf.mxu0 }
 0x335   :  { %v8049_v5 = vpop.f32.mrf.mxu1 }
 0x336   :  { %v1582_v6 = vpop.f32.mrf.mxu0  ;;  %v8077_v28 = vadd.f32 %v8049_v5, %v1565_v34 }
 0x337   :  { %v8051_v3 = vpop.f32.mrf.mxu1  ;;  %v1957_v6 = vadd.f32 %v1913_v51, %v1545_v59  ;;  %v1962_v51 = vadd.f32 %v1927_v62, %v1559_v32 }
 0x338   :  { %v1583_v7 = vpop.f32.mrf.mxu0 }
 0x339   :  { %v8053_v12 = vpop.f32.mrf.mxu1 }
 0x33a   :  { %v8084_v29 = vadd.f32 %v8053_v12, %v1571_v42 }
 0x33b   :  { %v8055_v13 = vpop.f32.mrf.mxu1 }
 0x33d   :  { %v8057_v18 = vpop.f32.mrf.mxu1 }
 0x33f   :  { %v8059_v16 = vpop.f32.mrf.mxu1 }
 0x340   :  { %v8094_v32 = vadd.f32 %v8059_v16, %v1579_v58 }
 0x341   :  { %v8061_v19 = vpop.f32.mrf.mxu1 }
 0x343   :  { %v1951_v17 = vpop.f32.mrf.mxu1 }
 0x344   :  { %v1561_v17 = vadd.f32 %v1560_v9, %v1341_v23  ;;  %v1573_v9 = vadd.f32 %v1572_v61, %v1337_v15 }
 0x345   :  { %v1952_v43 = vpop.f32.mrf.mxu1 }
 0x346   :  { %v1563_v43 = vadd.f32 %v1562_v52, %v1337_v15  ;;  %v1575_v52 = vadd.f32 %v1574_v63, %v1341_v23  ;;  %v1963_v57 = vadd.f32 %v1929_v0, %v1561_v17  ;;  %v8074_v63 = vadd.f32 %v8047_v2, %v1341_v23 }
 0x347   :  { %v8087_v2 = vadd.f32 %v8055_v13, %v1573_v9  ;;  %v7267_v9 = vld [vmem:[#allocation9 + $0x570] ss:$8 sps:$4 sm:$0xff]  }
 0x348   :  { %v8070_v46 = vadd.f32 %v1931_v4, %v1563_v43  ;;  %v8090_v5 = vadd.f32 %v8057_v18, %v1575_v52 }
 0x352   :  { %v2246_v31 = vpop.f32.mrf.mxu0 }
 0x353   :  { %v2293_v7 = vadd.f32 %v2246_v31, %v1954_v20  ;;  %v8080_v20 = vadd.f32 %v8051_v3, %v1569_v39 }
 0x354   :  { %v2248_v36 = vpop.f32.mrf.mxu0 }
 0x355   :  { %vm2312_vm2 = vcmp.ge.f32.partialorder %v2293_v7, 0.0  ;;  %v2331_v37 = vmul.f32 %v8065_v27, %v2293_v7  ;;  %v2294_v38 = vadd.f32 %v2248_v36, %v1955_v30 }
 0x356   :  { %v2250_v22 = vpop.f32.mrf.mxu0 }
 0x357   :  { %v2349_v47 = vsel %vm2312_vm2, %v2293_v7, %v2331_v37  ;;  %vm2313_vm3 = vcmp.ge.f32.partialorder %v2294_v38, 0.0  ;;  %v2332_v48 = vmul.f32 %v8065_v27, %v2294_v38  ;;  %v2295_v49 = vadd.f32 %v2250_v22, %v1956_v33 }
 0x358   :  { %v2375_v53 = vrot.slane %v2349_v47, 7  ;;  %v2252_v56 = vpop.f32.mrf.mxu0 }
 0x359   :  { %v2350_v10 = vsel %vm2313_vm3, %v2294_v38, %v2332_v48  ;;  %vm2314_vm4 = vcmp.ge.f32.partialorder %v2295_v49, 0.0  ;;  %v2333_v25 = vmul.f32 %v8065_v27, %v2295_v49  ;;  %v2296_v54 = vadd.f32 %v2252_v56, %v1957_v6 }
 0x35a   :  { %2399 = vst [vmem:[#allocation2] sm:$0xfe] %v2375_v53  ;;  %v2376_v60 = vrot.slane %v2350_v10, 7  ;;  %v2256_v24 = vpop.f32.mrf.mxu0 }
 0x35b   :  { %v2351_v59 = vsel %vm2314_vm4, %v2295_v49, %v2333_v25  ;;  %vm2315_vm5 = vcmp.ge.f32.partialorder %v2296_v54, 0.0  ;;  %v2334_v61 = vmul.f32 %v8065_v27, %v2296_v54  ;;  %v2297_v62 = vadd.f32 %v2256_v24, %v1958_v40  ;;  %v7275_v25 = vld [vmem:[#allocation9 + $0x564] ss:$8 sps:$4 sm:$0xff]  }
 0x35c   :  { %2400 = vst [vmem:[#allocation2 + $0x8] sm:$0xfe] %v2376_v60  ;;  %v2377_v0 = vrot.slane %v2351_v59, 7  ;;  %v2258_v1 = vpop.f32.mrf.mxu0 }
 0x35d   :  { %v2352_v4 = vsel %vm2315_vm5, %v2296_v54, %v2334_v61  ;;  %vm2316_vm6 = vcmp.ge.f32.partialorder %v2297_v62, 0.0  ;;  %v2335_v15 = vmul.f32 %v8065_v27, %v2297_v62  ;;  %v2298_v21 = vadd.f32 %v2258_v1, %v1959_v8 }
 0x35e   :  { %v2379_v23 = vrot.slane %v2352_v4, 7  ;;  %v2260_v3 = vpop.f32.mrf.mxu0  ;;  %v8097_v8 = vsel %vm1084_vm14, %v2375_v53, %v2377_v0  ;;  %v7273_v4 = vld [vmem:[#allocation9 + $0x560] ss:$8 sps:$4 sm:$0xff]  }
 0x35f   :  { %v2353_v55 = vsel %vm2316_vm6, %v2297_v62, %v2335_v15  ;;  %vm2317_vm7 = vcmp.ge.f32.partialorder %v2298_v21, 0.0  ;;  %v2336_v30 = vmul.f32 %v8065_v27, %v2298_v21  ;;  %v2299_v31 = vadd.f32 %v2260_v3, %v1960_v41 }
 0x360   :  { %v8100_v12 = vsel %vm1084_vm14, %v2376_v60, %v2379_v23  ;;  %v2381_v13 = vrot.slane %v2353_v55, 7  ;;  %v2262_v33 = vpop.f32.mrf.mxu0 }
 0x361   :  { %v2354_v18 = vsel %vm2317_vm7, %v2298_v21, %v2336_v30  ;;  %vm2318_vm8 = vcmp.ge.f32.partialorder %v2299_v31, 0.0  ;;  %v2337_v6 = vmul.f32 %v8065_v27, %v2299_v31  ;;  %v2300_v7 = vadd.f32 %v2262_v33, %v1961_v45  ;;  %v2457_v17 = vld [vmem:[#allocation2] sm:$0xff]  ;;  %v7281_v30 = vld [vmem:[#allocation9 + $0x554] ss:$8 sps:$4 sm:$0xff]  }
 0x362   :  { %v2772_v43 = vld [vmem:[#allocation2] sm:$0xfe]  ;;  %v2382_v40 = vsel %vm1084_vm14, %v2377_v0, %v2381_v13  ;;  %v2383_v34 = vrot.slane %v2354_v18, 7  ;;  %v2266_v16 = vpop.f32.mrf.mxu0  ;;  %v2475_v36 = vpack.c.bf16 %v8097_v8, %v2457_v17 }
 0x363   :  { %v8106_v37 = vpack.c.bf16 %v8097_v8, %v2772_v43  ;;  %v2355_v38 = vsel %vm2318_vm8, %v2299_v31, %v2337_v6  ;;  %vm2319_vm9 = vcmp.ge.f32.partialorder %v2300_v7, 0.0  ;;  %v2338_v39 = vmul.f32 %v8065_v27, %v2300_v7  ;;  %v2458_v42 = vld [vmem:[#allocation2 + $0x8] sm:$0xff] }
 0x364   :  { %v2301_v41 = vadd.f32 %v2266_v16, %v1962_v51  ;;  %v2773_v22 = vld [vmem:[#allocation2 + $0x8] sm:$0xfe]  ;;  %v2384_v45 = vsel %vm1084_vm14, %v2379_v23, %v2383_v34  ;;  %v2385_v47 = vrot.slane %v2355_v38, 7  ;;  %v2268_v48 = vpop.f32.mrf.mxu0  ;;  %v2476_v49 = vpack.c.bf16 %v8100_v12, %v2458_v42  ;;  %v7287_v38 = vld [vmem:[#allocation9 + $0x544] ss:$8 sps:$4 sm:$0xff]  }
 0x365   :  { %v2777_v52 = vpack.c.bf16 %v8100_v12, %v2773_v22  ;;  %v2356_v53 = vsel %vm2319_vm9, %v2300_v7, %v2338_v39  ;;  %v2302_v10 = vadd.f32 %v2268_v48, %v1963_v57 }
 0x366   :  { %vm2320_vm10 = vcmp.ge.f32.partialorder %v2301_v41, 0.0  ;;  %v2339_v56 = vmul.f32 %v8065_v27, %v2301_v41  ;;  %v2386_v54 = vsel %vm1084_vm14, %v2381_v13, %v2385_v47  ;;  %2407 = vst [vmem:[#allocation2 + $0x40] sm:$0x1] %v2385_v47  ;;  %v2387_v51 = vrot.slane %v2356_v53, 7  ;;  %v2270_v58 = vpop.f32.mrf.mxu0  ;;  %2723 = vmatprep.mubr.bf16.mxu1 %v2476_v49  ;;  %v7285_v53 = vld [vmem:[#allocation9 + $0x540] ss:$8 sps:$4 sm:$0xff]  }
 0x367   :  { %v2826_v60 = vshrl.u32 %v2777_v52, 16  ;;  %v2828_v24 = vshll.u32 %v2777_v52, 16  ;;  %vm2321_vm11 = vcmp.ge.f32.partialorder %v2302_v10, 0.0  ;;  %v2340_v61 = vmul.f32 %v8065_v27, %v2302_v10  ;;  %2724 = vmatmul.mubr.bf16.vlgmr.msra.gmra.mxu1 %v2475_v36 }
 0x368   :  { %v2357_v59 = vsel %vm2320_vm10, %v2301_v41, %v2339_v56  ;;  %v2303_v62 = vadd.f32 %v2270_v58, %v8070_v46  ;;  %v2388_v0 = vsel %vm1084_vm14, %v2383_v34, %v2387_v51  ;;  %2408 = vst [vmem:[#allocation2 + $0x48] sm:$0x1] %v2387_v51  ;;  %v2272_v1 = vpop.f32.mrf.mxu0  ;;  %3398 = vmatpush1.bf16.msra.mxu1 %v7267_v9  ;;  %v2816_v34 = vshll.u32 %v8106_v37, 16 }
 0x369   :  { %v2419_v57 = vrot.slane %v2357_v59, 7  ;;  %v8117_v15 = vpack.c.bf16 %v2386_v54, %v2382_v40  ;;  %v2830_v21 = vrot.slane %v2828_v24, 1  ;;  %v2358_v23 = vsel %vm2321_vm11, %v2302_v10, %v2340_v61  ;;  %3399 = vmatprep.subr.bf16.mxu1 %v7275_v25 }
 0x36a   :  { %vm2322_vm12 = vcmp.ge.f32.partialorder %v2303_v62, 0.0  ;;  %v2341_v3 = vmul.f32 %v8065_v27, %v2303_v62  ;;  %v2304_v55 = vadd.f32 %v2272_v1, %v8077_v28  ;;  %v8123_v46 = vadd.f32 %v8061_v19, %v8074_v63  ;;  %v2276_v13 = vpop.f32.mrf.mxu0  ;;  %v7279_v19 = vld [vmem:[#allocation9 + $0x550] ss:$8 sps:$4 sm:$0xff]  }
 0x36b   :  { %2447 = vst [vmem:[#allocation2 + $0x40] sm:$0xfc] %v2419_v57  ;;  %v2420_v31 = vrot.slane %v2358_v23, 7  ;;  %v8125_v33 = vpack.c.bf16 %v2388_v0, %v2384_v45  ;;  %v2831_v18 = vor.u32 %v2830_v21, %v2826_v60  ;;  %v2305_v17 = vadd.f32 %v2276_v13, %v8080_v20 }
 0x36c   :  { %v2359_v6 = vsel %vm2322_vm12, %v2303_v62, %v2341_v3  ;;  %vm2323_vm13 = vcmp.ge.f32.partialorder %v2304_v55, 0.0  ;;  %v2342_v7 = vmul.f32 %v8065_v27, %v2304_v55  ;;  %v2278_v43 = vpop.f32.mrf.mxu0  ;;  %3400 = vmatpush1.bf16.msra.mxu1 %v7273_v4  ;;  %v2814_v40 = vshrl.u32 %v8106_v37, 16  ;;  %v7288_v3 = vld [vmem:[#allocation9 + $0x530] ss:$8 sps:$4 sm:$0xff]  }
 0x36d   :  { %2448 = vst [vmem:[#allocation2 + $0x48] sm:$0xfc] %v2420_v31  ;;  %v2421_v28 = vrot.slane %v2359_v6, 7  ;;  %2733 = vmatprep.mubr.bf16.mxu1 %v8125_v33  ;;  %v2833_v63 = vshll.u32 %v8125_v33, 16  ;;  %vm2324_vm15 = vcmp.ge.f32.partialorder %v2305_v17, 0.0  ;;  %v2343_v36 = vmul.f32 %v8065_v27, %v2305_v17  ;;  %3401 = vmatprep.subr.bf16.mxu1 %v7281_v30 }
 0x36e   :  { %v8133_v16 = vsel %vm2323_vm13, %v2304_v55, %v2342_v7  ;;  %v2306_v20 = vadd.f32 %v2278_v43, %v8084_v29  ;;  %v2280_v41 = vpop.f32.mrf.mxu0  ;;  %v2818_v22 = vrot.slane %v2816_v34, 1  ;;  %v2821_v45 = vshll.u32 %v8117_v15, 16 }
 0x36f   :  { %v2423_v39 = vrot.slane %v8133_v16, 7  ;;  %v8138_v42 = vrot.slane %v2833_v63, 1  ;;  %v2361_v47 = vsel %vm2324_vm15, %v2305_v17, %v2343_v36  ;;  %v2307_v48 = vadd.f32 %v2280_v41, %v8087_v2  ;;  %2734 = vmatmul.mubr.bf16.gmra.mxu1 %v8117_v15  ;;  %v7290_v2 = vld [vmem:[#allocation9 + $0x534] ss:$8 sps:$4 sm:$0xff]   ;;  %v7291_v16 = vld [vmem:[#allocation9 + $0x520] ss:$8 sps:$4 sm:$0xff]  }
 0x370   :  { %vm2325_vm2 = vcmp.ge.f32.partialorder %v2306_v20, 0.0  ;;  %v2344_v37 = vmul.f32 %v8065_v27, %v2306_v20  ;;  %v2422_v29 = vsel %vm1084_vm14, %v2419_v57, %v2421_v28  ;;  %v2425_v9 = vrot.slane %v2361_v47, 7  ;;  %v2282_v52 = vpop.f32.mrf.mxu0  ;;  %3402 = vmatpush1.bf16.msra.mxu1 %v7279_v19 }
 0x371   :  { %v2424_v49 = vsel %vm1084_vm14, %v2420_v31, %v2423_v39  ;;  %v2836_v56 = vsel %vm1626_vm0, %v2831_v18, %v8138_v42  ;;  %vm2326_vm3 = vcmp.ge.f32.partialorder %v2307_v48, 0.0  ;;  %v2345_v25 = vmul.f32 %v8065_v27, %v2307_v48  ;;  %3403 = vmatprep.subr.bf16.mxu1 %v7287_v38 }
 0x372   :  { %v2362_v10 = vsel %vm2325_vm2, %v2306_v20, %v2344_v37  ;;  %v2308_v54 = vadd.f32 %v2282_v52, %v8090_v5  ;;  %3091 = vmatprep.mubr.bf16.mxu0 %v2836_v56  ;;  %v2465_v51 = vld [vmem:[#allocation2 + $0x40] sm:$0xff]  ;;  %v2426_v58 = vsel %vm1084_vm14, %v2421_v28, %v2425_v9  ;;  %v2286_v24 = vpop.f32.mrf.mxu0  ;;  %v2819_v59 = vor.u32 %v2818_v22, %v2814_v40 }
 0x373   :  { %v2427_v60 = vrot.slane %v2362_v10, 7  ;;  %v2823_v61 = vrot.slane %v2821_v45, 1  ;;  %v2363_v62 = vsel %vm2326_vm3, %v2307_v48, %v2345_v25  ;;  %v2309_v57 = vadd.f32 %v2286_v24, %v8094_v32  ;;  %v7293_v32 = vld [vmem:[#allocation9 + $0x524] ss:$8 sps:$4 sm:$0xff]  }
 0x374   :  { %vm2327_vm4 = vcmp.ge.f32.partialorder %v2308_v54, 0.0  ;;  %v2346_v0 = vmul.f32 %v8065_v27, %v2308_v54  ;;  %v2466_v1 = vld [vmem:[#allocation2 + $0x48] sm:$0xff]  ;;  %v2429_v4 = vrot.slane %v2363_v62, 7  ;;  %v2288_v21 = vpop.f32.mrf.mxu0  ;;  %3404 = vmatpush1.bf16.msra.mxu1 %v7285_v53  ;;  %v8156_v55 = vpack.c.bf16 %v2422_v29, %v2465_v51  ;;  %v3158_v25 = vld [vmem:[#allocation2] sm:$0xfc] }
 0x375   :  { %v2824_v5 = vsel %vm1626_vm0, %v2819_v59, %v2823_v61  ;;  %v8154_v23 = vpack.c.bf16 %v2424_v49, %v2466_v1  ;;  %vm2328_vm5 = vcmp.ge.f32.partialorder %v2309_v57, 0.0  ;;  %v2347_v31 = vmul.f32 %v8065_v27, %v2309_v57  ;;  %3405 = vmatprep.subr.bf16.mxu1 %v7290_v2  ;;  %v7294_v53 = vld [vmem:[#allocation9 + $0x510] ss:$8 sps:$4 sm:$0xff]   ;;  %v7299_v2 = vld [vmem:[#allocation9 + $0x504] ss:$8 sps:$4 sm:$0xff]  }
 0x376   :  { %v2364_v30 = vsel %vm2327_vm4, %v2308_v54, %v2346_v0  ;;  %v2310_v13 = vadd.f32 %v2288_v21, %v8123_v46  ;;  %3092 = vmatmul.mubr.bf16.vlgmr.msra.gmra.mxu0 %v2824_v5  ;;  %v2430_v18 = vsel %vm1084_vm14, %v2425_v9, %v2429_v4  ;;  %v2290_v7 = vpop.f32.mrf.mxu0  ;;  %v2845_v17 = vshrl.u32 %v8125_v33, 16 }
 0x377   :  { %v2431_v6 = vrot.slane %v2364_v30, 7  ;;  %2743 = vmatprep.mubr.bf16.mxu1 %v8154_v23  ;;  %v2849_v28 = vshll.u32 %v8154_v23, 16  ;;  %v2428_v43 = vsel %vm1084_vm14, %v2423_v39, %v2427_v60  ;;  %v2365_v19 = vsel %vm2328_vm5, %v2309_v57, %v2347_v31  ;;  %v7297_v57 = vld [vmem:[#allocation9 + $0x500] ss:$8 sps:$4 sm:$0xff]  }
 0x378   :  { %vm2329_vm6 = vcmp.ge.f32.partialorder %v2310_v13, 0.0  ;;  %v2348_v63 = vmul.f32 %v8065_v27, %v2310_v13  ;;  %2744 = vmatmul.mubr.bf16.gmra.mxu1 %v8156_v55  ;;  %v2433_v40 = vrot.slane %v2365_v19, 7  ;;  %v2291_v34 = vpop.f32.mrf.mxu0  ;;  %v2847_v36 = vor.u32 %v2845_v17, %v8138_v42  ;;  %v7296_v27 = vld [vmem:[#allocation9 + $0x514] ss:$8 sps:$4 sm:$0xff]   ;;  %v7300_v17 = vld [vmem:[#allocation9 + $0x5f0] ss:$8 sps:$4 sm:$0xff]  }
 0x379   :  { %v2432_v46 = vsel %vm1084_vm14, %v2427_v60, %v2431_v6  ;;  %3406 = vmatpush1.bf16.msra.mxu1 %v7288_v3  ;;  %v2851_v20 = vrot.slane %v2849_v28, 1  ;;  %v2837_v41 = vshrl.u32 %v8117_v15, 16  ;;  %v2841_v39 = vshll.u32 %v8156_v55, 16 }
 0x37a   :  { %v2366_v38 = vsel %vm2329_vm6, %v2310_v13, %v2348_v63  ;;  %3407 = vmatprep.subr.bf16.mxu1 %v7293_v32  ;;  %v8171_v22 = vpack.c.bf16 %v2432_v46, %v2428_v43  ;;  %v2434_v45 = vsel %vm1084_vm14, %v2429_v4, %v2433_v40  ;;  %v8175_v48 = vpack.c.bf16 %v2430_v18, %v2426_v58  ;;  %v7302_v4 = vld [vmem:[#allocation9 + $0x5f4] ss:$8 sps:$4 sm:$0xff]   ;;  %v7305_v46 = vld [vmem:[#allocation9 + $0x5e4] ss:$8 sps:$4 sm:$0xff]  }
 0x37b   :  { %v2435_v47 = vrot.slane %v2366_v38, 7  ;;  %v2852_v37 = vsel %vm1626_vm0, %v2847_v36, %v2851_v20  ;;  %2455 = vst [vmem:[#allocation2 + $0x80] sm:$0x3] %v2434_v45  ;;  %v2839_v42 = vor.u32 %v2837_v41, %v2823_v61  ;;  %v2843_v29 = vrot.slane %v2841_v39, 1  ;;  %v3159_v61 = vld [vmem:[#allocation2 + $0x8] sm:$0xfc] }
 0x37c   :  { %3101 = vmatprep.mubr.bf16.mxu0 %v2852_v37  ;;  %2753 = vmatprep.mubr.bf16.mxu1 %v8171_v22  ;;  %v2861_v49 = vshrl.u32 %v8154_v23, 16  ;;  %v2865_v9 = vshll.u32 %v8171_v22, 16  ;;  %v2853_v56 = vshrl.u32 %v8156_v55, 16  ;;  %v2857_v10 = vshll.u32 %v8175_v48, 16  ;;  %v7308_v39 = vld [vmem:[#allocation9 + $0x5d4] ss:$8 sps:$4 sm:$0xff]  }
 0x37d   :  { %v2436_v52 = vsel %vm1084_vm14, %v2431_v6, %v2435_v47  ;;  %3408 = vmatpush1.bf16.msra.mxu1 %v7291_v16  ;;  %v2844_v54 = vsel %vm1626_vm0, %v2839_v42, %v2843_v29  ;;  %v3162_v62 = vpack.c.bf16 %v8097_v8, %v3158_v25  ;;  %v3210_v0 = vrot.slane %v8117_v15, 1  ;;  %v7306_v42 = vld [vmem:[#allocation9 + $0x5d0] ss:$8 sps:$4 sm:$0xff]   ;;  %v7320_v25 = vld [vmem:[#allocation9 + $0x594] ss:$8 sps:$4 sm:$0xff]  }
 0x37e   :  { %2456 = vst [vmem:[#allocation2 + $0x88] sm:$0x3] %v2436_v52  ;;  %3409 = vmatprep.subr.bf16.mxu1 %v7296_v27  ;;  %v2863_v51 = vor.u32 %v2861_v49, %v2851_v20  ;;  %v2867_v58 = vrot.slane %v2865_v9, 1  ;;  %3102 = vmatmul.mubr.bf16.gmra.mxu0 %v2844_v54  ;;  %v2855_v60 = vor.u32 %v2853_v56, %v2843_v29  ;;  %v2859_v24 = vrot.slane %v2857_v10, 1  ;;  %v7303_v20 = vld [vmem:[#allocation9 + $0x5e0] ss:$8 sps:$4 sm:$0xff]  }
 0x37f   :  { %v3209_v21 = vrot.slane %v3162_v62, 1  ;;  %v3215_v5 = vrot.slane %v8156_v55, 1  ;;  %v3219_v3 = vrot.slane %v8175_v48, 1  ;;  %v3163_v30 = vpack.c.bf16 %v8100_v12, %v3159_v61  ;;  %v7311_v29 = vld [vmem:[#allocation9 + $0x5c4] ss:$8 sps:$4 sm:$0xff]  }
 0x380   :  { %2754 = vmatmul.mubr.bf16.gmra.mxu1 %v8175_v48  ;;  %v2868_v59 = vsel %vm1626_vm0, %v2863_v51, %v2867_v58  ;;  %v2860_v1 = vsel %vm1626_vm0, %v2855_v60, %v2859_v24  ;;  %v3213_v7 = vrot.slane %v8125_v33, 1  ;;  %v2877_v40 = vshrl.u32 %v8171_v22, 16  ;;  %v7309_v49 = vld [vmem:[#allocation9 + $0x5c0] ss:$8 sps:$4 sm:$0xff]   ;;  %v7314_v9 = vld [vmem:[#allocation9 + $0x5b4] ss:$8 sps:$4 sm:$0xff]  }
 0x381   :  { %3410 = vmatpush1.bf16.msra.mxu1 %v7294_v53  ;;  %3111 = vmatprep.mubr.bf16.mxu0 %v2868_v59  ;;  %v8193_v8 = vsel %vm2023_vm1, %v3209_v21, %v3210_v0  ;;  %v8196_v15 = vsel %vm2023_vm1, %v3210_v0, %v3215_v5  ;;  %v8202_v55 = vsel %vm2023_vm1, %v3215_v5, %v3219_v3  ;;  %v3212_v63 = vrot.slane %v3163_v30, 1  ;;  %v7312_v53 = vld [vmem:[#allocation9 + $0x5b0] ss:$8 sps:$4 sm:$0xff]   ;;  %v7317_v56 = vld [vmem:[#allocation9 + $0x5a4] ss:$8 sps:$4 sm:$0xff]  }
 0x382   :  { %3411 = vmatprep.subr.bf16.mxu1 %v7299_v2  ;;  %v2774_v31 = vld [vmem:[#allocation2 + $0x80] sm:$0x3]  ;;  %v2879_v16 = vor.u32 %v2877_v40, %v2867_v58  ;;  %v2869_v38 = vshrl.u32 %v8175_v48, 16  ;;  %v7318_v54 = vld [vmem:[#allocation9 + $0x590] ss:$8 sps:$4 sm:$0xff]   ;;  %v3217_v58 = vrot.slane %v8154_v23, 1 }
 0x383   :  { %v2473_v13 = vld [vmem:[#allocation2 + $0x80] sm:$0x1]  ;;  %v2778_v32 = vpack.c.bf16 %v2774_v31, %v2774_v31  ;;  %v3214_v33 = vsel %vm2023_vm1, %v3212_v63, %v3213_v7  ;;  %v7323_v2 = vld [vmem:[#allocation9 + $0x584] ss:$8 sps:$4 sm:$0xff]   ;;  %v7324_v21 = vld [vmem:[#allocation9 + $0x670] ss:$8 sps:$4 sm:$0xff]  }
 0x384   :  { %v2483_v19 = vpack.c.bf16 %v2473_v13, %v2473_v13  ;;  %v2871_v45 = vor.u32 %v2869_v38, %v2859_v24  ;;  %v7315_v10 = vld [vmem:[#allocation9 + $0x5a0] ss:$8 sps:$4 sm:$0xff]   ;;  %v3218_v60 = vsel %vm2023_vm1, %v3213_v7, %v3217_v58  ;;  %v3221_v24 = vrot.slane %v8171_v22, 1  ;;  %v7326_v5 = vld [vmem:[#allocation9 + $0x674] ss:$8 sps:$4 sm:$0xff]  }
 0x385   :  { %v2474_v18 = vld [vmem:[#allocation2 + $0x88] sm:$0x1]  ;;  %3412 = vmatpush1.bf16.msra.mxu1 %v7297_v57  ;;  %v2873_v43 = vshll.u32 %v2778_v32, 16  ;;  %v2885_v52 = vshrl.u32 %v2778_v32, 16  ;;  %v7321_v51 = vld [vmem:[#allocation9 + $0x580] ss:$8 sps:$4 sm:$0xff]   ;;  %3876 = vmatprep.subr.bf16.mxu0 %v7326_v5 }
 0x386   :  { %v2775_v6 = vld [vmem:[#allocation2 + $0x88] sm:$0x3]  ;;  %v2484_v12 = vpack.c.bf16 %v2474_v18, %v2474_v18  ;;  %3413 = vmatprep.subr.bf16.mxu1 %v7302_v4  ;;  %3112 = vmatmul.mubr.bf16.gmra.mxu0 %v2860_v1  ;;  %v3222_v61 = vsel %vm2023_vm1, %v3217_v58, %v3221_v24  ;;  %v3160_v57 = vld [vmem:[#allocation2 + $0x80] sm:$0x7]  ;;  %v7329_v31 = vld [vmem:[#allocation9 + $0x664] ss:$8 sps:$4 sm:$0xff]  }
 0x387   :  { %v2779_v28 = vpack.c.bf16 %v2775_v6, %v2775_v6  ;;  %v2875_v41 = vrot.slane %v2873_v43, 1  ;;  %v3161_v59 = vld [vmem:[#allocation2 + $0x88] sm:$0x7]  ;;  %v3164_v1 = vpack.c.bf16 %v3160_v57, %v3160_v57  ;;  %3877 = vmatpush1.bf16.msra.mxu0 %v7324_v21  ;;  %v7327_v30 = vld [vmem:[#allocation9 + $0x660] ss:$8 sps:$4 sm:$0xff]  }
 0x388   :  { %2763 = vmatprep.mubr.bf16.mxu1 %v2484_v12  ;;  %v3165_v62 = vpack.c.bf16 %v3161_v59, %v3161_v59  ;;  %3878 = vmatprep.subr.bf16.mxu0 %v7329_v31  ;;  %v7330_v13 = vld [vmem:[#allocation9 + $0x650] ss:$8 sps:$4 sm:$0xff]   ;;  %v7332_v32 = vld [vmem:[#allocation9 + $0x654] ss:$8 sps:$4 sm:$0xff]   ;;  %v7342_v7 = vld [vmem:[#allocation9 + $0x760] ss:$8 sps:$4 sm:$0xff]  }
 0x389   :  { %v2881_v34 = vshll.u32 %v2779_v28, 16  ;;  %2764 = vmatmul.mubr.bf16.gmra.mxu1 %v2483_v19  ;;  %v2876_v47 = vsel %vm1626_vm0, %v2871_v45, %v2875_v41  ;;  %v2887_v37 = vshrl.u32 %v2779_v28, 16  ;;  %v3223_v4 = vrot.slane %v3164_v1, 1  ;;  %v7336_v48 = vld [vmem:[#allocation9 + $0x770] ss:$8 sps:$4 sm:$0xff]  }
 0x38a   :  { %3414 = vmatpush2.bf16.msra.mxu1 %v7300_v17  ;;  %3429 = vmatprep.mubr.bf16.mxu1 %v3214_v33  ;;  %v3225_v0 = vrot.slane %v3165_v62, 1  ;;  %v7339_v18 = vld [vmem:[#allocation9 + $0x630] ss:$8 sps:$4 sm:$0xff]   ;;  %v7341_v6 = vld [vmem:[#allocation9 + $0x634] ss:$8 sps:$4 sm:$0xff]  }
 0x38b   :  { %v2883_v36 = vrot.slane %v2881_v34, 1  ;;  %3415 = vmatprep.subr.bf16.mxu1 %v7305_v46  ;;  %v3224_v22 = vsel %vm2023_vm1, %v3219_v3, %v3223_v4  ;;  %3879 = vmatpush1.bf16.msra.mxu0 %v7327_v30  ;;  %v7338_v3 = vld [vmem:[#allocation9 + $0x774] ss:$8 sps:$4 sm:$0xff]   ;;  %v7345_v12 = vld [vmem:[#allocation9 + $0x620] ss:$8 sps:$4 sm:$0xff]  }
 0x38c   :  { %v3226_v23 = vsel %vm2023_vm1, %v3221_v24, %v3225_v0  ;;  %3880 = vmatprep.subr.bf16.mxu0 %v7332_v32  ;;  %v7347_v17 = vld [vmem:[#allocation9 + $0x624] ss:$8 sps:$4 sm:$0xff]   ;;  %v7348_v28 = vld [vmem:[#allocation9 + $0x750] ss:$8 sps:$4 sm:$0xff]   ;;  %v7350_v43 = vld [vmem:[#allocation9 + $0x754] ss:$8 sps:$4 sm:$0xff]  }
 0x38d   :  { %v2884_v27 = vsel %vm1626_vm0, %v2879_v16, %v2883_v36  ;;  %v7351_v19 = vld [vmem:[#allocation9 + $0x610] ss:$8 sps:$4 sm:$0xff]   ;;  %v7353_v63 = vld [vmem:[#allocation9 + $0x614] ss:$8 sps:$4 sm:$0xff]   ;;  %v7354_v46 = vld [vmem:[#allocation9 + $0x740] ss:$8 sps:$4 sm:$0xff]  }
 0x38e   :  { %3121 = vmatprep.mubr.bf16.mxu0 %v2884_v27  ;;  %3416 = vmatpush2.bf16.msra.mxu1 %v7303_v20  ;;  %v7356_v40 = vld [vmem:[#allocation9 + $0x744] ss:$8 sps:$4 sm:$0xff]   ;;  %v7357_v34 = vld [vmem:[#allocation9 + $0x600] ss:$8 sps:$4 sm:$0xff]   ;;  %v7362_v16 = vld [vmem:[#allocation9 + $0x734] ss:$8 sps:$4 sm:$0xff]  }
 0x38f   :  { %3122 = vmatmul.mubr.bf16.gmra.mxu0 %v2876_v47  ;;  %3417 = vmatprep.subr.bf16.mxu1 %v7308_v39  ;;  %v7359_v33 = vld [vmem:[#allocation9 + $0x604] ss:$8 sps:$4 sm:$0xff]   ;;  %v7365_v36 = vld [vmem:[#allocation9 + $0x6f4] ss:$8 sps:$4 sm:$0xff]   ;;  %v7360_v20 = vld [vmem:[#allocation9 + $0x730] ss:$8 sps:$4 sm:$0xff]  }
 0x390   :  { %3131 = vmatprep.mubr.bf16.mxu0 %v2887_v37  ;;  %3881 = vmatpush1.bf16.msra.mxu0 %v7330_v13  ;;  %v7368_v38 = vld [vmem:[#allocation9 + $0x724] ss:$8 sps:$4 sm:$0xff]   ;;  %v7363_v41 = vld [vmem:[#allocation9 + $0x6f0] ss:$8 sps:$4 sm:$0xff]   ;;  %v7366_v27 = vld [vmem:[#allocation9 + $0x720] ss:$8 sps:$4 sm:$0xff]  }
 0x391   :  { %v7371_v39 = vld [vmem:[#allocation9 + $0x6e4] ss:$8 sps:$4 sm:$0xff]   ;;  %v7374_v45 = vld [vmem:[#allocation9 + $0x714] ss:$8 sps:$4 sm:$0xff]   ;;  %v7369_v47 = vld [vmem:[#allocation9 + $0x6e0] ss:$8 sps:$4 sm:$0xff]  }
 0x392   :  { %3418 = vmatpush2.bf16.msra.mxu1 %v7306_v42  ;;  %v7372_v37 = vld [vmem:[#allocation9 + $0x710] ss:$8 sps:$4 sm:$0xff]   ;;  %v7393_v58 = vld [vmem:[#allocation9 + $0x6a0] ss:$8 sps:$4 sm:$0xff]   ;;  %v7398_v59 = vld [vmem:[#allocation9 + $0x7d4] ss:$8 sps:$4 sm:$0xff]  }
 0x393   :  { %3419 = vmatprep.subr.bf16.mxu1 %v7311_v29  ;;  %v7375_v42 = vld [vmem:[#allocation9 + $0x6d0] ss:$8 sps:$4 sm:$0xff]   ;;  %v7377_v29 = vld [vmem:[#allocation9 + $0x6d4] ss:$8 sps:$4 sm:$0xff]   ;;  %v7404_v57 = vld [vmem:[#allocation9 + $0x7c4] ss:$8 sps:$4 sm:$0xff]  }
 0x394   :  { %v7396_v24 = vld [vmem:[#allocation9 + $0x7d0] ss:$8 sps:$4 sm:$0xff]   ;;  %v7401_v62 = vld [vmem:[#allocation9 + $0x694] ss:$8 sps:$4 sm:$0xff]   ;;  %v7405_v1 = vld [vmem:[#allocation9 + $0x680] ss:$8 sps:$4 sm:$0xff]  }
 0x395   :  { %v7413_v21 = vld [vmem:[#allocation9 + $0x874] ss:$8 sps:$4 sm:$0xff]   ;;  %v7414_v5 = vld [vmem:[#allocation9 + $0x7a0] ss:$8 sps:$4 sm:$0xff]   ;;  %v7416_v30 = vld [vmem:[#allocation9 + $0x7a4] ss:$8 sps:$4 sm:$0xff]  }
 0x396   :  { %3420 = vmatpush2.bf16.msra.mxu1 %v7309_v49  ;;  %v7378_v49 = vld [vmem:[#allocation9 + $0x700] ss:$8 sps:$4 sm:$0xff]   ;;  %v7420_v31 = vld [vmem:[#allocation9 + $0x790] ss:$8 sps:$4 sm:$0xff]   ;;  %v7422_v13 = vld [vmem:[#allocation9 + $0x794] ss:$8 sps:$4 sm:$0xff]  }
 0x397   :  { %3132 = vmatmul.mubr.bf16.gmra.mxu0 %v2885_v52  ;;  %3421 = vmatprep.subr.bf16.mxu1 %v7314_v9  ;;  %v7380_v9 = vld [vmem:[#allocation9 + $0x704] ss:$8 sps:$4 sm:$0xff]   ;;  %v7381_v52 = vld [vmem:[#allocation9 + $0x6c0] ss:$8 sps:$4 sm:$0xff]  }
 0x398   :  { %v7426_v32 = vld [vmem:[#allocation9 + $0x780] ss:$8 sps:$4 sm:$0xff]  }
 0x39a   :  { %3422 = vmatpush2.bf16.msra.mxu1 %v7312_v53  ;;  %v7383_v53 = vld [vmem:[#allocation9 + $0x6c4] ss:$8 sps:$4 sm:$0xff]  }
 0x39b   :  { %3423 = vmatprep.subr.bf16.mxu1 %v7317_v56  ;;  %v7384_v56 = vld [vmem:[#allocation9 + $0x7f0] ss:$8 sps:$4 sm:$0xff]  }
 0x39e   :  { %3424 = vmatpush2.bf16.msra.mxu1 %v7315_v10  ;;  %v7386_v10 = vld [vmem:[#allocation9 + $0x7f4] ss:$8 sps:$4 sm:$0xff]  }
 0x39f   :  { %3425 = vmatprep.subr.bf16.mxu1 %v7320_v25  ;;  %v7387_v25 = vld [vmem:[#allocation9 + $0x6b0] ss:$8 sps:$4 sm:$0xff]  }
 0x3a2   :  { %3426 = vmatpush2.bf16.msra.mxu1 %v7318_v54  ;;  %v7389_v54 = vld [vmem:[#allocation9 + $0x6b4] ss:$8 sps:$4 sm:$0xff]  }
 0x3a3   :  { %3427 = vmatprep.subr.bf16.mxu1 %v7323_v2  ;;  %v7390_v2 = vld [vmem:[#allocation9 + $0x7e0] ss:$8 sps:$4 sm:$0xff]  }
 0x3a6   :  { %3428 = vmatpush2.bf16.msra.mxu1 %v7321_v51  ;;  %v7392_v51 = vld [vmem:[#allocation9 + $0x7e4] ss:$8 sps:$4 sm:$0xff]  }
 0x3a7   :  { %4244 = vmatprep.subr.bf16.mxu1 %v7338_v3 }
 0x3a9   :  { %3430 = vmatmul.mubr.bf16.vlgmr.msra.gmra.mxu1 %v8193_v8  ;;  %v7333_v8 = vld [vmem:[#allocation9 + $0x640] ss:$8 sps:$4 sm:$0xff]  }
 0x3aa   :  { %3439 = vmatprep.mubr.bf16.mxu1 %v3218_v60  ;;  %4245 = vmatpush1.bf16.msra.mxu1 %v7336_v48  ;;  %v7395_v60 = vld [vmem:[#allocation9 + $0x6a4] ss:$8 sps:$4 sm:$0xff]  }
 0x3b1   :  { %3440 = vmatmul.mubr.bf16.gmra.mxu1 %v8196_v15  ;;  %v7335_v15 = vld [vmem:[#allocation9 + $0x644] ss:$8 sps:$4 sm:$0xff]  }
 0x3b2   :  { %3449 = vmatprep.mubr.bf16.mxu1 %v3222_v61  ;;  %3882 = vmatprep.subr.bf16.mxu0 %v7335_v15  ;;  %v7399_v61 = vld [vmem:[#allocation9 + $0x690] ss:$8 sps:$4 sm:$0xff]   ;;  %v8750_v15 = vmov 0.0  }
 0x3b3   :  { %3883 = vmatpush1.bf16.msra.mxu0 %v7333_v8  ;;  %v7428_v8 = vld [vmem:[#allocation9 + $0x784] ss:$8 sps:$4 sm:$0xff]  }
 0x3b4   :  { %3884 = vmatprep.subr.bf16.mxu0 %v7341_v6 }
 0x3b7   :  { %3885 = vmatpush1.bf16.msra.mxu0 %v7339_v18 }
 0x3b8   :  { %3886 = vmatprep.subr.bf16.mxu0 %v7347_v17 }
 0x3b9   :  { %3450 = vmatmul.mubr.bf16.gmra.mxu1 %v8202_v55  ;;  %v7344_v55 = vld [vmem:[#allocation9 + $0x764] ss:$8 sps:$4 sm:$0xff]  }
 0x3ba   :  { %3459 = vmatprep.mubr.bf16.mxu1 %v3226_v23  ;;  %4246 = vmatprep.subr.bf16.mxu1 %v7344_v55  ;;  %v7407_v23 = vld [vmem:[#allocation9 + $0x684] ss:$8 sps:$4 sm:$0xff]  }
 0x3bb   :  { %4247 = vmatpush1.bf16.msra.mxu1 %v7342_v7  ;;  %3887 = vmatpush1.bf16.msra.mxu0 %v7345_v12 }
 0x3bc   :  { %4248 = vmatprep.subr.bf16.mxu1 %v7350_v43  ;;  %3888 = vmatprep.subr.bf16.mxu0 %v7353_v63 }
 0x3bf   :  { %4249 = vmatpush1.bf16.msra.mxu1 %v7348_v28  ;;  %3889 = vmatpush1.bf16.msra.mxu0 %v7351_v19 }
 0x3c0   :  { %4250 = vmatprep.subr.bf16.mxu1 %v7356_v40  ;;  %3890 = vmatprep.subr.bf16.mxu0 %v7359_v33 }
 0x3c1   :  { %3460 = vmatmul.mubr.bf16.gmra.mxu1 %v3224_v22  ;;  %v7410_v22 = vld [vmem:[#allocation9 + $0x7b4] ss:$8 sps:$4 sm:$0xff]  }
 0x3c2   :  { %3469 = vmatprep.mubr.bf16.mxu1 %v3225_v0  ;;  %v7402_v0 = vld [vmem:[#allocation9 + $0x7c0] ss:$8 sps:$4 sm:$0xff]  }
 0x3c3   :  { %4251 = vmatpush1.bf16.msra.mxu1 %v7354_v46  ;;  %3891 = vmatpush1.bf16.msra.mxu0 %v7357_v34 }
 0x3c4   :  { %4252 = vmatprep.subr.bf16.mxu1 %v7362_v16  ;;  %3892 = vmatprep.subr.bf16.mxu0 %v7365_v36 }
 0x3c7   :  { %4253 = vmatpush1.bf16.msra.mxu1 %v7360_v20  ;;  %3893 = vmatpush2.bf16.msra.mxu0 %v7363_v41 }
 0x3c8   :  { %4254 = vmatprep.subr.bf16.mxu1 %v7368_v38  ;;  %3894 = vmatprep.subr.bf16.mxu0 %v7371_v39 }
 0x3c9   :  { %3470 = vmatmul.mubr.bf16.gmra.mxu1 %v3223_v4  ;;  %v7408_v4 = vld [vmem:[#allocation9 + $0x7b0] ss:$8 sps:$4 sm:$0xff]  }
 0x3cb   :  { %4255 = vmatpush1.bf16.msra.mxu1 %v7366_v27  ;;  %3895 = vmatpush2.bf16.msra.mxu0 %v7369_v47 }
 0x3cc   :  { %4256 = vmatprep.subr.bf16.mxu1 %v7374_v45  ;;  %3896 = vmatprep.subr.bf16.mxu0 %v7377_v29 }
 0x3cf   :  { %4257 = vmatpush1.bf16.msra.mxu1 %v7372_v37  ;;  %3897 = vmatpush2.bf16.msra.mxu0 %v7375_v42 }
 0x3d0   :  { %4258 = vmatprep.subr.bf16.mxu1 %v7380_v9  ;;  %3898 = vmatprep.subr.bf16.mxu0 %v7383_v53 }
 0x3d3   :  { %4259 = vmatpush1.bf16.msra.mxu1 %v7378_v49  ;;  %3899 = vmatpush2.bf16.msra.mxu0 %v7381_v52 }
 0x3d4   :  { %4260 = vmatprep.subr.bf16.mxu1 %v7386_v10  ;;  %3900 = vmatprep.subr.bf16.mxu0 %v7389_v54 }
 0x3d7   :  { %4261 = vmatpush2.bf16.msra.mxu1 %v7384_v56  ;;  %3901 = vmatpush2.bf16.msra.mxu0 %v7387_v25 }
 0x3d8   :  { %4262 = vmatprep.subr.bf16.mxu1 %v7392_v51  ;;  %3902 = vmatprep.subr.bf16.mxu0 %v7395_v60 }
 0x3db   :  { %4263 = vmatpush2.bf16.msra.mxu1 %v7390_v2  ;;  %3903 = vmatpush2.bf16.msra.mxu0 %v7393_v58 }
 0x3dc   :  { %4264 = vmatprep.subr.bf16.mxu1 %v7398_v59  ;;  %3904 = vmatprep.subr.bf16.mxu0 %v7401_v62 }
 0x3df   :  { %4265 = vmatpush2.bf16.msra.mxu1 %v7396_v24  ;;  %3905 = vmatpush2.bf16.msra.mxu0 %v7399_v61  ;;  %v2519_v24 = vld [vmem:[#allocation15 + $0x1] ss:$4 sm:$0x3] }
 0x3e0   :  { %4266 = vmatprep.subr.bf16.mxu1 %v7404_v57  ;;  %3906 = vmatprep.subr.bf16.mxu0 %v7407_v23  ;;  %v2524_v59 = vrot.slane %v2519_v24, %v7852_v11  ;;  %v2528_v61 = vrot.slane %v2519_v24, %v7856_v14 }
 0x3e3   :  { %4267 = vmatpush2.bf16.msra.mxu1 %v7402_v0  ;;  %3907 = vmatpush2.bf16.msra.mxu0 %v7405_v1  ;;  %v8237_v1 = vstv %s6355_s3 }
 0x3e4   :  { %4268 = vmatprep.subr.bf16.mxu1 %v7410_v22  ;;  %4582 = vmatprep.subr.bf16.mxu0 %v7413_v21 }
 0x3e7   :  { %4269 = vmatpush2.bf16.msra.mxu1 %v7408_v4 }
 0x3e8   :  { %4270 = vmatprep.subr.bf16.mxu1 %v7416_v30 }
 0x3eb   :  { %4271 = vmatpush2.bf16.msra.mxu1 %v7414_v5 }
 0x3ec   :  { %4272 = vmatprep.subr.bf16.mxu1 %v7422_v13 }
 0x3ef   :  { %4273 = vmatpush2.bf16.msra.mxu1 %v7420_v31 }
 0x3f0   :  { %4274 = vmatprep.subr.bf16.mxu1 %v7428_v8 }
 0x3f3   :  { %4275 = vmatpush2.bf16.msra.mxu1 %v7426_v32 }
 0x3f4   :  { %6686 = vmatprep.subr.bf16.mxu1 %v8750_v15 }
 0x427   :  { %v2725_v48 = vpop.f32.mrf.mxu1 }
 0x428   :  { %v2726_v62 = vadd.f32 %v2725_v48, %v2524_v59 }
 0x429   :  { %v2727_v3 = vpop.f32.mrf.mxu1 }
 0x42a   :  { %v2728_v0 = vadd.f32 %v2727_v3, %v2528_v61 }
 0x42b   :  { %v2729_v18 = vpop.f32.mrf.mxu1 }
 0x42c   :  { %v2730_v57 = vadd.f32 %v2729_v18, %v2524_v59 }
 0x42d   :  { %v2731_v6 = vpop.f32.mrf.mxu1 }
 0x42e   :  { %v2732_v23 = vadd.f32 %v2731_v6, %v2528_v61 }
 0x42f   :  { %v2735_v7 = vpop.f32.mrf.mxu1 }
 0x430   :  { %v2736_v4 = vadd.f32 %v2735_v7, %v2524_v59 }
 0x431   :  { %v2737_v55 = vpop.f32.mrf.mxu1 }
 0x432   :  { %v2738_v22 = vadd.f32 %v2737_v55, %v2528_v61 }
 0x433   :  { %v2739_v12 = vpop.f32.mrf.mxu1 }
 0x434   :  { %v2740_v5 = vadd.f32 %v2739_v12, %v2524_v59 }
 0x435   :  { %v2741_v28 = vpop.f32.mrf.mxu1 }
 0x436   :  { %v3093_v17 = vpop.f32.mrf.mxu0  ;;  %v2742_v30 = vadd.f32 %v2741_v28, %v2528_v61 }
 0x437   :  { %v3140_v21 = vadd.f32 %v3093_v17, %v2726_v62 }
 0x438   :  { %v3095_v43 = vpop.f32.mrf.mxu0  ;;  %v2745_v19 = vpop.f32.mrf.mxu1 }
 0x439   :  { %v3141_v31 = vadd.f32 %v3095_v43, %v2728_v0  ;;  %v2746_v13 = vadd.f32 %v2745_v19, %v2524_v59 }
 0x43a   :  { %v3097_v63 = vpop.f32.mrf.mxu0  ;;  %v2747_v46 = vpop.f32.mrf.mxu1 }
 0x43b   :  { %v3142_v8 = vadd.f32 %v3097_v63, %v2730_v57 }
 0x43c   :  { %v2749_v40 = vpop.f32.mrf.mxu1  ;;  %v3099_v34 = vpop.f32.mrf.mxu0 }
 0x43e   :  { %v2751_v33 = vpop.f32.mrf.mxu1  ;;  %v3103_v16 = vpop.f32.mrf.mxu0 }
 0x43f   :  { %v3144_v24 = vadd.f32 %v3103_v16, %v2736_v4  ;;  %v2752_v48 = vadd.f32 %v2751_v33, %v2528_v61 }
 0x440   :  { %v2755_v36 = vpop.f32.mrf.mxu1  ;;  %v3105_v20 = vpop.f32.mrf.mxu0 }
 0x441   :  { %v2756_v3 = vadd.f32 %v2755_v36, %v2524_v59  ;;  %v3145_v50 = vadd.f32 %v3105_v20, %v2738_v22 }
 0x442   :  { %v2757_v38 = vpop.f32.mrf.mxu1  ;;  %v3107_v41 = vpop.f32.mrf.mxu0 }
 0x443   :  { %v3146_v55 = vadd.f32 %v3107_v41, %v2740_v5  ;;  %v2758_v12 = vadd.f32 %v2757_v38, %v2528_v61 }
 0x444   :  { %v2759_v39 = vpop.f32.mrf.mxu1  ;;  %v3109_v27 = vpop.f32.mrf.mxu0 }
 0x445   :  { %v3147_v17 = vadd.f32 %v3109_v27, %v2742_v30  ;;  %v2760_v28 = vadd.f32 %v2759_v39, %v2524_v59 }
 0x446   :  { %v2761_v45 = vpop.f32.mrf.mxu1  ;;  %v3113_v47 = vpop.f32.mrf.mxu0 }
 0x448   :  { %v3115_v37 = vpop.f32.mrf.mxu0 }
 0x449   :  { %v2765_v42 = vpop.f32.mrf.mxu1 }
 0x44a   :  { %v3117_v29 = vpop.f32.mrf.mxu0  ;;  %v2766_v38 = vadd.f32 %v2765_v42, %v2524_v59 }
 0x44b   :  { %v2767_v49 = vpop.f32.mrf.mxu1 }
 0x44c   :  { %v8221_v9 = vpop.f32.mrf.mxu0  ;;  %v2768_v39 = vadd.f32 %v2767_v49, %v2528_v61 }
 0x44d   :  { %v2769_v52 = vpop.f32.mrf.mxu1 }
 0x44e   :  { %v2748_v52 = vadd.f32 %v2747_v46, %v2528_v61 }
 0x44f   :  { %v8223_v53 = vpop.f32.mrf.mxu0  ;;  %v2770_v56 = vpop.f32.mrf.mxu1 }
 0x450   :  { %v3143_v56 = vadd.f32 %v3099_v34, %v2732_v23  ;;  %v2762_v34 = vadd.f32 %v2761_v45, %v2528_v61  ;;  %v8241_v33 = vadd.f32 %v3115_v37, %v2748_v52  ;;  %v8248_v37 = vadd.f32 %v8221_v9, %v2752_v48 }
 0x451   :  { %v8225_v10 = vpop.f32.mrf.mxu0  ;;  %v8251_v4 = vadd.f32 %v8223_v53, %v2756_v3 }
 0x452   :  { %v8254_v22 = vadd.f32 %v8225_v10, %v2758_v12 }
 0x453   :  { %v8227_v25 = vpop.f32.mrf.mxu0 }
 0x455   :  { %v8229_v54 = vpop.f32.mrf.mxu0 }
 0x456   :  { %v8261_v9 = vadd.f32 %v8229_v54, %v2762_v34  ;;  %v7411_v34 = vld [vmem:[#allocation9 + $0x870] ss:$8 sps:$4 sm:$0xff]  }
 0x457   :  { %v8231_v2 = vpop.f32.mrf.mxu0 }
 0x459   :  { %v8233_v51 = vpop.f32.mrf.mxu0 }
 0x45b   :  { %v3137_v58 = vpop.f32.mrf.mxu0 }
 0x45d   :  { %v3138_v60 = vpop.f32.mrf.mxu0 }
 0x45e   :  { %v2750_v60 = vadd.f32 %v2749_v40, %v2524_v59  ;;  %v3148_v40 = vadd.f32 %v3113_v47, %v2746_v13 }
 0x460   :  { %v8244_v27 = vadd.f32 %v3117_v29, %v2750_v60 }
 0x469   :  { %v3431_v32 = vpop.f32.mrf.mxu1 }
 0x46a   :  { %v3478_v58 = vadd.f32 %v3431_v32, %v3140_v21  ;;  %v8258_v21 = vadd.f32 %v8227_v25, %v2760_v28  ;;  %v8268_v32 = vadd.f32 %v8231_v2, %v2766_v38 }
 0x46b   :  { %v3433_v18 = vpop.f32.mrf.mxu1 }
 0x46c   :  { %vm3497_vm7 = vcmp.ge.f32.partialorder %v3478_v58, 0.0  ;;  %v3516_v6 = vmul.f32 %v8237_v1, %v3478_v58  ;;  %v3479_v7 = vadd.f32 %v3433_v18, %v3141_v31 }
 0x46d   :  { %v3435_v43 = vpop.f32.mrf.mxu1 }
 0x46e   :  { %v3534_v19 = vsel %vm3497_vm7, %v3478_v58, %v3516_v6  ;;  %vm3498_vm8 = vcmp.ge.f32.partialorder %v3479_v7, 0.0  ;;  %v3517_v63 = vmul.f32 %v8237_v1, %v3479_v7  ;;  %v3480_v46 = vadd.f32 %v3435_v43, %v3142_v8 }
 0x46f   :  { %v3560_v16 = vrot.slane %v3534_v19, 7  ;;  %v3437_v36 = vpop.f32.mrf.mxu1 }
 0x470   :  { %v3535_v20 = vsel %vm3498_vm8, %v3479_v7, %v3517_v63  ;;  %vm3499_vm9 = vcmp.ge.f32.partialorder %v3480_v46, 0.0  ;;  %v3518_v62 = vmul.f32 %v8237_v1, %v3480_v46  ;;  %v3481_v41 = vadd.f32 %v3437_v36, %v3143_v56 }
 0x471   :  { %3584 = vst [vmem:[#allocation2] sm:$0xfe] %v3560_v16  ;;  %v3561_v0 = vrot.slane %v3535_v20, 7  ;;  %v3441_v57 = vpop.f32.mrf.mxu1 }
 0x472   :  { %v3536_v23 = vsel %vm3499_vm9, %v3480_v46, %v3518_v62  ;;  %vm3500_vm10 = vcmp.ge.f32.partialorder %v3481_v41, 0.0  ;;  %v3519_v45 = vmul.f32 %v8237_v1, %v3481_v41  ;;  %v3482_v47 = vadd.f32 %v3441_v57, %v3144_v24  ;;  %v7419_v62 = vld [vmem:[#allocation9 + $0x864] ss:$8 sps:$4 sm:$0xff]  }
 0x473   :  { %3585 = vst [vmem:[#allocation2 + $0x8] sm:$0xfe] %v3561_v0  ;;  %v3562_v42 = vrot.slane %v3536_v23, 7  ;;  %v3443_v29 = vpop.f32.mrf.mxu1 }
 0x474   :  { %v3537_v49 = vsel %vm3500_vm10, %v3481_v41, %v3519_v45  ;;  %vm3501_vm11 = vcmp.ge.f32.partialorder %v3482_v47, 0.0  ;;  %v3520_v59 = vmul.f32 %v8237_v1, %v3482_v47  ;;  %v3483_v61 = vadd.f32 %v3443_v29, %v3145_v50  ;;  %v7417_v29 = vld [vmem:[#allocation9 + $0x860] ss:$8 sps:$4 sm:$0xff]  }
 0x475   :  { %v8264_v53 = vsel %vm1084_vm14, %v3560_v16, %v3562_v42  ;;  %v3564_v5 = vrot.slane %v3537_v49, 7  ;;  %v3445_v10 = vpop.f32.mrf.mxu1  ;;  %v8271_v50 = vadd.f32 %v8233_v51, %v2768_v39 }
 0x476   :  { %v3538_v30 = vsel %vm3501_vm11, %v3482_v47, %v3520_v59  ;;  %vm3502_vm12 = vcmp.ge.f32.partialorder %v3483_v61, 0.0  ;;  %v3521_v31 = vmul.f32 %v8237_v1, %v3483_v61  ;;  %v3484_v13 = vadd.f32 %v3445_v10, %v3146_v55 }
 0x477   :  { %v8274_v25 = vsel %vm1084_vm14, %v3561_v0, %v3564_v5  ;;  %v3566_v54 = vrot.slane %v3538_v30, 7  ;;  %v3447_v8 = vpop.f32.mrf.mxu1  ;;  %v7425_v30 = vld [vmem:[#allocation9 + $0x854] ss:$8 sps:$4 sm:$0xff]  }
 0x478   :  { %v3539_v52 = vsel %vm3502_vm12, %v3483_v61, %v3521_v31  ;;  %vm3503_vm13 = vcmp.ge.f32.partialorder %v3484_v13, 0.0  ;;  %v3522_v56 = vmul.f32 %v8237_v1, %v3484_v13  ;;  %v3485_v58 = vadd.f32 %v3447_v8, %v3147_v17  ;;  %v3642_v60 = vld [vmem:[#allocation2] sm:$0xff] }
 0x479   :  { %v3957_v24 = vld [vmem:[#allocation2] sm:$0xfe]  ;;  %v3567_v48 = vsel %vm1084_vm14, %v3562_v42, %v3566_v54  ;;  %v3568_v3 = vrot.slane %v3539_v52, 7  ;;  %v3451_v2 = vpop.f32.mrf.mxu1  ;;  %v3660_v18 = vpack.c.bf16 %v8264_v53, %v3642_v60 }
 0x47a   :  { %v8280_v51 = vpack.c.bf16 %v8264_v53, %v3957_v24  ;;  %v3540_v6 = vsel %vm3503_vm13, %v3484_v13, %v3522_v56  ;;  %vm3504_vm15 = vcmp.ge.f32.partialorder %v3485_v58, 0.0  ;;  %v3523_v7 = vmul.f32 %v8237_v1, %v3485_v58  ;;  %v3643_v12 = vld [vmem:[#allocation2 + $0x8] sm:$0xff] }
 0x47b   :  { %v3486_v55 = vadd.f32 %v3451_v2, %v3148_v40  ;;  %v3958_v28 = vld [vmem:[#allocation2 + $0x8] sm:$0xfe]  ;;  %v3569_v17 = vsel %vm1084_vm14, %v3564_v5, %v3568_v3  ;;  %v3570_v43 = vrot.slane %v3540_v6, 7  ;;  %v3453_v19 = vpop.f32.mrf.mxu1  ;;  %v3661_v63 = vpack.c.bf16 %v8274_v25, %v3643_v12 }
 0x47c   :  { %v3962_v46 = vpack.c.bf16 %v8274_v25, %v3958_v28  ;;  %v3541_v16 = vsel %vm3504_vm15, %v3485_v58, %v3523_v7  ;;  %v3487_v20 = vadd.f32 %v3453_v19, %v8241_v33  ;;  %v3999_v8 = vshrl.u32 %v8280_v51, 16 }
 0x47d   :  { %vm3505_vm2 = vcmp.ge.f32.partialorder %v3486_v55, 0.0  ;;  %v3524_v36 = vmul.f32 %v8237_v1, %v3486_v55  ;;  %v3571_v40 = vsel %vm1084_vm14, %v3566_v54, %v3570_v43  ;;  %3592 = vst [vmem:[#allocation2 + $0x40] sm:$0x1] %v3570_v43  ;;  %v3572_v41 = vrot.slane %v3541_v16, 7  ;;  %v3455_v38 = vpop.f32.mrf.mxu1  ;;  %3908 = vmatprep.mubr.bf16.mxu0 %v3661_v63  ;;  %v7429_v16 = vld [vmem:[#allocation9 + $0x840] ss:$8 sps:$4 sm:$0xff]  }
 0x47e   :  { %v4011_v39 = vshrl.u32 %v3962_v46, 16  ;;  %v4013_v0 = vshll.u32 %v3962_v46, 16  ;;  %vm3506_vm3 = vcmp.ge.f32.partialorder %v3487_v20, 0.0  ;;  %v3525_v23 = vmul.f32 %v8237_v1, %v3487_v20  ;;  %3909 = vmatmul.mubr.bf16.vlgmr.msra.gmra.mxu0 %v3660_v18 }
 0x47f   :  { %v3542_v57 = vsel %vm3505_vm2, %v3486_v55, %v3524_v36  ;;  %v3488_v45 = vadd.f32 %v3455_v38, %v8244_v27  ;;  %v3573_v47 = vsel %vm1084_vm14, %v3568_v3, %v3572_v41  ;;  %3593 = vst [vmem:[#allocation2 + $0x48] sm:$0x1] %v3572_v41  ;;  %v3457_v42 = vpop.f32.mrf.mxu1  ;;  %4583 = vmatpush1.bf16.msra.mxu0 %v7411_v34  ;;  %v4001_v3 = vshll.u32 %v8280_v51, 16 }
 0x480   :  { %v3604_v33 = vrot.slane %v3542_v57, 7  ;;  %v8292_v49 = vpack.c.bf16 %v3571_v40, %v3567_v48  ;;  %v4015_v59 = vrot.slane %v4013_v0, 1  ;;  %v3543_v61 = vsel %vm3506_vm3, %v3487_v20, %v3525_v23  ;;  %4584 = vmatprep.subr.bf16.mxu0 %v7419_v62 }
 0x481   :  { %vm3507_vm4 = vcmp.ge.f32.partialorder %v3488_v45, 0.0  ;;  %v3526_v5 = vmul.f32 %v8237_v1, %v3488_v45  ;;  %v3489_v10 = vadd.f32 %v3457_v42, %v8248_v37  ;;  %v3605_v27 = vrot.slane %v3543_v61, 7  ;;  %v3461_v31 = vpop.f32.mrf.mxu1  ;;  %v7423_v37 = vld [vmem:[#allocation9 + $0x850] ss:$8 sps:$4 sm:$0xff]  }
 0x482   :  { %3632 = vst [vmem:[#allocation2 + $0x40] sm:$0xfc] %v3604_v33  ;;  %v8296_v13 = vpack.c.bf16 %v3573_v47, %v3569_v17  ;;  %v4016_v54 = vor.u32 %v4015_v59, %v4011_v39  ;;  %v3490_v58 = vadd.f32 %v3461_v31, %v8251_v4  ;;  %v4006_v2 = vshll.u32 %v8292_v49, 16  ;;  %v7431_v4 = vld [vmem:[#allocation9 + $0x844] ss:$8 sps:$4 sm:$0xff]   ;;  %v7438_v47 = vld [vmem:[#allocation10 + $0x38] sm:$0xff]  }
 0x483   :  { %v3544_v52 = vsel %vm3507_vm4, %v3488_v45, %v3526_v5  ;;  %vm3508_vm5 = vcmp.ge.f32.partialorder %v3489_v10, 0.0  ;;  %v3527_v56 = vmul.f32 %v8237_v1, %v3489_v10  ;;  %3633 = vst [vmem:[#allocation2 + $0x48] sm:$0xfc] %v3605_v27  ;;  %v3463_v24 = vpop.f32.mrf.mxu1  ;;  %4585 = vmatpush1.bf16.msra.mxu0 %v7417_v29  ;;  %v4003_v43 = vrot.slane %v4001_v3, 1 }
 0x484   :  { %v3606_v60 = vrot.slane %v3544_v52, 7  ;;  %3918 = vmatprep.mubr.bf16.mxu0 %v8296_v13  ;;  %v4018_v48 = vshll.u32 %v8296_v13, 16  ;;  %vm3509_vm6 = vcmp.ge.f32.partialorder %v3490_v58, 0.0  ;;  %v3528_v6 = vmul.f32 %v8237_v1, %v3490_v58  ;;  %4586 = vmatprep.subr.bf16.mxu0 %v7425_v30 }
 0x485   :  { %v3545_v18 = vsel %vm3508_vm5, %v3489_v10, %v3527_v56  ;;  %v3491_v7 = vadd.f32 %v3463_v24, %v8254_v22  ;;  %v3465_v28 = vpop.f32.mrf.mxu1  ;;  %v4004_v20 = vor.u32 %v4003_v43, %v3999_v8  ;;  %v4008_v23 = vrot.slane %v4006_v2, 1  ;;  %v7441_v43 = vld [vmem:[#allocation9 + $0x814] ss:$8 sps:$4 sm:$0xff]  }
 0x486   :  { %v3607_v55 = vsel %vm1084_vm14, %v3604_v33, %v3606_v60  ;;  %v3608_v12 = vrot.slane %v3545_v18, 7  ;;  %v8308_v17 = vrot.slane %v4018_v48, 1  ;;  %v3546_v19 = vsel %vm3509_vm6, %v3490_v58, %v3528_v6  ;;  %3919 = vmatmul.mubr.bf16.gmra.mxu0 %v8292_v49  ;;  %v7435_v6 = vld [vmem:[#allocation9 + $0x820] ss:$8 sps:$4 sm:$0xff]  }
 0x487   :  { %vm3510_vm7 = vcmp.ge.f32.partialorder %v3491_v7, 0.0  ;;  %v3529_v51 = vmul.f32 %v8237_v1, %v3491_v7  ;;  %v3492_v63 = vadd.f32 %v3465_v28, %v8258_v21  ;;  %v3610_v22 = vrot.slane %v3546_v19, 7  ;;  %v3467_v34 = vpop.f32.mrf.mxu1  ;;  %4587 = vmatpush1.bf16.msra.mxu0 %v7423_v37  ;;  %v7434_v21 = vld [vmem:[#allocation9 + $0x834] ss:$8 sps:$4 sm:$0xff]  }
 0x488   :  { %v3609_v46 = vsel %vm1084_vm14, %v3605_v27, %v3608_v12  ;;  %v4021_v36 = vsel %vm1626_vm0, %v4016_v54, %v8308_v17  ;;  %v3493_v41 = vadd.f32 %v3467_v34, %v8261_v9  ;;  %4588 = vmatprep.subr.bf16.mxu0 %v7431_v4  ;;  %v4009_v10 = vsel %vm1626_vm0, %v4004_v20, %v4008_v23  ;;  %v7432_v27 = vld [vmem:[#allocation9 + $0x830] ss:$8 sps:$4 sm:$0xff]  }
 0x489   :  { %v3547_v62 = vsel %vm3510_vm7, %v3491_v7, %v3529_v51  ;;  %vm3511_vm8 = vcmp.ge.f32.partialorder %v3492_v63, 0.0  ;;  %v3530_v40 = vmul.f32 %v8237_v1, %v3492_v63  ;;  %4276 = vmatprep.mubr.bf16.mxu1 %v4021_v36  ;;  %v3650_v38 = vld [vmem:[#allocation2 + $0x40] sm:$0xff]  ;;  %v3611_v39 = vsel %vm1084_vm14, %v3606_v60, %v3610_v22  ;;  %v3471_v57 = vpop.f32.mrf.mxu1  ;;  %v7442_v37 = vld [vmem:[#allocation10 + $0x30] sm:$0xff]  }
 0x48a   :  { %v3612_v0 = vrot.slane %v3547_v62, 7  ;;  %v8319_v45 = vpack.c.bf16 %v3607_v55, %v3650_v38  ;;  %vm3512_vm9 = vcmp.ge.f32.partialorder %v3493_v41, 0.0  ;;  %v3531_v42 = vmul.f32 %v8237_v1, %v3493_v41  ;;  %v3651_v59 = vld [vmem:[#allocation2 + $0x48] sm:$0xff]  ;;  %4277 = vmatmul.mubr.bf16.vlgmr.msra.gmra.mxu1 %v4009_v10  ;;  %v7446_v36 = vld [vmem:[#allocation10 + $0x28] sm:$0xff]  }
 0x48b   :  { %v3548_v33 = vsel %vm3511_vm8, %v3492_v63, %v3530_v40  ;;  %v3494_v29 = vadd.f32 %v3471_v57, %v8268_v32  ;;  %v3473_v5 = vpop.f32.mrf.mxu1  ;;  %4589 = vmatpush1.bf16.msra.mxu0 %v7429_v16  ;;  %v8325_v30 = vpack.c.bf16 %v3609_v46, %v3651_v59  ;;  %v7437_v32 = vld [vmem:[#allocation9 + $0x824] ss:$8 sps:$4 sm:$0xff]   ;;  %v4030_v60 = vshrl.u32 %v8296_v13, 16  ;;  %6687 = vmatpush3.bf16.msra.mxu1 %v7438_v47  ;;  %v7439_v62 = vld [vmem:[#allocation9 + $0x810] ss:$8 sps:$4 sm:$0xff]  }
 0x48c   :  { %v3613_v9 = vsel %vm1084_vm14, %v3608_v12, %v3612_v0  ;;  %v3614_v61 = vrot.slane %v3548_v33, 7  ;;  %v3549_v31 = vsel %vm3512_vm9, %v3493_v41, %v3531_v42  ;;  %v3495_v8 = vadd.f32 %v3473_v5, %v8271_v50  ;;  %4590 = vmatprep.subr.bf16.mxu0 %v7434_v21  ;;  %6688 = vmatprep.subr.bf16.mxu1 %v8750_v15  ;;  %v7445_v41 = vld [vmem:[#allocation9 + $0x804] ss:$8 sps:$4 sm:$0xff]   ;;  %v4344_v57 = vld [vmem:[#allocation2 + $0x8] sm:$0xfc] }
 0x48d   :  { %vm3513_vm10 = vcmp.ge.f32.partialorder %v3494_v29, 0.0  ;;  %v3532_v54 = vmul.f32 %v8237_v1, %v3494_v29  ;;  %v3616_v56 = vrot.slane %v3549_v31, 7  ;;  %v3475_v58 = vpop.f32.mrf.mxu1  ;;  %3928 = vmatprep.mubr.bf16.mxu0 %v8325_v30  ;;  %v4034_v24 = vshll.u32 %v8325_v30, 16  ;;  %v7443_v47 = vld [vmem:[#allocation9 + $0x800] ss:$8 sps:$4 sm:$0xff]  }
 0x48e   :  { %v3615_v52 = vsel %vm1084_vm14, %v3610_v22, %v3614_v61  ;;  %vm3514_vm11 = vcmp.ge.f32.partialorder %v3495_v8, 0.0  ;;  %v3533_v3 = vmul.f32 %v8237_v1, %v3495_v8  ;;  %3929 = vmatmul.mubr.bf16.gmra.mxu0 %v8319_v45  ;;  %v4032_v7 = vor.u32 %v4030_v60, %v8308_v17 }
 0x48f   :  { %v3550_v48 = vsel %vm3513_vm10, %v3494_v29, %v3532_v54  ;;  %v3617_v50 = vsel %vm1084_vm14, %v3612_v0, %v3616_v56  ;;  %v3476_v18 = vpop.f32.mrf.mxu1  ;;  %4591 = vmatpush1.bf16.msra.mxu0 %v7432_v27  ;;  %v4036_v4 = vrot.slane %v4034_v24, 1  ;;  %v4022_v12 = vshrl.u32 %v8292_v49, 16  ;;  %6689 = vmatpush3.bf16.msra.mxu1 %v7442_v37  ;;  %v7449_v29 = vld [vmem:[#allocation9 + $0x8f4] ss:$8 sps:$4 sm:$0xff]   ;;  %v7453_v37 = vld [vmem:[#allocation9 + $0x8e4] ss:$8 sps:$4 sm:$0xff]  }
 0x490   :  { %v3618_v2 = vrot.slane %v3550_v48, 7  ;;  %v3551_v55 = vsel %vm3514_vm11, %v3495_v8, %v3533_v3  ;;  %4592 = vmatprep.subr.bf16.mxu0 %v7437_v32  ;;  %v4026_v28 = vshll.u32 %v8319_v45, 16  ;;  %v8340_v1 = vpack.c.bf16 %v3617_v50, %v3613_v9  ;;  %6690 = vmatprep.subr.bf16.mxu1 %v8750_v15  ;;  %v7454_v27 = vld [vmem:[#allocation10 + $0x18] sm:$0xff]   ;;  %v7458_v50 = vld [vmem:[#allocation10 + $0x10] sm:$0xff]  }
 0x491   :  { %v3620_v51 = vrot.slane %v3551_v55, 7  ;;  %v4037_v63 = vsel %vm1626_vm0, %v4032_v7, %v4036_v4  ;;  %v8344_v46 = vpack.c.bf16 %v3615_v52, %v3611_v39  ;;  %v4024_v17 = vor.u32 %v4022_v12, %v4008_v23  ;;  %v7450_v23 = vld [vmem:[#allocation10 + $0x20] sm:$0xff]   ;;  %v7457_v12 = vld [vmem:[#allocation9 + $0x8d4] ss:$8 sps:$4 sm:$0xff]  }
 0x492   :  { %v3619_v19 = vsel %vm1084_vm14, %v3614_v61, %v3618_v2  ;;  %4286 = vmatprep.mubr.bf16.mxu1 %v4037_v63  ;;  %v4028_v22 = vrot.slane %v4026_v28, 1  ;;  %3938 = vmatprep.mubr.bf16.mxu0 %v8340_v1  ;;  %v4046_v34 = vshrl.u32 %v8325_v30, 16  ;;  %v4050_v16 = vshll.u32 %v8340_v1, 16  ;;  %v7451_v7 = vld [vmem:[#allocation9 + $0x8e0] ss:$8 sps:$4 sm:$0xff]  }
 0x493   :  { %3640 = vst [vmem:[#allocation2 + $0x80] sm:$0x3] %v3619_v19  ;;  %v3621_v20 = vsel %vm1084_vm14, %v3616_v56, %v3620_v51  ;;  %4593 = vmatpush1.bf16.msra.mxu0 %v7435_v6  ;;  %v4042_v39 = vshll.u32 %v8344_v46, 16  ;;  %6691 = vmatpush3.bf16.msra.mxu1 %v7446_v36  ;;  %v4038_v33 = vshrl.u32 %v8319_v45, 16  ;;  %v4348_v59 = vpack.c.bf16 %v8274_v25, %v4344_v57  ;;  %v7447_v56 = vld [vmem:[#allocation9 + $0x8f0] ss:$8 sps:$4 sm:$0xff]  }
 0x494   :  { %3641 = vst [vmem:[#allocation2 + $0x88] sm:$0x3] %v3621_v20  ;;  %v4029_v40 = vsel %vm1626_vm0, %v4024_v17, %v4028_v22  ;;  %4594 = vmatprep.subr.bf16.mxu0 %v7441_v43  ;;  %v4048_v21 = vor.u32 %v4046_v34, %v4036_v4  ;;  %v4052_v38 = vrot.slane %v4050_v16, 1  ;;  %6692 = vmatprep.subr.bf16.mxu1 %v8750_v15  ;;  %v4398_v8 = vrot.slane %v8296_v13, 1  ;;  %v7462_v19 = vld [vmem:[#allocation10 + $0x8] sm:$0xff]   ;;  %v7466_v34 = vld [vmem:[#allocation10] sm:$0xff]  }
 0x495   :  { %4287 = vmatmul.mubr.bf16.gmra.mxu1 %v4029_v40  ;;  %v4044_v42 = vrot.slane %v4042_v39, 1  ;;  %v4040_v61 = vor.u32 %v4038_v33, %v4028_v22  ;;  %v4397_v24 = vrot.slane %v4348_v59, 1  ;;  %v4062_v48 = vshrl.u32 %v8340_v1, 16  ;;  %v7455_v17 = vld [vmem:[#allocation9 + $0x8d0] ss:$8 sps:$4 sm:$0xff]   ;;  %v7484_v13 = vld [vmem:[#allocation10 + $0xa8] sm:$0xff]  }
 0x496   :  { %3939 = vmatmul.mubr.bf16.gmra.mxu0 %v8344_v46  ;;  %v4053_v0 = vsel %vm1626_vm0, %v4048_v21, %v4052_v38  ;;  %v4054_v4 = vshrl.u32 %v8344_v46, 16  ;;  %v7461_v22 = vld [vmem:[#allocation9 + $0x8c4] ss:$8 sps:$4 sm:$0xff]   ;;  %v7459_v16 = vld [vmem:[#allocation9 + $0x8c0] ss:$8 sps:$4 sm:$0xff]   ;;  %vm7741_vm14 = vmmov 0  }
 0x497   :  { %4595 = vmatpush1.bf16.msra.mxu0 %v7439_v62  ;;  %4296 = vmatprep.mubr.bf16.mxu1 %v4053_v0  ;;  %v4045_v52 = vsel %vm1626_vm0, %v4040_v61, %v4044_v42  ;;  %v4399_v2 = vsel %vm2023_vm1, %v4397_v24, %v4398_v8  ;;  %v4064_v18 = vor.u32 %v4062_v48, %v4052_v38  ;;  %v7465_v36 = vld [vmem:[#allocation9 + $0x8b4] ss:$8 sps:$4 sm:$0xff]   ;;  %v7463_v62 = vld [vmem:[#allocation9 + $0x8b0] ss:$8 sps:$4 sm:$0xff]   ;;  %v7469_v40 = vld [vmem:[#allocation9 + $0x8a4] ss:$8 sps:$4 sm:$0xff]  }
 0x498   :  { %4596 = vmatprep.subr.bf16.mxu0 %v7445_v41  ;;  %6693 = vmatpush3.bf16.msra.mxu1 %v7450_v23  ;;  %v4056_v43 = vor.u32 %v4054_v4, %v4044_v42  ;;  %v7467_v41 = vld [vmem:[#allocation9 + $0x8a0] ss:$8 sps:$4 sm:$0xff]   ;;  %v7473_v38 = vld [vmem:[#allocation9 + $0x894] ss:$8 sps:$4 sm:$0xff]   ;;  %v7471_v23 = vld [vmem:[#allocation9 + $0x890] ss:$8 sps:$4 sm:$0xff]  }
 0x499   :  { %6694 = vmatprep.subr.bf16.mxu1 %v8750_v15  ;;  %v4791_v21 = vld [vmem:[#allocation3 + $0x8] sm:$0xff]  ;;  %v4790_v39 = vld [vmem:[#allocation3] sm:$0xff]  ;;  %v4343_v33 = vld [vmem:[#allocation2] sm:$0xfc]  ;;  %v4406_v24 = vrot.slane %v8340_v1, 1 }
 0x49a   :  { %v3959_v9 = vld [vmem:[#allocation2 + $0x80] sm:$0x3]  ;;  %v7470_v0 = vld [vmem:[#allocation10 + $0x78] sm:$0xff]   ;;  %v4795_v57 = vpack.c.bf16 %v4791_v21, %v4790_v39  ;;  %v7474_v42 = vld [vmem:[#allocation10 + $0x70] sm:$0xff]  }
 0x49b   :  { %v3658_v5 = vld [vmem:[#allocation2 + $0x80] sm:$0x1]  ;;  %v3963_v10 = vpack.c.bf16 %v3959_v9, %v3959_v9  ;;  %v3659_v31 = vld [vmem:[#allocation2 + $0x88] sm:$0x1]  ;;  %4597 = vmatpush1.bf16.msra.mxu0 %v7443_v47  ;;  %v7477_v47 = vld [vmem:[#allocation9 + $0x884] ss:$8 sps:$4 sm:$0xff]   ;;  %v4347_v9 = vpack.c.bf16 %v8264_v53, %v4343_v33 }
 0x49c   :  { %v3960_v54 = vld [vmem:[#allocation2 + $0x88] sm:$0x3]  ;;  %v3669_v32 = vpack.c.bf16 %v3659_v31, %v3659_v31  ;;  %4598 = vmatprep.subr.bf16.mxu0 %v7449_v29  ;;  %v3668_v60 = vpack.c.bf16 %v3658_v5, %v3658_v5  ;;  %6695 = vmatpush3.bf16.msra.mxu1 %v7454_v27  ;;  %v7475_v29 = vld [vmem:[#allocation9 + $0x880] ss:$8 sps:$4 sm:$0xff]   ;;  %v4402_v31 = vrot.slane %v8325_v30, 1  ;;  %v5060_v39 = vld [vmem:[#allocation3 + $0x1a] sm:$0xff] }
 0x49d   :  { %v3964_v58 = vpack.c.bf16 %v3960_v54, %v3960_v54  ;;  %v4058_v25 = vshll.u32 %v3963_v10, 16  ;;  %4297 = vmatmul.mubr.bf16.gmra.mxu1 %v4045_v52  ;;  %6696 = vmatprep.subr.bf16.mxu1 %v8750_v15  ;;  %v4070_v20 = vshrl.u32 %v3963_v10, 16  ;;  %v4793_v59 = vld [vmem:[#allocation3 + $0x18] sm:$0xff]  ;;  %v4792_v61 = vld [vmem:[#allocation3 + $0x10] sm:$0xff]  ;;  %v4395_v10 = vrot.slane %v8292_v49, 1  ;;  %v7480_v52 = vld [vmem:[#allocation10 + $0x60] sm:$0xff]  }
 0x49e   :  { %3948 = vmatprep.mubr.bf16.mxu0 %v3669_v32  ;;  %v7478_v5 = vld [vmem:[#allocation10 + $0x68] sm:$0xff]   ;;  %v4796_v27 = vpack.c.bf16 %v4793_v59, %v4792_v61  ;;  %v4394_v54 = vrot.slane %v4347_v9, 1  ;;  %v7479_v32 = vld [vmem:[#allocation10 + $0xb8] sm:$0xff]   ;;  %v4403_v49 = vsel %vm2023_vm1, %v4398_v8, %v4402_v31  ;;  %v4346_v8 = vld [vmem:[#allocation2 + $0x88] sm:$0x7] }
 0x49f   :  { %v4066_v3 = vshll.u32 %v3964_v58, 16  ;;  %3949 = vmatmul.mubr.bf16.gmra.mxu0 %v3668_v60  ;;  %v4060_v55 = vrot.slane %v4058_v25, 1  ;;  %v4072_v63 = vshrl.u32 %v3964_v58, 16  ;;  %v4794_v30 = vld [vmem:[#allocation3 + $0x20] sm:$0x1]  ;;  %v4400_v25 = vrot.slane %v8319_v45, 1 }
 0x4a0   :  { %4599 = vmatpush2.bf16.msra.mxu0 %v7447_v56  ;;  %4614 = vmatprep.mubr.bf16.mxu0 %v4399_v2  ;;  %v4396_v53 = vsel %vm2023_vm1, %v4394_v54, %v4395_v10  ;;  %v7482_v56 = vld [vmem:[#allocation10 + $0xb0] sm:$0xff]   ;;  %v7481_v58 = vld [vmem:[#allocation10 + $0x58] sm:$0xff]   ;;  %v4797_v60 = vpack.c.bf16 %v4794_v30, %v4794_v30  ;;  %v4407_v45 = vsel %vm2023_vm1, %v4402_v31, %v4406_v24  ;;  %v7486_v1 = vld [vmem:[#allocation10 + $0xa0] sm:$0xff]   ;;  %v4404_v2 = vrot.slane %v8344_v46, 1 }
 0x4a1   :  { %v4068_v6 = vrot.slane %v4066_v3, 1  ;;  %4600 = vmatprep.subr.bf16.mxu0 %v7453_v37  ;;  %6697 = vmatpush3.bf16.msra.mxu1 %v7458_v50  ;;  %v4061_v51 = vsel %vm1626_vm0, %v4056_v43, %v4060_v55  ;;  %v4401_v37 = vsel %vm2023_vm1, %v4395_v10, %v4400_v25  ;;  %v7483_v48 = vld [vmem:[#allocation10 + $0x50] sm:$0xff]   ;;  %v4350_v3 = vpack.c.bf16 %v4346_v8, %v4346_v8  ;;  %v7485_v50 = vld [vmem:[#allocation10 + $0x48] sm:$0xff]   ;;  %v7487_v55 = vld [vmem:[#allocation10 + $0x40] sm:$0xff]  }
 0x4a2   :  { %6698 = vmatprep.subr.bf16.mxu1 %v8750_v15  ;;  %v4405_v4 = vsel %vm2023_vm1, %v4400_v25, %v4404_v2  ;;  %v4924_v46 = vld [vmem:[#allocation3 + $0x9] sm:$0xff]  ;;  %v7489_v43 = vld [vmem:[#allocation10 + $0x90] sm:$0xff]   ;;  %v7492_v33 = vld [vmem:[#allocation10 + $0xf8] sm:$0xff]  }
 0x4a3   :  { %v4069_v28 = vsel %vm1626_vm0, %v4064_v18, %v4068_v6  ;;  %v4410_v18 = vrot.slane %v4350_v3, 1  ;;  %v4345_v6 = vld [vmem:[#allocation2 + $0x80] sm:$0x7]  ;;  %v7495_v59 = vld [vmem:[#allocation10 + $0x130] sm:$0xff]   ;;  %v7499_v10 = vld [vmem:[#allocation10 + $0x120] sm:$0xff]  }
 0x4a4   :  { %4306 = vmatprep.mubr.bf16.mxu1 %v4069_v28  ;;  %4601 = vmatpush2.bf16.msra.mxu0 %v7451_v7  ;;  %v7488_v7 = vld [vmem:[#allocation10 + $0x98] sm:$0xff]   ;;  %v7496_v9 = vld [vmem:[#allocation10 + $0xe8] sm:$0xff]   ;;  %v7502_v54 = vld [vmem:[#allocation10 + $0xd0] sm:$0xff]  }
 0x4a5   :  { %4307 = vmatmul.mubr.bf16.gmra.mxu1 %v4061_v51  ;;  %4602 = vmatprep.subr.bf16.mxu0 %v7457_v12  ;;  %v4349_v12 = vpack.c.bf16 %v4345_v6, %v4345_v6  ;;  %v4411_v28 = vsel %vm2023_vm1, %v4406_v24, %v4410_v18  ;;  %v7497_v61 = vld [vmem:[#allocation10 + $0x128] sm:$0xff]   ;;  %v7501_v31 = vld [vmem:[#allocation10 + $0x118] sm:$0xff]   ;;  %v7506_v30 = vld [vmem:[#allocation10 + $0xc0] sm:$0xff]  }
 0x4a6   :  { %4316 = vmatprep.mubr.bf16.mxu1 %v4072_v63  ;;  %6699 = vmatpush3.bf16.msra.mxu1 %v7462_v19  ;;  %v4923_v19 = vld [vmem:[#allocation3 + $0x1] sm:$0xff] }
 0x4a7   :  { %6700 = vmatprep.subr.bf16.mxu1 %v8750_v15  ;;  %v4408_v51 = vrot.slane %v4349_v12, 1  ;;  %v4928_v63 = vpack.c.bf16 %v4924_v46, %v4923_v19 }
 0x4a8   :  { %4603 = vmatpush2.bf16.msra.mxu0 %v7455_v17  ;;  %v7490_v17 = vld [vmem:[#allocation10 + $0x88] sm:$0xff]  }
 0x4a9   :  { %4604 = vmatprep.subr.bf16.mxu0 %v7461_v22  ;;  %v4409_v22 = vsel %vm2023_vm1, %v4404_v2, %v4408_v51 }
 0x4aa   :  { %6701 = vmatpush3.bf16.msra.mxu1 %v7466_v34  ;;  %v4926_v34 = vld [vmem:[#allocation3 + $0x19] sm:$0xff] }
 0x4ab   :  { %6714 = vmatprep.subr.bf16.mxu1 %v8750_v15 }
 0x4ac   :  { %4605 = vmatpush2.bf16.msra.mxu0 %v7459_v16  ;;  %v7491_v16 = vld [vmem:[#allocation10 + $0x80] sm:$0xff]  }
 0x4ad   :  { %4317 = vmatmul.mubr.bf16.gmra.mxu1 %v4070_v20  ;;  %4606 = vmatprep.subr.bf16.mxu0 %v7465_v36  ;;  %v4925_v36 = vld [vmem:[#allocation3 + $0x11] sm:$0xff] }
 0x4ae   :  { %6702 = vmatprep.mubr.msk.bf16.mxu1 %vm7741_vm14, %v8750_v15  ;;  %v4929_v20 = vpack.c.bf16 %v4926_v34, %v4925_v36 }
 0x4b0   :  { %4607 = vmatpush2.bf16.msra.mxu0 %v7463_v62  ;;  %v4927_v62 = vld [vmem:[#allocation3 + $0x21] sm:$0x1] }
 0x4b1   :  { %4608 = vmatprep.subr.bf16.mxu0 %v7469_v40  ;;  %v5057_v40 = vld [vmem:[#allocation3 + $0x2] sm:$0xff]  ;;  %v4930_v21 = vpack.c.bf16 %v4927_v62, %v4927_v62 }
 0x4b4   :  { %4609 = vmatpush2.bf16.msra.mxu0 %v7467_v41  ;;  %v5058_v41 = vld [vmem:[#allocation3 + $0xa] sm:$0xff] }
 0x4b5   :  { %6703 = vmatmul.mubr.bf16.vlgmr.msra.gmra.mxu1 %v4795_v57  ;;  %4610 = vmatprep.subr.bf16.mxu0 %v7473_v38  ;;  %v5062_v38 = vpack.c.bf16 %v5058_v41, %v5057_v40 }
 0x4b6   :  { %6715 = vmatpush3.bf16.msra.mxu1 %v7470_v0  ;;  %6706 = vmatprep.mubr.msk.bf16.mxu1 %vm7741_vm14, %v8750_v15  ;;  %v5059_v0 = vld [vmem:[#allocation3 + $0x12] sm:$0xff] }
 0x4b7   :  { %6716 = vmatprep.subr.bf16.mxu1 %v8750_v15  ;;  %v5063_v57 = vpack.c.bf16 %v5060_v39, %v5059_v0 }
 0x4b8   :  { %4611 = vmatpush2.bf16.msra.mxu0 %v7471_v23  ;;  %v5061_v23 = vld [vmem:[#allocation3 + $0x22] sm:$0x1] }
 0x4b9   :  { %4612 = vmatprep.subr.bf16.mxu0 %v7477_v47  ;;  %v5064_v47 = vpack.c.bf16 %v5061_v23, %v5061_v23  ;;  %v3704_v23 = vld [vmem:[#allocation15 + $0x2] ss:$4 sm:$0x3] }
 0x4ba   :  { %6717 = vmatpush3.bf16.msra.mxu1 %v7474_v42  ;;  %v7493_v42 = vld [vmem:[#allocation10 + $0x138] sm:$0xff]  }
 0x4bb   :  { %6718 = vmatprep.subr.bf16.mxu1 %v8750_v15 }
 0x4bc   :  { %4613 = vmatpush2.bf16.msra.mxu0 %v7475_v29  ;;  %v7494_v29 = vld [vmem:[#allocation10 + $0xf0] sm:$0xff]  }
 0x4bd   :  { %6707 = vmatmul.mubr.bf16.gmra.mxu1 %v4796_v27  ;;  %6742 = vmatprep.subr.bf16.mxu0 %v8750_v15  ;;  %v7500_v27 = vld [vmem:[#allocation10 + $0xd8] sm:$0xff]  }
 0x4be   :  { %6719 = vmatpush3.bf16.msra.mxu1 %v7478_v5  ;;  %6710 = vmatprep.mubr.msk.bf16.mxu1 %vm7741_vm14, %v8750_v15  ;;  %v7498_v5 = vld [vmem:[#allocation10 + $0xe0] sm:$0xff]  }
 0x4bf   :  { %4615 = vmatmul.mubr.bf16.vlgmr.msra.gmra.mxu0 %v4396_v53  ;;  %6720 = vmatprep.subr.bf16.mxu1 %v8750_v15  ;;  %v7504_v53 = vld [vmem:[#allocation10 + $0xc8] sm:$0xff]  }
 0x4c0   :  { %4624 = vmatprep.mubr.bf16.mxu0 %v4403_v49  ;;  %6743 = vmatpush3.bf16.msra.mxu0 %v7479_v32  ;;  %v7503_v32 = vld [vmem:[#allocation10 + $0x110] sm:$0xff]  }
 0x4c1   :  { %6744 = vmatprep.subr.bf16.mxu0 %v8750_v15 }
 0x4c2   :  { %6721 = vmatpush3.bf16.msra.mxu1 %v7480_v52  ;;  %v7505_v52 = vld [vmem:[#allocation10 + $0x108] sm:$0xff]  }
 0x4c3   :  { %6722 = vmatprep.subr.bf16.mxu1 %v8750_v15 }
 0x4c4   :  { %6745 = vmatpush3.bf16.msra.mxu0 %v7482_v56  ;;  %v7507_v56 = vld [vmem:[#allocation10 + $0x100] sm:$0xff]  }
 0x4c5   :  { %6711 = vmatmul.mubr.bf16.gmra.mxu1 %v4797_v60  ;;  %6746 = vmatprep.subr.bf16.mxu0 %v8750_v15 }
 0x4c6   :  { %6723 = vmatpush3.bf16.msra.mxu1 %v7481_v58  ;;  %6730 = vmatprep.mubr.msk.bf16.mxu1 %vm7741_vm14, %v8750_v15 }
 0x4c7   :  { %4625 = vmatmul.mubr.bf16.gmra.mxu0 %v4401_v37  ;;  %6724 = vmatprep.subr.bf16.mxu1 %v8750_v15 }
 0x4c8   :  { %4634 = vmatprep.mubr.bf16.mxu0 %v4407_v45  ;;  %6747 = vmatpush3.bf16.msra.mxu0 %v7484_v13 }
 0x4c9   :  { %6748 = vmatprep.subr.bf16.mxu0 %v8750_v15 }
 0x4ca   :  { %6725 = vmatpush3.bf16.msra.mxu1 %v7483_v48 }
 0x4cb   :  { %6726 = vmatprep.subr.bf16.mxu1 %v8750_v15 }
 0x4cc   :  { %6749 = vmatpush3.bf16.msra.mxu0 %v7486_v1 }
 0x4cd   :  { %6750 = vmatprep.subr.bf16.mxu0 %v8750_v15 }
 0x4ce   :  { %6727 = vmatpush3.bf16.msra.mxu1 %v7485_v50 }
 0x4cf   :  { %4635 = vmatmul.mubr.bf16.gmra.mxu0 %v4405_v4  ;;  %6728 = vmatprep.subr.bf16.mxu1 %v8750_v15 }
 0x4d0   :  { %4644 = vmatprep.mubr.bf16.mxu0 %v4411_v28  ;;  %6751 = vmatpush3.bf16.msra.mxu0 %v7488_v7 }
 0x4d1   :  { %6752 = vmatprep.subr.bf16.mxu0 %v8750_v15 }
 0x4d2   :  { %6729 = vmatpush3.bf16.msra.mxu1 %v7487_v55 }
 0x4d3   :  { %6770 = vmatprep.subr.bf16.mxu1 %v8750_v15 }
 0x4d4   :  { %6753 = vmatpush3.bf16.msra.mxu0 %v7489_v43 }
 0x4d5   :  { %6731 = vmatmul.mubr.bf16.vlgmr.msra.gmra.mxu1 %v4928_v63  ;;  %6754 = vmatprep.subr.bf16.mxu0 %v8750_v15 }
 0x4d6   :  { %6734 = vmatprep.mubr.msk.bf16.mxu1 %vm7741_vm14, %v8750_v15  ;;  %6771 = vmatpush3.bf16.msra.mxu1 %v7492_v33 }
 0x4d7   :  { %4645 = vmatmul.mubr.bf16.gmra.mxu0 %v4409_v22  ;;  %6772 = vmatprep.subr.bf16.mxu1 %v8750_v15 }
 0x4d8   :  { %4654 = vmatprep.mubr.bf16.mxu0 %v4410_v18  ;;  %6755 = vmatpush3.bf16.msra.mxu0 %v7490_v17 }
 0x4d9   :  { %6756 = vmatprep.subr.bf16.mxu0 %v8750_v15 }
 0x4da   :  { %6773 = vmatpush3.bf16.msra.mxu1 %v7494_v29 }
 0x4db   :  { %6774 = vmatprep.subr.bf16.mxu1 %v8750_v15 }
 0x4dc   :  { %6757 = vmatpush3.bf16.msra.mxu0 %v7491_v16 }
 0x4dd   :  { %6735 = vmatmul.mubr.bf16.gmra.mxu1 %v4929_v20  ;;  %6798 = vmatprep.subr.bf16.mxu0 %v8750_v15 }
 0x4de   :  { %6738 = vmatprep.mubr.msk.bf16.mxu1 %vm7741_vm14, %v8750_v15  ;;  %6775 = vmatpush3.bf16.msra.mxu1 %v7496_v9 }
 0x4df   :  { %4655 = vmatmul.mubr.bf16.gmra.mxu0 %v4408_v51  ;;  %6776 = vmatprep.subr.bf16.mxu1 %v8750_v15 }
 0x4e0   :  { %6758 = vmatprep.mubr.msk.bf16.mxu0 %vm7741_vm14, %v8750_v15 }
 0x4e2   :  { %6777 = vmatpush3.bf16.msra.mxu1 %v7498_v5 }
 0x4e3   :  { %6778 = vmatprep.subr.bf16.mxu1 %v8750_v15 }
 0x4e5   :  { %6739 = vmatmul.mubr.bf16.gmra.mxu1 %v4930_v21 }
 0x4e6   :  { %6786 = vmatprep.mubr.msk.bf16.mxu1 %vm7741_vm14, %v8750_v15  ;;  %6779 = vmatpush3.bf16.msra.mxu1 %v7500_v27 }
 0x4e7   :  { %6759 = vmatmul.mubr.bf16.vlgmr.msra.gmra.mxu0 %v5062_v38  ;;  %6780 = vmatprep.subr.bf16.mxu1 %v8750_v15 }
 0x4e8   :  { %6762 = vmatprep.mubr.msk.bf16.mxu0 %vm7741_vm14, %v8750_v15  ;;  %6799 = vmatpush3.bf16.msra.mxu0 %v7493_v42  ;;  %v8497_v42 = vrot.slane %v3704_v23, %v7852_v11 }
 0x4e9   :  { %6800 = vmatprep.subr.bf16.mxu0 %v8750_v15 }
 0x4ea   :  { %6781 = vmatpush3.bf16.msra.mxu1 %v7502_v54  ;;  %v8508_v54 = vstv %s6452_s14 }
 0x4eb   :  { %6782 = vmatprep.subr.bf16.mxu1 %v8750_v15 }
 0x4ec   :  { %6801 = vmatpush3.bf16.msra.mxu0 %v7495_v59  ;;  %v8502_v59 = vrot.slane %v3704_v23, %v7856_v14 }
 0x4ed   :  { %6802 = vmatprep.subr.bf16.mxu0 %v8750_v15 }
 0x4ee   :  { %6783 = vmatpush3.bf16.msra.mxu1 %v7504_v53 }
 0x4ef   :  { %6763 = vmatmul.mubr.bf16.gmra.mxu0 %v5063_v57  ;;  %6784 = vmatprep.subr.bf16.mxu1 %v8750_v15 }
 0x4f0   :  { %6766 = vmatprep.mubr.msk.bf16.mxu0 %vm7741_vm14, %v8750_v15  ;;  %6803 = vmatpush3.bf16.msra.mxu0 %v7497_v61 }
 0x4f1   :  { %6804 = vmatprep.subr.bf16.mxu0 %v8750_v15 }
 0x4f2   :  { %6785 = vmatpush3.bf16.msra.mxu1 %v7506_v30 }
 0x4f3   :  { %6826 = vmatprep.subr.bf16.mxu1 %v8750_v15 }
 0x4f4   :  { %6805 = vmatpush3.bf16.msra.mxu0 %v7499_v10 }
 0x4f5   :  { %6806 = vmatprep.subr.bf16.mxu0 %v8750_v15 }
 0x4f7   :  { %6767 = vmatmul.mubr.bf16.gmra.mxu0 %v5064_v47 }
 0x4f8   :  { %6814 = vmatprep.mubr.msk.bf16.mxu0 %vm7741_vm14, %v8750_v15  ;;  %6807 = vmatpush3.bf16.msra.mxu0 %v7501_v31 }
 0x4f9   :  { %6808 = vmatprep.subr.bf16.mxu0 %v8750_v15 }
 0x4fc   :  { %6809 = vmatpush3.bf16.msra.mxu0 %v7503_v32 }
 0x4fd   :  { %6810 = vmatprep.subr.bf16.mxu0 %v8750_v15 }
 0x500   :  { %6811 = vmatpush3.bf16.msra.mxu0 %v7505_v52 }
 0x501   :  { %6812 = vmatprep.subr.bf16.mxu0 %v8750_v15 }
 0x504   :  { %6813 = vmatpush3.bf16.msra.mxu0 %v7507_v56 }
 0x505   :  { %6854 = vmatprep.subr.bf16.mxu0 %v8750_v15 }
 0x53e   :  { %v3910_v49 = vpop.f32.mrf.mxu0 }
 0x53f   :  { %v3911_v61 = vadd.f32 %v3910_v49, %v8497_v42 }
 0x540   :  { %v3912_v58 = vpop.f32.mrf.mxu0 }
 0x541   :  { %v3913_v10 = vadd.f32 %v3912_v58, %v8502_v59 }
 0x542   :  { %v3914_v25 = vpop.f32.mrf.mxu0 }
 0x543   :  { %v3915_v11 = vadd.f32 %v3914_v25, %v8497_v42 }
 0x544   :  { %v3916_v60 = vpop.f32.mrf.mxu0 }
 0x545   :  { %v3917_v30 = vadd.f32 %v3916_v60, %v8502_v59 }
 0x546   :  { %v3920_v24 = vpop.f32.mrf.mxu0 }
 0x547   :  { %v3921_v58 = vadd.f32 %v3920_v24, %v8497_v42 }
 0x548   :  { %v8442_v13 = vpop.f32.mrf.mxu0 }
 0x549   :  { %v3923_v60 = vadd.f32 %v8442_v13, %v8502_v59 }
 0x54a   :  { %v8444_v8 = vpop.f32.mrf.mxu0  ;;  %v4278_v37 = vpop.f32.mrf.mxu1 }
 0x54b   :  { %v4325_v27 = vadd.f32 %v4278_v37, %v3911_v61 }
 0x54c   :  { %v8446_v48 = vpop.f32.mrf.mxu0  ;;  %v4280_v45 = vpop.f32.mrf.mxu1 }
 0x54d   :  { %v4326_v53 = vadd.f32 %v4280_v45, %v3913_v10  ;;  %v3925_v10 = vadd.f32 %v8444_v8, %v8497_v42 }
 0x54e   :  { %v8448_v3 = vpop.f32.mrf.mxu0  ;;  %v4282_v1 = vpop.f32.mrf.mxu1 }
 0x550   :  { %v8450_v50 = vpop.f32.mrf.mxu0  ;;  %v4284_v18 = vpop.f32.mrf.mxu1 }
 0x551   :  { %v4328_v37 = vadd.f32 %v4284_v18, %v3917_v30 }
 0x552   :  { %v8452_v2 = vpop.f32.mrf.mxu0 }
 0x554   :  { %v8454_v6 = vpop.f32.mrf.mxu0 }
 0x555   :  { %v4288_v7 = vpop.f32.mrf.mxu1 }
 0x556   :  { %v8456_v4 = vpop.f32.mrf.mxu0 }
 0x557   :  { %v8458_v55 = vpop.f32.mrf.mxu1 }
 0x558   :  { %v8460_v12 = vpop.f32.mrf.mxu0 }
 0x559   :  { %v8462_v28 = vpop.f32.mrf.mxu1 }
 0x55a   :  { %v8464_v46 = vpop.f32.mrf.mxu0 }
 0x55b   :  { %v8466_v43 = vpop.f32.mrf.mxu1 }
 0x55c   :  { %v8468_v19 = vpop.f32.mrf.mxu0 }
 0x55d   :  { %v8470_v51 = vpop.f32.mrf.mxu1 }
 0x55f   :  { %v8472_v63 = vpop.f32.mrf.mxu1  ;;  %v8474_v17 = vpop.f32.mrf.mxu0 }
 0x561   :  { %v8476_v22 = vpop.f32.mrf.mxu1  ;;  %v8478_v34 = vpop.f32.mrf.mxu0 }
 0x563   :  { %v8480_v16 = vpop.f32.mrf.mxu1  ;;  %v3954_v36 = vpop.f32.mrf.mxu0 }
 0x564   :  { %v4327_v36 = vadd.f32 %v4282_v1, %v3915_v11 }
 0x565   :  { %v8482_v20 = vpop.f32.mrf.mxu1  ;;  %v3955_v62 = vpop.f32.mrf.mxu0 }
 0x567   :  { %v8484_v40 = vpop.f32.mrf.mxu1 }
 0x569   :  { %v8486_v41 = vpop.f32.mrf.mxu1 }
 0x56b   :  { %v8488_v21 = vpop.f32.mrf.mxu1 }
 0x56d   :  { %v8490_v38 = vpop.f32.mrf.mxu1 }
 0x56f   :  { %v8492_v39 = vpop.f32.mrf.mxu1 }
 0x571   :  { %v4322_v0 = vpop.f32.mrf.mxu1 }
 0x573   :  { %v4323_v57 = vpop.f32.mrf.mxu1 }
 0x575   :  { %v8494_v47 = vpop.f32.mrf.mxu1 }
 0x577   :  { %v6704_v33 = vpop.f32.mrf.mxu1 }
 0x578   :  { %v4329_v33 = vadd.f32 %v4288_v7, %v3921_v58 }
 0x579   :  { %v8499_v29 = vpop.f32.mrf.mxu1 }
 0x57b   :  { %v6705_v9 = vpop.f32.mrf.mxu1 }
 0x57d   :  { %v8505_v5 = vpop.f32.mrf.mxu1 }
 0x57f   :  { %v4616_v31 = vpop.f32.mrf.mxu0  ;;  %v6708_v32 = vpop.f32.mrf.mxu1 }
 0x580   :  { %v4663_v52 = vadd.f32 %v4616_v31, %v4325_v27  ;;  %v4330_v27 = vadd.f32 %v8458_v55, %v3923_v60  ;;  %v3935_v60 = vadd.f32 %v8452_v2, %v8497_v42 }
 0x581   :  { %v4618_v14 = vpop.f32.mrf.mxu0  ;;  %v8512_v56 = vpop.f32.mrf.mxu1 }
 0x582   :  { %vm4682_vm0 = vcmp.ge.f32.partialorder %v4663_v52, 0.0  ;;  %v4701_v49 = vmul.f32 %v8508_v54, %v4663_v52  ;;  %v4664_v62 = vadd.f32 %v4618_v14, %v4326_v53  ;;  %v3927_v53 = vadd.f32 %v8446_v48, %v8502_v59 }
 0x583   :  { %v4620_v0 = vpop.f32.mrf.mxu0  ;;  %v6709_v57 = vpop.f32.mrf.mxu1 }
 0x584   :  { %v4719_v23 = vsel %vm4682_vm0, %v4663_v52, %v4701_v49  ;;  %vm4683_vm12 = vcmp.ge.f32.partialorder %v4664_v62, 0.0  ;;  %v4702_v25 = vmul.f32 %v8508_v54, %v4664_v62  ;;  %v4665_v45 = vadd.f32 %v4620_v0, %v4327_v36 }
 0x585   :  { %4737 = vst [vmem:[%s8744_s10] sm:$0xff] %v4719_v23  ;;  %v4622_v1 = vpop.f32.mrf.mxu0  ;;  %v8522_v9 = vpop.f32.mrf.mxu1  ;;  %v4331_v52 = vadd.f32 %v8462_v28, %v3925_v10  ;;  %v3931_v49 = vadd.f32 %v8448_v3, %v8497_v42  ;;  %v3933_v57 = vadd.f32 %v8450_v50, %v8502_v59 }
 0x586   :  { %v4720_v24 = vsel %vm4683_vm12, %v4664_v62, %v4702_v25  ;;  %vm4684_vm13 = vcmp.ge.f32.partialorder %v4665_v45, 0.0  ;;  %v4703_v18 = vmul.f32 %v8508_v54, %v4665_v45  ;;  %v4666_v61 = vadd.f32 %v4622_v1, %v4328_v37 }
 0x587   :  { %4738 = vst [vmem:[%s8744_s10 + $0x8] sm:$0xff] %v4720_v24  ;;  %v4626_v13 = vpop.f32.mrf.mxu0  ;;  %v6712_v7 = vpop.f32.mrf.mxu1  ;;  %v4332_v62 = vadd.f32 %v8466_v43, %v3927_v53  ;;  %v4333_v23 = vadd.f32 %v8470_v51, %v3931_v49 }
 0x588   :  { %v4721_v31 = vsel %vm4684_vm13, %v4665_v45, %v4703_v18  ;;  %vm4685_vm15 = vcmp.ge.f32.partialorder %v4666_v61, 0.0  ;;  %v4704_v32 = vmul.f32 %v8508_v54, %v4666_v61  ;;  %v4667_v11 = vadd.f32 %v4626_v13, %v4329_v33 }
 0x589   :  { %4739 = vst [vmem:[%s8744_s10 + $0x10] sm:$0xff] %v4721_v31  ;;  %v4628_v8 = vpop.f32.mrf.mxu0  ;;  %v4920_v55 = vpop.f32.mrf.mxu1  ;;  %v4334_v33 = vadd.f32 %v8472_v63, %v3933_v57  ;;  %v3941_v7 = vadd.f32 %v8456_v4, %v8497_v42  ;;  %v3945_v4 = vadd.f32 %v8464_v46, %v8497_v42 }
 0x58a   :  { %v4722_v30 = vsel %vm4685_vm15, %v4666_v61, %v4704_v32  ;;  %vm4686_vm2 = vcmp.ge.f32.partialorder %v4667_v11, 0.0  ;;  %v4705_v14 = vmul.f32 %v8508_v54, %v4667_v11  ;;  %v4668_v36 = vadd.f32 %v4628_v8, %v4330_v27 }
 0x58b   :  { %4740 = vst [vmem:[%s8744_s10 + $0x18] sm:$0xff] %v4722_v30  ;;  %v4630_v48 = vpop.f32.mrf.mxu0  ;;  %v6713_v28 = vpop.f32.mrf.mxu1  ;;  %v4335_v61 = vadd.f32 %v8476_v22, %v3935_v60  ;;  %v3937_v27 = vadd.f32 %v8454_v6, %v8502_v59  ;;  %v3943_v22 = vadd.f32 %v8460_v12, %v8502_v59  ;;  %v3947_v30 = vadd.f32 %v8468_v19, %v8502_v59 }
 0x58c   :  { %v4723_v58 = vsel %vm4686_vm2, %v4667_v11, %v4705_v14  ;;  %vm4687_vm3 = vcmp.ge.f32.partialorder %v4668_v36, 0.0  ;;  %v4706_v37 = vmul.f32 %v8508_v54, %v4668_v36  ;;  %v4669_v0 = vadd.f32 %v4630_v48, %v4331_v52 }
 0x58d   :  { %4741 = vst [vmem:[%s8744_s10 + $0x20] sm:$0xff] %v4723_v58  ;;  %v4632_v3 = vpop.f32.mrf.mxu0  ;;  %v4336_v11 = vadd.f32 %v8480_v16, %v3937_v27  ;;  %v4337_v52 = vadd.f32 %v8482_v20, %v3941_v7  ;;  %v3951_v12 = vadd.f32 %v8474_v17, %v8497_v42  ;;  %v4338_v49 = vadd.f32 %v8484_v40, %v3943_v22 }
 0x58e   :  { %v4724_v43 = vsel %vm4687_vm3, %v4668_v36, %v4706_v37  ;;  %vm4688_vm4 = vcmp.ge.f32.partialorder %v4669_v0, 0.0  ;;  %v4707_v25 = vmul.f32 %v8508_v54, %v4669_v0  ;;  %v4670_v45 = vadd.f32 %v4632_v3, %v4332_v62 }
 0x58f   :  { %4742 = vst [vmem:[%s8744_s10 + $0x28] sm:$0xff] %v4724_v43  ;;  %v4636_v50 = vpop.f32.mrf.mxu0  ;;  %v4339_v19 = vadd.f32 %v8486_v41, %v3945_v4  ;;  %v4340_v57 = vadd.f32 %v8488_v21, %v3947_v30 }
 0x590   :  { %v4725_v51 = vsel %vm4688_vm4, %v4669_v0, %v4707_v25  ;;  %vm4689_vm5 = vcmp.ge.f32.partialorder %v4670_v45, 0.0  ;;  %v4708_v1 = vmul.f32 %v8508_v54, %v4670_v45  ;;  %v4671_v24 = vadd.f32 %v4636_v50, %v4333_v23 }
 0x591   :  { %4743 = vst [vmem:[%s8744_s10 + $0x30] sm:$0xff] %v4725_v51  ;;  %v4638_v18 = vpop.f32.mrf.mxu0 }
 0x592   :  { %v4726_v2 = vsel %vm4689_vm5, %v4670_v45, %v4708_v1  ;;  %v4709_v63 = vmul.f32 %v8508_v54, %v4671_v24  ;;  %v4672_v10 = vadd.f32 %v4638_v18, %v4334_v33  ;;  %vm4690_vm6 = vcmp.ge.f32.partialorder %v4671_v24, 0.0 }
 0x593   :  { %4744 = vst [vmem:[%s8744_s10 + $0x38] sm:$0xff] %v4726_v2  ;;  %v4640_v13 = vpop.f32.mrf.mxu0  ;;  %v3953_v33 = vadd.f32 %v8478_v34, %v8502_v59 }
 0x594   :  { %v4710_v31 = vmul.f32 %v8508_v54, %v4672_v10  ;;  %v4673_v32 = vadd.f32 %v4640_v13, %v4335_v61  ;;  %vm4691_vm7 = vcmp.ge.f32.partialorder %v4672_v10, 0.0  ;;  %v4727_v8 = vsel %vm4690_vm6, %v4671_v24, %v4709_v63 }
 0x595   :  { %v8576_v53 = vpop.f32.mrf.mxu1  ;;  %v4642_v6 = vpop.f32.mrf.mxu0  ;;  %v4756_v28 = vrot.slane %v4727_v8, 1  ;;  %v4341_v24 = vadd.f32 %v8490_v38, %v3951_v12  ;;  %v4342_v7 = vadd.f32 %v8492_v39, %v3953_v33 }
 0x596   :  { %vm4692_vm8 = vcmp.ge.f32.partialorder %v4673_v32, 0.0  ;;  %v4711_v55 = vmul.f32 %v8508_v54, %v4673_v32  ;;  %v4674_v16 = vadd.f32 %v4642_v6, %v4336_v11  ;;  %v4728_v62 = vsel %vm4691_vm7, %v4672_v10, %v4710_v31  ;;  %v8616_v31 = vld [vmem:[#allocation16] ss:$0 sm:$0xff] }
 0x597   :  { %v6732_v14 = vpop.f32.mrf.mxu1  ;;  %v4646_v36 = vpop.f32.mrf.mxu0  ;;  %v4759_v40 = vrot.slane %v4728_v62, 1 }
 0x598   :  { %v4729_v20 = vsel %vm4692_vm8, %v4673_v32, %v4711_v55  ;;  %v4675_v48 = vadd.f32 %v4646_v36, %v4337_v52  ;;  %vm4693_vm9 = vcmp.ge.f32.partialorder %v4674_v16, 0.0  ;;  %v4712_v37 = vmul.f32 %v8508_v54, %v4674_v16 }
 0x599   :  { %v4757_v58 = vrot.slane %v4729_v20, 1  ;;  %v8588_v46 = vpop.f32.mrf.mxu1  ;;  %v4648_v0 = vpop.f32.mrf.mxu0 }
 0x59a   :  { %vm4694_vm10 = vcmp.ge.f32.partialorder %v4675_v48, 0.0  ;;  %v4713_v17 = vmul.f32 %v8508_v54, %v4675_v48  ;;  %v4676_v42 = vadd.f32 %v4648_v0, %v4338_v49  ;;  %v4730_v3 = vsel %vm4693_vm9, %v4674_v16, %v4712_v37 }
 0x59b   :  { %v4758_v23 = vsel %vm2023_vm1, %v4756_v28, %v4757_v58  ;;  %v6733_v43 = vpop.f32.mrf.mxu1  ;;  %v4650_v25 = vpop.f32.mrf.mxu0  ;;  %v4760_v45 = vrot.slane %v4730_v3, 1  ;;  %v4902_v16 = vadd.f32 %v8616_v31, %v8494_v47 }
 0x59c   :  { %4782 = vst [vmem:[%s8744_s10 + $0x40] sm:$0xff] %v4758_v23  ;;  %v4731_v60 = vsel %vm4694_vm10, %v4675_v48, %v4713_v17  ;;  %vm4695_vm11 = vcmp.ge.f32.partialorder %v4676_v42, 0.0  ;;  %v4714_v41 = vmul.f32 %v8508_v54, %v4676_v42  ;;  %v4677_v21 = vadd.f32 %v4650_v25, %v4339_v19 }
 0x59d   :  { %v4762_v50 = vrot.slane %v4731_v60, 1  ;;  %v8600_v51 = vpop.f32.mrf.mxu1  ;;  %v4652_v1 = vpop.f32.mrf.mxu0  ;;  %v4761_v18 = vsel %vm2023_vm1, %v4759_v40, %v4760_v45  ;;  %v5197_v17 = vstv %s8609_s1 }
 0x59e   :  { %v4732_v61 = vsel %vm4695_vm11, %v4676_v42, %v4714_v41  ;;  %v4678_v2 = vadd.f32 %v4652_v1, %v4340_v57  ;;  %4783 = vst [vmem:[%s8744_s10 + $0x48] sm:$0xff] %v4761_v18  ;;  %vm4696_vm0 = vcmp.ge.f32.partialorder %v4677_v21, 0.0  ;;  %v4715_v34 = vmul.f32 %v8508_v54, %v4677_v21 }
 0x59f   :  { %v4763_v63 = vsel %vm2023_vm1, %v4757_v58, %v4762_v50  ;;  %v4764_v10 = vrot.slane %v4732_v61, 1  ;;  %v6736_v59 = vpop.f32.mrf.mxu1  ;;  %v4656_v27 = vpop.f32.mrf.mxu0  ;;  %v5052_v58 = vadd.f32 %v8576_v53, %v4902_v16  ;;  %v4905_v42 = vadd.f32 %v8616_v31, %v8499_v29 }
 0x5a0   :  { %4784 = vst [vmem:[%s8744_s10 + $0x50] sm:$0xff] %v4763_v63  ;;  %vm4697_vm12 = vcmp.ge.f32.partialorder %v4678_v2, 0.0  ;;  %v4716_v38 = vmul.f32 %v8508_v54, %v4678_v2  ;;  %v4679_v13 = vadd.f32 %v4656_v27, %v4341_v24  ;;  %v4733_v22 = vsel %vm4696_vm0, %v4677_v21, %v4715_v34 }
 0x5a1   :  { %v4765_v32 = vsel %vm2023_vm1, %v4760_v45, %v4764_v10  ;;  %v5041_v11 = vpop.f32.mrf.mxu1  ;;  %v4658_v6 = vpop.f32.mrf.mxu0  ;;  %v4766_v52 = vrot.slane %v4733_v22, 1  ;;  %v5053_v23 = vadd.f32 %v8588_v46, %v4905_v42  ;;  %v4910_v45 = vadd.f32 %v8616_v31, %v8505_v5 }
 0x5a2   :  { %4785 = vst [vmem:[%s8744_s10 + $0x58] sm:$0xff] %v4765_v32  ;;  %v4734_v8 = vsel %vm4697_vm12, %v4678_v2, %v4716_v38  ;;  %vm4698_vm13 = vcmp.ge.f32.partialorder %v4679_v13, 0.0  ;;  %v4717_v55 = vmul.f32 %v8508_v54, %v4679_v13  ;;  %v4680_v30 = vadd.f32 %v4658_v6, %v4342_v7  ;;  %v7508_v6 = vld [vmem:[#allocation10 + $0x178] sm:$0xff]  }
 0x5a3   :  { %v4768_v4 = vrot.slane %v4734_v8, 1  ;;  %v6737_v12 = vpop.f32.mrf.mxu1  ;;  %v4660_v39 = vpop.f32.mrf.mxu0  ;;  %v4767_v14 = vsel %vm2023_vm1, %v4762_v50, %v4766_v52  ;;  %v5054_v50 = vadd.f32 %v8600_v51, %v4910_v45  ;;  %v4913_v1 = vadd.f32 %v8616_v31, %v8512_v56  ;;  %v7519_v45 = vld [vmem:[#allocation10 + $0x1f0] sm:$0xff]  }
 0x5a4   :  { %v4735_v36 = vsel %vm4698_vm13, %v4679_v13, %v4717_v55  ;;  %4786 = vst [vmem:[%s8744_s10 + $0x60] sm:$0xff] %v4767_v14  ;;  %vm4699_vm15 = vcmp.ge.f32.partialorder %v4680_v30, 0.0  ;;  %v4718_v20 = vmul.f32 %v8508_v54, %v4680_v30  ;;  %v4918_v34 = vadd.f32 %v8616_v31, %v8522_v9 }
 0x5a5   :  { %v4769_v49 = vsel %vm2023_vm1, %v4764_v10, %v4768_v4  ;;  %v4770_v62 = vrot.slane %v4735_v36, 1  ;;  %v5046_v48 = vpop.f32.mrf.mxu1  ;;  %v4661_v28 = vpop.f32.mrf.mxu0  ;;  %v5055_v63 = vadd.f32 %v5041_v11, %v4913_v1  ;;  %v7510_v36 = vld [vmem:[#allocation10 + $0x168] sm:$0xff]   ;;  %v7526_v1 = vld [vmem:[#allocation10 + $0x190] sm:$0xff]  }
 0x5a6   :  { %4787 = vst [vmem:[%s8744_s10 + $0x68] sm:$0xff] %v4769_v49  ;;  %v4736_v37 = vsel %vm4699_vm15, %v4680_v30, %v4718_v20  ;;  %v5056_v27 = vadd.f32 %v5046_v48, %v4918_v34 }
 0x5a7   :  { %v4771_v47 = vsel %vm2023_vm1, %v4766_v52, %v4770_v62  ;;  %v6740_v0 = vpop.f32.mrf.mxu1  ;;  %v5164_v19 = vpop.f32.mrf.mxu0  ;;  %v4772_v54 = vrot.slane %v4736_v37, 1  ;;  %v7511_v62 = vld [vmem:[#allocation10 + $0x160] sm:$0xff]   ;;  %v7513_v37 = vld [vmem:[#allocation10 + $0x150] sm:$0xff]  }
 0x5a8   :  { %4788 = vst [vmem:[%s8744_s10 + $0x70] sm:$0xff] %v4771_v47  ;;  %v5186_v57 = vadd.f32 %v5164_v19, %v5052_v58  ;;  %v7512_v58 = vld [vmem:[#allocation10 + $0x158] sm:$0xff]   ;;  %v7514_v0 = vld [vmem:[#allocation10 + $0x148] sm:$0xff]   ;;  %v7515_v19 = vld [vmem:[#allocation10 + $0x140] sm:$0xff]  }
 0x5a9   :  { %v5049_v53 = vpop.f32.mrf.mxu1  ;;  %v6760_v40 = vpop.f32.mrf.mxu0  ;;  %v4773_v3 = vsel %vm2023_vm1, %v4768_v4, %v4772_v54  ;;  %v7509_v4 = vld [vmem:[#allocation10 + $0x170] sm:$0xff]  }
 0x5aa   :  { %vm5192_vm2 = vcmp.ge.f32.partialorder %v5186_v57, 0.0  ;;  %v5198_v43 = vmul.f32 %v5197_v17, %v5186_v57  ;;  %4789 = vst [vmem:[%s8744_s10 + $0x78] sm:$0xff] %v4773_v3  ;;  %s6504_s10 = sld [smem:[#allocation18 + $0x6]] }
 0x5ab   :  { %v6741_v25 = vpop.f32.mrf.mxu1  ;;  %v5167_v29 = vpop.f32.mrf.mxu0 }
 0x5ac   :  { %v5203_v60 = vsel %vm5192_vm2, %v5186_v57, %v5198_v43  ;;  %v5187_v41 = vadd.f32 %v5167_v29, %v5053_v23  ;;  %v5485_v23 = vld [vmem:[#allocation3 + $0x22] sm:$0x1]  ;;  %v7518_v29 = vld [vmem:[#allocation10 + $0x1b0] sm:$0xff]  }
 0x5ad   :  { %5208 = vst [vmem:[#allocation3 + $0x1] sm:$0xff] %v5203_v60  ;;  %v6761_v33 = vpop.f32.mrf.mxu0  ;;  %v5488_v3 = vpack.c.bf16 %v5485_v23, %v5485_v23  ;;  %v7516_v43 = vld [vmem:[#allocation10 + $0x1b8] sm:$0xff]  }
 0x5ae   :  { %vm5193_vm3 = vcmp.ge.f32.partialorder %v5187_v41, 0.0  ;;  %v5199_v46 = vmul.f32 %v5197_v17, %v5187_v41  ;;  %v7517_v25 = vld [vmem:[#allocation10 + $0x1f8] sm:$0xff]   ;;  %v7522_v33 = vld [vmem:[#allocation10 + $0x1a0] sm:$0xff]  }
 0x5af   :  { %v5172_v21 = vpop.f32.mrf.mxu0 }
 0x5b0   :  { %v5204_v24 = vsel %vm5193_vm3, %v5187_v41, %v5199_v46  ;;  %v5188_v18 = vadd.f32 %v5172_v21, %v5054_v50  ;;  %v7521_v41 = vld [vmem:[#allocation10 + $0x1e8] sm:$0xff]   ;;  %v7523_v50 = vld [vmem:[#allocation10 + $0x1e0] sm:$0xff]   ;;  %v7524_v46 = vld [vmem:[#allocation10 + $0x198] sm:$0xff]  }
 0x5b1   :  { %5209 = vst [vmem:[#allocation3 + $0x9] sm:$0xff] %v5204_v24  ;;  %v6764_v61 = vpop.f32.mrf.mxu0  ;;  %v5352_v2 = vpack.c.bf16 %v5204_v24, %v5203_v60  ;;  %v7520_v60 = vld [vmem:[#allocation10 + $0x1a8] sm:$0xff]   ;;  %v7525_v21 = vld [vmem:[#allocation10 + $0x1d8] sm:$0xff]   ;;  %v7527_v24 = vld [vmem:[#allocation10 + $0x1d0] sm:$0xff]  }
 0x5b2   :  { %vm5194_vm4 = vcmp.ge.f32.partialorder %v5188_v18, 0.0  ;;  %v5200_v5 = vmul.f32 %v5197_v17, %v5188_v18  ;;  %v7529_v61 = vld [vmem:[#allocation10 + $0x1c8] sm:$0xff]  }
 0x5b3   :  { %v5175_v10 = vpop.f32.mrf.mxu0  ;;  %6815 = vmatmul.mubr.bf16.vlgmr.msra.gmra.mxu0 %v5352_v2  ;;  %v7530_v2 = vld [vmem:[#allocation10 + $0x180] sm:$0xff]  }
 0x5b4   :  { %v5205_v51 = vsel %vm5194_vm4, %v5188_v18, %v5200_v5  ;;  %v5189_v59 = vadd.f32 %v5175_v10, %v5055_v63  ;;  %6818 = vmatprep.mubr.msk.bf16.mxu0 %vm7741_vm14, %v8750_v15  ;;  %v5213_v22 = vld [vmem:[#allocation3] sm:$0xff]  ;;  %6855 = vmatpush3.bf16.msra.mxu0 %v7516_v43  ;;  %v7528_v18 = vld [vmem:[#allocation10 + $0x188] sm:$0xff]   ;;  %v7531_v63 = vld [vmem:[#allocation10 + $0x1c0] sm:$0xff]  }
 0x5b5   :  { %5210 = vst [vmem:[#allocation3 + $0x11] sm:$0xfe] %v5205_v51  ;;  %v6765_v56 = vpop.f32.mrf.mxu0  ;;  %6856 = vmatprep.subr.bf16.mxu0 %v8750_v15 }
 0x5b6   :  { %vm5195_vm5 = vcmp.ge.f32.partialorder %v5189_v59, 0.0  ;;  %v5201_v38 = vmul.f32 %v5197_v17, %v5189_v59 }
 0x5b7   :  { %v5180_v13 = vpop.f32.mrf.mxu0 }
 0x5b8   :  { %v5206_v7 = vsel %vm5195_vm5, %v5189_v59, %v5201_v38  ;;  %v5190_v32 = vadd.f32 %v5180_v13, %v5056_v27  ;;  %v5214_v11 = vld [vmem:[#allocation3 + $0x8] sm:$0xff]  ;;  %6857 = vmatpush3.bf16.msra.mxu0 %v7518_v29 }
 0x5b9   :  { %5211 = vst [vmem:[#allocation3 + $0x19] sm:$0xff] %v5206_v7  ;;  %v5218_v52 = vpack.c.bf16 %v5214_v11, %v5213_v22  ;;  %v6768_v8 = vpop.f32.mrf.mxu0  ;;  %v5482_v42 = vld [vmem:[#allocation3 + $0xa] sm:$0xff]  ;;  %6858 = vmatprep.subr.bf16.mxu0 %v8750_v15 }
 0x5ba   :  { %vm5196_vm6 = vcmp.ge.f32.partialorder %v5190_v32, 0.0  ;;  %v5202_v9 = vmul.f32 %v5197_v17, %v5190_v32  ;;  %v5481_v17 = vld [vmem:[#allocation3 + $0x2] sm:$0xff] }
 0x5bb   :  { %6787 = vmatmul.mubr.bf16.vlgmr.msra.gmra.mxu1 %v5218_v52  ;;  %v5183_v31 = vpop.f32.mrf.mxu0  ;;  %v5486_v54 = vpack.c.bf16 %v5482_v42, %v5481_v17 }
 0x5bc   :  { %v5207_v55 = vsel %vm5196_vm6, %v5190_v32, %v5202_v9  ;;  %6827 = vmatpush3.bf16.msra.mxu1 %v7508_v6  ;;  %6790 = vmatprep.mubr.msk.bf16.mxu1 %vm7741_vm14, %v8750_v15  ;;  %v5349_v30 = vld [vmem:[#allocation3 + $0x11] sm:$0xff] }
 0x5bd   :  { %5212 = vst [vmem:[#allocation3 + $0x21] sm:$0x1] %v5207_v55  ;;  %6828 = vmatprep.subr.bf16.mxu1 %v8750_v15  ;;  %v5353_v12 = vpack.c.bf16 %v5206_v7, %v5349_v30  ;;  %v6769_v39 = vpop.f32.mrf.mxu0  ;;  %v5215_v16 = vld [vmem:[#allocation3 + $0x10] sm:$0xff]  ;;  %6859 = vmatpush3.bf16.msra.mxu0 %v7520_v60 }
 0x5be   :  { %6860 = vmatprep.subr.bf16.mxu0 %v8750_v15 }
 0x5bf   :  { %6819 = vmatmul.mubr.bf16.gmra.mxu0 %v5353_v12 }
 0x5c0   :  { %6829 = vmatpush3.bf16.msra.mxu1 %v7509_v4  ;;  %v5216_v14 = vld [vmem:[#allocation3 + $0x18] sm:$0xff]  ;;  %6822 = vmatprep.mubr.msk.bf16.mxu0 %vm7741_vm14, %v8750_v15  ;;  %v5217_v28 = vld [vmem:[#allocation3 + $0x20] sm:$0x1] }
 0x5c1   :  { %6830 = vmatprep.subr.bf16.mxu1 %v8750_v15  ;;  %v5219_v49 = vpack.c.bf16 %v5216_v14, %v5215_v16  ;;  %v5220_v47 = vpack.c.bf16 %v5217_v28, %v5217_v28  ;;  %v5483_v53 = vld [vmem:[#allocation3 + $0x12] sm:$0xff]  ;;  %6861 = vmatpush3.bf16.msra.mxu0 %v7522_v33 }
 0x5c2   :  { %6862 = vmatprep.subr.bf16.mxu0 %v8750_v15  ;;  %v6479_v14 = vld [vmem:[#allocation16 + $0x1] ss:$0 sm:$0xff] }
 0x5c3   :  { %6791 = vmatmul.mubr.bf16.gmra.mxu1 %v5219_v49 }
 0x5c4   :  { %6831 = vmatpush3.bf16.msra.mxu1 %v7510_v36  ;;  %6794 = vmatprep.mubr.msk.bf16.mxu1 %vm7741_vm14, %v8750_v15  ;;  %v5351_v20 = vld [vmem:[#allocation3 + $0x21] sm:$0x1] }
 0x5c5   :  { %6832 = vmatprep.subr.bf16.mxu1 %v8750_v15  ;;  %v5354_v48 = vpack.c.bf16 %v5351_v20, %v5351_v20  ;;  %v5484_v57 = vld [vmem:[#allocation3 + $0x1a] sm:$0xff]  ;;  %6863 = vmatpush3.bf16.msra.mxu0 %v7524_v46 }
 0x5c6   :  { %v5487_v40 = vpack.c.bf16 %v5484_v57, %v5483_v53  ;;  %6864 = vmatprep.subr.bf16.mxu0 %v8750_v15 }
 0x5c7   :  { %6823 = vmatmul.mubr.bf16.gmra.mxu0 %v5354_v48  ;;  %v5621_v48 = vstv %s6504_s10 }
 0x5c8   :  { %6833 = vmatpush3.bf16.msra.mxu1 %v7511_v62  ;;  %6870 = vmatprep.mubr.msk.bf16.mxu0 %vm7741_vm14, %v8750_v15 }
 0x5c9   :  { %6834 = vmatprep.subr.bf16.mxu1 %v8750_v15  ;;  %6865 = vmatpush3.bf16.msra.mxu0 %v7526_v1 }
 0x5ca   :  { %6866 = vmatprep.subr.bf16.mxu0 %v8750_v15 }
 0x5cb   :  { %6795 = vmatmul.mubr.bf16.gmra.mxu1 %v5220_v47 }
 0x5cc   :  { %6835 = vmatpush3.bf16.msra.mxu1 %v7512_v58  ;;  %6842 = vmatprep.mubr.msk.bf16.mxu1 %vm7741_vm14, %v8750_v15 }
 0x5cd   :  { %6836 = vmatprep.subr.bf16.mxu1 %v8750_v15  ;;  %6867 = vmatpush3.bf16.msra.mxu0 %v7528_v18 }
 0x5ce   :  { %6868 = vmatprep.subr.bf16.mxu0 %v8750_v15 }
 0x5d0   :  { %6837 = vmatpush3.bf16.msra.mxu1 %v7513_v37 }
 0x5d1   :  { %6838 = vmatprep.subr.bf16.mxu1 %v8750_v15  ;;  %6869 = vmatpush3.bf16.msra.mxu0 %v7530_v2 }
 0x5d2   :  { %6910 = vmatprep.subr.bf16.mxu0 %v8750_v15 }
 0x5d4   :  { %6839 = vmatpush3.bf16.msra.mxu1 %v7514_v0 }
 0x5d5   :  { %6840 = vmatprep.subr.bf16.mxu1 %v8750_v15 }
 0x5d8   :  { %6841 = vmatpush3.bf16.msra.mxu1 %v7515_v19 }
 0x5d9   :  { %6882 = vmatprep.subr.bf16.mxu1 %v8750_v15 }
 0x5db   :  { %6843 = vmatmul.mubr.bf16.vlgmr.msra.gmra.mxu1 %v5486_v54 }
 0x5dc   :  { %6846 = vmatprep.mubr.msk.bf16.mxu1 %vm7741_vm14, %v8750_v15  ;;  %6883 = vmatpush3.bf16.msra.mxu1 %v7517_v25 }
 0x5dd   :  { %6884 = vmatprep.subr.bf16.mxu1 %v8750_v15 }
 0x5e0   :  { %6885 = vmatpush3.bf16.msra.mxu1 %v7519_v45 }
 0x5e1   :  { %6886 = vmatprep.subr.bf16.mxu1 %v8750_v15 }
 0x5e3   :  { %6847 = vmatmul.mubr.bf16.gmra.mxu1 %v5487_v40 }
 0x5e4   :  { %6850 = vmatprep.mubr.msk.bf16.mxu1 %vm7741_vm14, %v8750_v15  ;;  %6887 = vmatpush3.bf16.msra.mxu1 %v7521_v41 }
 0x5e5   :  { %6888 = vmatprep.subr.bf16.mxu1 %v8750_v15 }
 0x5e8   :  { %6889 = vmatpush3.bf16.msra.mxu1 %v7523_v50 }
 0x5e9   :  { %6890 = vmatprep.subr.bf16.mxu1 %v8750_v15 }
 0x5eb   :  { %6851 = vmatmul.mubr.bf16.gmra.mxu1 %v5488_v3 }
 0x5ec   :  { %6898 = vmatprep.mubr.msk.bf16.mxu1 %vm7741_vm14, %v8750_v15  ;;  %6891 = vmatpush3.bf16.msra.mxu1 %v7525_v21 }
 0x5ed   :  { %6892 = vmatprep.subr.bf16.mxu1 %v8750_v15 }
 0x5f0   :  { %6893 = vmatpush3.bf16.msra.mxu1 %v7527_v24 }
 0x5f1   :  { %6894 = vmatprep.subr.bf16.mxu1 %v8750_v15 }
 0x5f4   :  { %6895 = vmatpush3.bf16.msra.mxu1 %v7529_v61 }
 0x5f5   :  { %6896 = vmatprep.subr.bf16.mxu1 %v8750_v15 }
 0x5f8   :  { %6897 = vmatpush3.bf16.msra.mxu1 %v7531_v63 }
 0x673   :  { %v5454_v5 = vpop.f32.mrf.mxu0 }
 0x675   :  { %v6816_v10 = vpop.f32.mrf.mxu0 }
 0x676   :  { %v7532_v10 = vld [vmem:[#allocation10 + $0x238] sm:$0xff]  }
 0x677   :  { %v5457_v34 = vpop.f32.mrf.mxu0 }
 0x679   :  { %v6817_v51 = vpop.f32.mrf.mxu0 }
 0x67b   :  { %v5325_v59 = vpop.f32.mrf.mxu1 }
 0x67c   :  { %v5326_v36 = vadd.f32 %v6479_v14, %v5325_v59 }
 0x67d   :  { %v6788_v56 = vpop.f32.mrf.mxu1 }
 0x67e   :  { %v5476_v49 = vadd.f32 %v5454_v5, %v5326_v36 }
 0x67f   :  { %v5328_v27 = vpop.f32.mrf.mxu1  ;;  %v5462_v38 = vpop.f32.mrf.mxu0 }
 0x680   :  { %v5329_v62 = vadd.f32 %v6479_v14, %v5328_v27 }
 0x681   :  { %v6789_v13 = vpop.f32.mrf.mxu1  ;;  %v6820_v7 = vpop.f32.mrf.mxu0 }
 0x682   :  { %v5477_v47 = vadd.f32 %v5457_v34, %v5329_v62 }
 0x683   :  { %v5333_v32 = vpop.f32.mrf.mxu1  ;;  %v5465_v22 = vpop.f32.mrf.mxu0 }
 0x684   :  { %v5334_v37 = vadd.f32 %v6479_v14, %v5333_v32 }
 0x685   :  { %v6792_v11 = vpop.f32.mrf.mxu1  ;;  %v6821_v6 = vpop.f32.mrf.mxu0 }
 0x686   :  { %v5478_v57 = vadd.f32 %v5462_v38, %v5334_v37  ;;  %v7533_v38 = vld [vmem:[#allocation10 + $0x230] sm:$0xff]   ;;  %v7534_v6 = vld [vmem:[#allocation10 + $0x228] sm:$0xff]  }
 0x687   :  { %v5336_v52 = vpop.f32.mrf.mxu1  ;;  %v5470_v8 = vpop.f32.mrf.mxu0 }
 0x688   :  { %v5337_v53 = vadd.f32 %v6479_v14, %v5336_v52 }
 0x689   :  { %v6793_v9 = vpop.f32.mrf.mxu1  ;;  %v6824_v31 = vpop.f32.mrf.mxu0 }
 0x68a   :  { %v5479_v45 = vadd.f32 %v5465_v22, %v5337_v53 }
 0x68b   :  { %v5341_v55 = vpop.f32.mrf.mxu1  ;;  %v5473_v4 = vpop.f32.mrf.mxu0 }
 0x68c   :  { %v5342_v60 = vadd.f32 %v6479_v14, %v5341_v55  ;;  %v7536_v4 = vld [vmem:[#allocation10 + $0x218] sm:$0xff]  }
 0x68d   :  { %v6796_v30 = vpop.f32.mrf.mxu1  ;;  %v6825_v12 = vpop.f32.mrf.mxu0 }
 0x68e   :  { %v5480_v1 = vadd.f32 %v5470_v8, %v5342_v60  ;;  %v7535_v8 = vld [vmem:[#allocation10 + $0x220] sm:$0xff]   ;;  %v7537_v12 = vld [vmem:[#allocation10 + $0x210] sm:$0xff]  }
 0x68f   :  { %v5344_v39 = vpop.f32.mrf.mxu1 }
 0x690   :  { %v7538_v39 = vld [vmem:[#allocation10 + $0x208] sm:$0xff]  }
 0x691   :  { %v6797_v16 = vpop.f32.mrf.mxu1 }
 0x692   :  { %v7539_v16 = vld [vmem:[#allocation10 + $0x200] sm:$0xff]  }
 0x69b   :  { %v5588_v20 = vpop.f32.mrf.mxu1 }
 0x69c   :  { %v5610_v28 = vadd.f32 %v5588_v20, %v5476_v49 }
 0x69d   :  { %v6844_v58 = vpop.f32.mrf.mxu1 }
 0x69e   :  { %vm5616_vm7 = vcmp.ge.f32.partialorder %v5610_v28, 0.0  ;;  %v5622_v0 = vmul.f32 %v5621_v48, %v5610_v28 }
 0x69f   :  { %v5591_v19 = vpop.f32.mrf.mxu1 }
 0x6a0   :  { %v5627_v17 = vsel %vm5616_vm7, %v5610_v28, %v5622_v0  ;;  %v5611_v42 = vadd.f32 %v5591_v19, %v5477_v47  ;;  %v5909_v28 = vld [vmem:[#allocation3 + $0x22] sm:$0x1] }
 0x6a1   :  { %5632 = vst [vmem:[#allocation3 + $0x1] sm:$0xff] %v5627_v17  ;;  %v6845_v54 = vpop.f32.mrf.mxu1  ;;  %v5912_v58 = vpack.c.bf16 %v5909_v28, %v5909_v28 }
 0x6a2   :  { %vm5617_vm8 = vcmp.ge.f32.partialorder %v5611_v42, 0.0  ;;  %v5623_v40 = vmul.f32 %v5621_v48, %v5611_v42 }
 0x6a3   :  { %v5596_v23 = vpop.f32.mrf.mxu1 }
 0x6a4   :  { %v5628_v3 = vsel %vm5617_vm8, %v5611_v42, %v5623_v40  ;;  %v5612_v43 = vadd.f32 %v5596_v23, %v5478_v57 }
 0x6a5   :  { %5633 = vst [vmem:[#allocation3 + $0x9] sm:$0xff] %v5628_v3  ;;  %v6848_v25 = vpop.f32.mrf.mxu1  ;;  %v5776_v29 = vpack.c.bf16 %v5628_v3, %v5627_v17 }
 0x6a6   :  { %vm5618_vm9 = vcmp.ge.f32.partialorder %v5612_v43, 0.0  ;;  %v5624_v41 = vmul.f32 %v5621_v48, %v5612_v43 }
 0x6a7   :  { %v5599_v33 = vpop.f32.mrf.mxu1  ;;  %6899 = vmatmul.mubr.bf16.vlgmr.msra.gmra.mxu1 %v5776_v29 }
 0x6a8   :  { %v5629_v50 = vsel %vm5618_vm9, %v5612_v43, %v5624_v41  ;;  %v5613_v46 = vadd.f32 %v5599_v33, %v5479_v45  ;;  %6902 = vmatprep.mubr.msk.bf16.mxu1 %vm7741_vm14, %v8750_v15  ;;  %v5637_v63 = vld [vmem:[#allocation3] sm:$0xff] }
 0x6a9   :  { %5634 = vst [vmem:[#allocation3 + $0x11] sm:$0xfe] %v5629_v50  ;;  %v6849_v21 = vpop.f32.mrf.mxu1 }
 0x6aa   :  { %vm5619_vm10 = vcmp.ge.f32.partialorder %v5613_v46, 0.0  ;;  %v5625_v24 = vmul.f32 %v5621_v48, %v5613_v46 }
 0x6ab   :  { %v5604_v18 = vpop.f32.mrf.mxu1 }
 0x6ac   :  { %v5630_v61 = vsel %vm5619_vm10, %v5613_v46, %v5625_v24  ;;  %v5614_v2 = vadd.f32 %v5604_v18, %v5480_v1  ;;  %v5638_v5 = vld [vmem:[#allocation3 + $0x8] sm:$0xff]  ;;  %v6505_v24 = vld [vmem:[#allocation16 + $0x2] ss:$0 sm:$0xff] }
 0x6ad   :  { %5635 = vst [vmem:[#allocation3 + $0x19] sm:$0xff] %v5630_v61  ;;  %v5642_v34 = vpack.c.bf16 %v5638_v5, %v5637_v63  ;;  %v6852_v51 = vpop.f32.mrf.mxu1  ;;  %v5905_v14 = vld [vmem:[#allocation3 + $0x2] sm:$0xff]  ;;  %v5906_v36 = vld [vmem:[#allocation3 + $0xa] sm:$0xff]  ;;  %v6045_v5 = vstv %s6530_s4 }
 0x6ae   :  { %vm5620_vm11 = vcmp.ge.f32.partialorder %v5614_v2, 0.0  ;;  %v5626_v59 = vmul.f32 %v5621_v48, %v5614_v2  ;;  %v5910_v49 = vpack.c.bf16 %v5906_v36, %v5905_v14 }
 0x6af   :  { %6871 = vmatmul.mubr.bf16.vlgmr.msra.gmra.mxu0 %v5642_v34  ;;  %v5607_v56 = vpop.f32.mrf.mxu1 }
 0x6b0   :  { %v5631_v27 = vsel %vm5620_vm11, %v5614_v2, %v5626_v59  ;;  %6911 = vmatpush3.bf16.msra.mxu0 %v7532_v10  ;;  %6874 = vmatprep.mubr.msk.bf16.mxu0 %vm7741_vm14, %v8750_v15  ;;  %v5773_v13 = vld [vmem:[#allocation3 + $0x11] sm:$0xff] }
 0x6b1   :  { %5636 = vst [vmem:[#allocation3 + $0x21] sm:$0x1] %v5631_v27  ;;  %6912 = vmatprep.subr.bf16.mxu0 %v8750_v15  ;;  %v5777_v7 = vpack.c.bf16 %v5630_v61, %v5773_v13  ;;  %v6853_v32 = vpop.f32.mrf.mxu1  ;;  %v5639_v22 = vld [vmem:[#allocation3 + $0x10] sm:$0xff] }
 0x6b3   :  { %6903 = vmatmul.mubr.bf16.gmra.mxu1 %v5777_v7 }
 0x6b4   :  { %6913 = vmatpush3.bf16.msra.mxu0 %v7533_v38  ;;  %v5640_v11 = vld [vmem:[#allocation3 + $0x18] sm:$0xff]  ;;  %6906 = vmatprep.mubr.msk.bf16.mxu1 %vm7741_vm14, %v8750_v15  ;;  %v5641_v55 = vld [vmem:[#allocation3 + $0x20] sm:$0x1] }
 0x6b5   :  { %6914 = vmatprep.subr.bf16.mxu0 %v8750_v15  ;;  %v5643_v52 = vpack.c.bf16 %v5640_v11, %v5639_v22  ;;  %v5644_v30 = vpack.c.bf16 %v5641_v55, %v5641_v55  ;;  %v5907_v20 = vld [vmem:[#allocation3 + $0x12] sm:$0xff] }
 0x6b7   :  { %6875 = vmatmul.mubr.bf16.gmra.mxu0 %v5643_v52 }
 0x6b8   :  { %6915 = vmatpush3.bf16.msra.mxu0 %v7534_v6  ;;  %6878 = vmatprep.mubr.msk.bf16.mxu0 %vm7741_vm14, %v8750_v15  ;;  %v5775_v9 = vld [vmem:[#allocation3 + $0x21] sm:$0x1] }
 0x6b9   :  { %6916 = vmatprep.subr.bf16.mxu0 %v8750_v15  ;;  %v5778_v31 = vpack.c.bf16 %v5775_v9, %v5775_v9  ;;  %v5908_v62 = vld [vmem:[#allocation3 + $0x1a] sm:$0xff] }
 0x6ba   :  { %v5911_v48 = vpack.c.bf16 %v5908_v62, %v5907_v20 }
 0x6bb   :  { %6907 = vmatmul.mubr.bf16.gmra.mxu1 %v5778_v31 }
 0x6bc   :  { %6917 = vmatpush3.bf16.msra.mxu0 %v7535_v8 }
 0x6bd   :  { %6918 = vmatprep.subr.bf16.mxu0 %v8750_v15 }
 0x6bf   :  { %6879 = vmatmul.mubr.bf16.gmra.mxu0 %v5644_v30 }
 0x6c0   :  { %6919 = vmatpush3.bf16.msra.mxu0 %v7536_v4  ;;  %6926 = vmatprep.mubr.msk.bf16.mxu0 %vm7741_vm14, %v8750_v15 }
 0x6c1   :  { %6920 = vmatprep.subr.bf16.mxu0 %v8750_v15 }
 0x6c4   :  { %6921 = vmatpush3.bf16.msra.mxu0 %v7537_v12 }
 0x6c5   :  { %6922 = vmatprep.subr.bf16.mxu0 %v8750_v15 }
 0x6c8   :  { %6923 = vmatpush3.bf16.msra.mxu0 %v7538_v39 }
 0x6c9   :  { %6924 = vmatprep.subr.bf16.mxu0 %v8750_v15 }
 0x6cc   :  { %6925 = vmatpush3.bf16.msra.mxu0 %v7539_v16 }
 0x6cf   :  { %6927 = vmatmul.mubr.bf16.vlgmr.msra.gmra.mxu0 %v5910_v49 }
 0x6d0   :  { %6930 = vmatprep.mubr.msk.bf16.mxu0 %vm7741_vm14, %v8750_v15 }
 0x6d7   :  { %6931 = vmatmul.mubr.bf16.gmra.mxu0 %v5911_v48 }
 0x6d8   :  { %6934 = vmatprep.mubr.msk.bf16.mxu0 %vm7741_vm14, %v8750_v15 }
 0x6df   :  { %6935 = vmatmul.mubr.bf16.gmra.mxu0 %v5912_v58 }
 0x767   :  { %v5878_v47 = vpop.f32.mrf.mxu1 }
 0x769   :  { %v6900_v37 = vpop.f32.mrf.mxu1 }
 0x76b   :  { %v5881_v0 = vpop.f32.mrf.mxu1 }
 0x76d   :  { %v6901_v19 = vpop.f32.mrf.mxu1 }
 0x76f   :  { %v5749_v17 = vpop.f32.mrf.mxu0 }
 0x770   :  { %v5750_v18 = vadd.f32 %v6505_v24, %v5749_v17 }
 0x771   :  { %v6872_v42 = vpop.f32.mrf.mxu0 }
 0x772   :  { %v5900_v61 = vadd.f32 %v5878_v47, %v5750_v18 }
 0x773   :  { %v5752_v54 = vpop.f32.mrf.mxu0  ;;  %v5886_v57 = vpop.f32.mrf.mxu1 }
 0x774   :  { %v5753_v2 = vadd.f32 %v6505_v24, %v5752_v54 }
 0x775   :  { %v6873_v53 = vpop.f32.mrf.mxu0  ;;  %v6904_v40 = vpop.f32.mrf.mxu1 }
 0x776   :  { %v5901_v51 = vadd.f32 %v5881_v0, %v5753_v2  ;;  %v8751_v53 = vld [vmem:[#allocation25_spill] sm:$0xff] }
 0x777   :  { %v5757_v23 = vpop.f32.mrf.mxu0  ;;  %v5889_v3 = vpop.f32.mrf.mxu1 }
 0x778   :  { %v5758_v59 = vadd.f32 %v6505_v24, %v5757_v23 }
 0x779   :  { %v6876_v43 = vpop.f32.mrf.mxu0  ;;  %v6905_v25 = vpop.f32.mrf.mxu1 }
 0x77a   :  { %v5902_v22 = vadd.f32 %v5886_v57, %v5758_v59 }
 0x77b   :  { %v5760_v29 = vpop.f32.mrf.mxu0  ;;  %v5894_v45 = vpop.f32.mrf.mxu1 }
 0x77c   :  { %v5761_v11 = vadd.f32 %v6505_v24, %v5760_v29 }
 0x77d   :  { %v6877_v15 = vpop.f32.mrf.mxu0  ;;  %v6908_v60 = vpop.f32.mrf.mxu1 }
 0x77e   :  { %v5903_v4 = vadd.f32 %v5889_v3, %v5761_v11 }
 0x77f   :  { %v5765_v41 = vpop.f32.mrf.mxu0  ;;  %v5897_v33 = vpop.f32.mrf.mxu1 }
 0x780   :  { %v5766_v30 = vadd.f32 %v6505_v24, %v5765_v41 }
 0x781   :  { %v6880_v50 = vpop.f32.mrf.mxu0  ;;  %v6909_v46 = vpop.f32.mrf.mxu1 }
 0x782   :  { %v5904_v14 = vadd.f32 %v5894_v45, %v5766_v30 }
 0x783   :  { %v5768_v21 = vpop.f32.mrf.mxu0 }
 0x785   :  { %v6881_v1 = vpop.f32.mrf.mxu0 }
 0x78f   :  { %v6012_v63 = vpop.f32.mrf.mxu0 }
 0x790   :  { %v6034_v10 = vadd.f32 %v6012_v63, %v5900_v61 }
 0x791   :  { %v6928_v34 = vpop.f32.mrf.mxu0 }
 0x792   :  { %vm6040_vm14 = vcmp.ge.f32.partialorder %v6034_v10, 0.0  ;;  %v6046_v56 = vmul.f32 %v6045_v5, %v6034_v10 }
 0x793   :  { %v6015_v27 = vpop.f32.mrf.mxu0 }
 0x794   :  { %v6051_v38 = vsel %vm6040_vm14, %v6034_v10, %v6046_v56  ;;  %v6035_v13 = vadd.f32 %v6015_v27, %v5901_v51 }
 0x795   :  { %v6056_v7 = vadd.f32 %v6051_v38, %v7948_v26  ;;  %v6929_v32 = vpop.f32.mrf.mxu0 }
 0x796   :  { %vm6041_vm0 = vcmp.ge.f32.partialorder %v6035_v13, 0.0  ;;  %v6047_v6 = vmul.f32 %v6045_v5, %v6035_v13 }
 0x797   :  { %6058 = vst [vmem:[%s8745_s11] sm:$0xff] %v6056_v7  ;;  %v6020_v52 = vpop.f32.mrf.mxu0 }
 0x798   :  { %v6052_v8 = vsel %vm6041_vm0, %v6035_v13, %v6047_v6  ;;  %v6036_v9 = vadd.f32 %v6020_v52, %v5902_v22 }
 0x799   :  { %v6057_v31 = vadd.f32 %v6052_v8, %v7954_v35  ;;  %v6932_v55 = vpop.f32.mrf.mxu0 }
 0x79a   :  { %v6048_v12 = vmul.f32 %v6045_v5, %v6036_v9  ;;  %vm6042_vm12 = vcmp.ge.f32.partialorder %v6036_v9, 0.0 }
 0x79b   :  { %6059 = vst [vmem:[%s8745_s11 + $0x8] sm:$0xff] %v6057_v31  ;;  %v6023_v26 = vpop.f32.mrf.mxu0 }
 0x79c   :  { %v6037_v39 = vadd.f32 %v6023_v26, %v5903_v4  ;;  %v6053_v36 = vsel %vm6042_vm12, %v6036_v9, %v6048_v12 }
 0x79d   :  { %v6933_v16 = vpop.f32.mrf.mxu0  ;;  %v6063_v35 = vrot.slane %v6053_v36, 1 }
 0x79e   :  { %vm6043_vm13 = vcmp.ge.f32.partialorder %v6037_v39, 0.0  ;;  %v6049_v49 = vmul.f32 %v6045_v5, %v6037_v39 }
 0x79f   :  { %v6028_v62 = vpop.f32.mrf.mxu0 }
 0x7a0   :  { %v6054_v20 = vsel %vm6043_vm13, %v6037_v39, %v6049_v49  ;;  %v6038_v48 = vadd.f32 %v6028_v62, %v5904_v14 }
 0x7a1   :  { %v6064_v28 = vrot.slane %v6054_v20, 1  ;;  %v6936_v58 = vpop.f32.mrf.mxu0 }
 0x7a2   :  { %vm6044_vm15 = vcmp.ge.f32.partialorder %v6038_v48, 0.0  ;;  %v6050_v47 = vmul.f32 %v6045_v5, %v6038_v48 }
 0x7a3   :  { %v6065_v37 = vsel %vm2023_vm1, %v6063_v35, %v6064_v28  ;;  %v6031_v0 = vpop.f32.mrf.mxu0 }
 0x7a4   :  { %v6070_v19 = vadd.f32 %v6065_v37, %v7960_v44  ;;  %v6055_v17 = vsel %vm6044_vm15, %v6038_v48, %v6050_v47 }
 0x7a5   :  { %v6066_v42 = vrot.slane %v6055_v17, 1  ;;  %v6937_v54 = vpop.f32.mrf.mxu0 }
 0x7a6   :  { %6072 = vst [vmem:[%s8745_s11 + $0x10] sm:$0xff] %v6070_v19 }
 0x7a7   :  { %v6067_v57 = vsel %vm2023_vm1, %v6064_v28, %v6066_v42 }
 0x7a8   :  { %v6071_v40 = vadd.f32 %v6067_v57, %v8751_v53 }
 0x7aa   :  { %6073 = vst [vmem:[%s8745_s11 + $0x18] sm:$0xff] %v6071_v40 }
 0x7ab   :  { %6082 = vsyncpa [#allocation5], 1 }
 0x7ac   :  { %6083 = vsyncpa [#allocation8], 1 }
 0x7ad   :  { %6084 = vsyncpa [#allocation11], 1 }
 0x7ae   :  { %6085 = vsyncpa [#allocation14], 1 }
 0x7af   :  { %6086 = vsyncpa [#allocation17], 1 }
 0x7b0   :  { %6087 = vsyncpa [#allocation6], 1 }

</bundles_post_ra>
